<compile_context>
chip_gen: v6e
topology: v6e:2x2x1
jax: 0.10.0
libtpu: 0.0.40
codegen_flags: <defaults>
</compile_context>

<pallas_src>
import functools

import jax
import jax.numpy as jnp
from jax.experimental import pallas as pl
from jax.experimental.pallas import tpu as pltpu


_ROW_TILE = 256                      # fixed row-tile cap (multiple of 8)
_VMEM_LIMIT = 64 * 1024 * 1024       # explicit scoped-VMEM budget (v5e default is 16 MiB)


def _round_up(x, m):
    return ((x + m - 1) // m) * m


def _row_tile(T):
    """Fixed row tile: min(256, T rounded up to a multiple of 8)."""
    return min(_ROW_TILE, _round_up(T, 8))


# ----------------------------------------------------------------------------
# In-kernel helpers (traced inside Pallas kernels)
# ----------------------------------------------------------------------------
def _ln_f32(x, g, b, eps=1e-5):
    x = x.astype(jnp.float32)
    mean = jnp.mean(x, axis=-1, keepdims=True)
    xc = x - mean
    var = jnp.mean(xc * xc, axis=-1, keepdims=True)
    return xc * jax.lax.rsqrt(var + eps) * g + b


def _mm(x, w, b=None):
    """bf16 MXU matmul with f32 accumulation (+ optional f32 bias)."""
    y = jnp.dot(x.astype(jnp.bfloat16), w.astype(jnp.bfloat16),
                preferred_element_type=jnp.float32)
    if b is not None:
        y = y + b
    return y


def _mm_t(x, w_t, b=None):
    """x @ w_t.T with bf16 operands and f32 accumulation (w_t stored (out, in))."""
    y = jax.lax.dot_general(x.astype(jnp.bfloat16), w_t.astype(jnp.bfloat16),
                            (((1,), (1,)), ((), ())),
                            preferred_element_type=jnp.float32)
    if b is not None:
        y = y + b
    return y


def _quickgelu(x):
    return x * jax.nn.sigmoid(1.702 * x)


# ----------------------------------------------------------------------------
# Fused LayerNorm + MLP (QuickGELU) + residual, row-tiled
# ----------------------------------------------------------------------------
def _ln_mlp_res_kernel(x_ref, g_ref, b_ref, w1_ref, b1_ref, w2_ref, b2_ref, o_ref):
    x = x_ref[...].astype(jnp.float32)
    h = _ln_f32(x, g_ref[...], b_ref[...])
    h = _quickgelu(_mm(h, w1_ref[...], b1_ref[...]))
    h = _mm(h, w2_ref[...], b2_ref[...])
    o_ref[...] = (x + h).astype(o_ref.dtype)


def ln_mlp_residual(x2d, g, b, w1, b1, w2, b2, out_dtype=jnp.float32):
    T, D = x2d.shape
    Dh = w1.shape[1]
    tm = _row_tile(T)
    Tp = _round_up(T, tm)
    xp = jnp.pad(x2d, ((0, Tp - T), (0, 0))) if Tp != T else x2d
    const = lambda i: (0, 0)
    row = lambda i: (i, 0)
    out = pl.pallas_call(
        _ln_mlp_res_kernel,
        grid=(Tp // tm,),
        in_specs=[
            pl.BlockSpec((tm, D), row),
            pl.BlockSpec((1, D), const),
            pl.BlockSpec((1, D), const),
            pl.BlockSpec((D, Dh), const),
            pl.BlockSpec((1, Dh), const),
            pl.BlockSpec((Dh, D), const),
            pl.BlockSpec((1, D), const),
        ],
        out_specs=pl.BlockSpec((tm, D), row),
        out_shape=jax.ShapeDtypeStruct((Tp, D), out_dtype),
        compiler_params=pltpu.CompilerParams(
            dimension_semantics=("parallel",),
            vmem_limit_bytes=_VMEM_LIMIT),
    )(xp, g.reshape(1, D), b.reshape(1, D),
      w1, b1.reshape(1, Dh), w2, b2.reshape(1, D))
    return out[:T] if Tp != T else out


# ----------------------------------------------------------------------------
# Fused LN + per-head QKV + attention + out-proj + residual, grid=(B, n_head)
# (torch.nn.MultiheadAttention semantics, eval mode, average_attn_weights=True)
# ----------------------------------------------------------------------------
def _mha_head_kernel(*refs, n_head, masked, self_attn, return_probs):
    it = iter(refs)
    qin_ref = next(it)
    kvin_ref = None if self_attn else next(it)
    g_ref, be_ref = next(it), next(it)
    wq_ref, bq_ref = next(it), next(it)
    wk_ref, bk_ref = next(it), next(it)
    wv_ref, bv_ref = next(it), next(it)
    wo_ref, bo_ref = next(it), next(it)
    m_ref = next(it) if masked else None
    out_ref = next(it)
    p_ref = next(it) if return_probs else None
    qn_scr = next(it)
    kn_scr = qn_scr if self_attn else next(it)
    acc_scr = next(it)
    psum_scr = next(it) if return_probs else None

    h = pl.program_id(1)

    @pl.when(h == 0)
    def _init():
        # LayerNorm once per batch element (reused by every head), stored bf16.
        qn_scr[...] = _ln_f32(qin_ref[0], g_ref[...], be_ref[...]).astype(jnp.bfloat16)
        if not self_attn:
            kn_scr[...] = _ln_f32(kvin_ref[0], g_ref[...], be_ref[...]).astype(jnp.bfloat16)
        acc_scr[...] = jnp.zeros_like(acc_scr)
        if return_probs:
            psum_scr[...] = jnp.zeros_like(psum_scr)

    qn = qn_scr[...]                     # (Lq, D) bf16
    kn = kn_scr[...]                     # (Lk, D) bf16

    # Per-head projections; softmax scale already folded into wq/bq.
    qh = _mm_t(qn, wq_ref[0], bq_ref[0])          # (Lq, hd) f32
    kh = _mm_t(kn, wk_ref[0], bk_ref[0])          # (Lk, hd) f32
    vh = _mm_t(kn, wv_ref[0], bv_ref[0])          # (Lk, hd) f32

    s = jax.lax.dot_general(qh.astype(jnp.bfloat16), kh.astype(jnp.bfloat16),
                            (((1,), (1,)), ((), ())),
                            preferred_element_type=jnp.float32)     # (Lq, Lk)
    if masked:
        s = s + m_ref[...]
    s = s - jnp.max(s, axis=-1, keepdims=True)
    e = jnp.exp(s)
    p = e / jnp.sum(e, axis=-1, keepdims=True)    # exact f32 softmax (attn-map parity)

    oh = jnp.dot(p.astype(jnp.bfloat16), vh.astype(jnp.bfloat16),
                 preferred_element_type=jnp.float32)                # (Lq, hd)
    # Accumulate this head's out-projection contribution (== concat @ Wo).
    acc_scr[...] += jnp.dot(oh.astype(jnp.bfloat16), wo_ref[0],
                            preferred_element_type=jnp.float32)     # (Lq, D)
    if return_probs:
        psum_scr[...] += p

    @pl.when(h == n_head - 1)
    def _finalize():
        out_ref[0] = qin_ref[0].astype(jnp.float32) + acc_scr[...] + bo_ref[...]
        if return_probs:
            p_ref[0] = psum_scr[...] * (1.0 / n_head)


def fused_mha(p, q_in, kv_in, ln_g, ln_b, n_head, mask=None, return_probs=False):
    """q_in: (B, Lq, D); kv_in: (B, Lk, D) (any float dtype) or None for self-attn."""
    B, Lq, D = q_in.shape
    assert D % n_head == 0
    hd = D // n_head
    self_attn = kv_in is None
    Lk = Lq if self_attn else kv_in.shape[1]
    masked = mask is not None

    const2 = lambda b, h: (0, 0)
    headw = lambda b, h: (h, 0, 0)
    qmap = lambda b, h: (b, 0, 0)

    arrays = [q_in]
    in_specs = [pl.BlockSpec((1, Lq, D), qmap)]
    if not self_attn:
        arrays.append(kv_in)
        in_specs.append(pl.BlockSpec((1, Lk, D), qmap))
    arrays += [ln_g.reshape(1, D), ln_b.reshape(1, D),
               p["wq"], p["bq"], p["wk"], p["bk"], p["wv"], p["bv"],
               p["wo"], p["bo"].reshape(1, D)]
    in_specs += [pl.BlockSpec((1, D), const2), pl.BlockSpec((1, D), const2),
                 pl.BlockSpec((1, hd, D), headw), pl.BlockSpec((1, 1, hd), headw),
                 pl.BlockSpec((1, hd, D), headw), pl.BlockSpec((1, 1, hd), headw),
                 pl.BlockSpec((1, hd, D), headw), pl.BlockSpec((1, 1, hd), headw),
                 pl.BlockSpec((1, hd, D), headw), pl.BlockSpec((1, D), const2)]
    if masked:
        arrays.append(mask)
        in_specs.append(pl.BlockSpec((Lq, Lk), const2))

    out_shape = [jax.ShapeDtypeStruct((B, Lq, D), jnp.float32)]
    out_specs = [pl.BlockSpec((1, Lq, D), qmap)]
    if return_probs:
        out_shape.append(jax.ShapeDtypeStruct((B, Lq, Lk), jnp.float32))
        out_specs.append(pl.BlockSpec((1, Lq, Lk), qmap))

    scratch = [pltpu.VMEM((Lq, D), jnp.bfloat16)]          # LN'd queries
    if not self_attn:
        scratch.append(pltpu.VMEM((Lk, D), jnp.bfloat16))  # LN'd keys/values
    scratch.append(pltpu.VMEM((Lq, D), jnp.float32))       # out-proj accumulator
    if return_probs:
        scratch.append(pltpu.VMEM((Lq, Lk), jnp.float32))  # head-sum of probs

    res = pl.pallas_call(
        functools.partial(_mha_head_kernel, n_head=n_head, masked=masked,
                          self_attn=self_attn, return_probs=return_probs),
        grid=(B, n_head),
        in_specs=in_specs,
        out_specs=out_specs,
        out_shape=out_shape,
        scratch_shapes=scratch,
        compiler_params=pltpu.CompilerParams(
            dimension_semantics=("parallel", "arbitrary"),
            vmem_limit_bytes=_VMEM_LIMIT),
    )(*arrays)
    return (res[0], res[1]) if return_probs else (res[0], None)


# ----------------------------------------------------------------------------
# Fused output heads: ln_post@proj, bbox_score, bbox MLP (sigmoid)
# score + boxes are packed into one lane-dense (T, 16) output slab.
# ----------------------------------------------------------------------------
def _heads_kernel(x_ref, lng_ref, lnb_ref, proj_ref,
                  ws_ref, bs_ref, w0_ref, b0_ref, w1_ref, b1_ref, w2_ref, b2_ref,
                  feat_ref, small_ref):
    x = x_ref[...].astype(jnp.float32)
    feat_ref[...] = _mm(_ln_f32(x, lng_ref[...], lnb_ref[...]), proj_ref[...])
    score8 = _mm(x, ws_ref[...], bs_ref[...])                 # (tm, 8), col 0 = score
    h = jnp.maximum(_mm(x, w0_ref[...], b0_ref[...]), 0.0)
    h = jnp.maximum(_mm(h, w1_ref[...], b1_ref[...]), 0.0)
    boxes = jax.nn.sigmoid(_mm(h, w2_ref[...], b2_ref[...]))  # (tm, 8)
    small_ref[...] = jnp.concatenate([score8, boxes], axis=-1)  # single (tm,16) store


def fused_heads(x2d, prm):
    T, D = x2d.shape
    Do = prm["proj"].shape[1]
    tm = _row_tile(T)
    Tp = _round_up(T, tm)
    xp = jnp.pad(x2d, ((0, Tp - T), (0, 0))) if Tp != T else x2d
    const = lambda i: (0, 0)
    row = lambda i: (i, 0)
    feat, small = pl.pallas_call(
        _heads_kernel,
        grid=(Tp // tm,),
        in_specs=[
            pl.BlockSpec((tm, D), row),
            pl.BlockSpec((1, D), const), pl.BlockSpec((1, D), const),
            pl.BlockSpec((D, Do), const),
            pl.BlockSpec((D, 8), const), pl.BlockSpec((1, 8), const),
            pl.BlockSpec((D, D), const), pl.BlockSpec((1, D), const),
            pl.BlockSpec((D, D), const), pl.BlockSpec((1, D), const),
            pl.BlockSpec((D, 8), const), pl.BlockSpec((1, 8), const),
        ],
        out_specs=[pl.BlockSpec((tm, Do), row),
                   pl.BlockSpec((tm, 16), row)],
        out_shape=[jax.ShapeDtypeStruct((Tp, Do), jnp.float32),
                   jax.ShapeDtypeStruct((Tp, 16), jnp.float32)],
        compiler_params=pltpu.CompilerParams(
            dimension_semantics=("parallel",),
            vmem_limit_bytes=_VMEM_LIMIT),
    )(xp,
      prm["ln_post_g"].reshape(1, D), prm["ln_post_b"].reshape(1, D),
      prm["proj"],
      prm["bbox_score_w8"], prm["bbox_score_b8"].reshape(1, 8),
      prm["bbox_mlp_w0"], prm["bbox_mlp_b0"].reshape(1, D),
      prm["bbox_mlp_w1"], prm["bbox_mlp_b1"].reshape(1, D),
      prm["bbox_mlp_w2"], prm["bbox_mlp_b2"].reshape(1, 8))
    feat, small = feat[:T], small[:T]
    return feat, small[:, 0:1], small[:, 8:16]


# ----------------------------------------------------------------------------
# HOIResidualAttentionBlock / HOITransformer / HOIVisionTransformer forward
# (all activations kept batch-major: (B, seq, D) — math identical to seq-major)
# ----------------------------------------------------------------------------
def hoi_vit_forward(params, image, prompt_hint, n_head):
    bs, N, c = image.shape
    L = params["hoi_token_embed"].shape[0]
    P = prompt_hint.shape[0]

    # hoi = ln_pre(hoi_token_embed + hoi_pos_embed): tiny, batch-independent ->
    # plain jnp (XLA constant-folds it; no dedicated grid=(1,) pallas_call).
    hoi_tok = params["hoi_token_embed"] + params["hoi_pos_embed"]
    mean = jnp.mean(hoi_tok, axis=-1, keepdims=True)
    var = jnp.mean((hoi_tok - mean) ** 2, axis=-1, keepdims=True)
    hoi_tok = ((hoi_tok - mean) * jax.lax.rsqrt(var + 1e-5)
               * params["ln_pre_g"] + params["ln_pre_b"])
    hoi = jnp.broadcast_to(hoi_tok[None], (bs, L, c)).astype(jnp.float32)

    # image = image + hoi_mlp(hoi_ln(image)); stored bf16 (re-read by every
    # layer's cross-attention -> halves the recurring per-layer K/V DMA).
    image_b = ln_mlp_residual(
        image.reshape(bs * N, c),
        params["hoi_ln_g"], params["hoi_ln_b"],
        params["hoi_fc1_w"], params["hoi_fc1_b"],
        params["hoi_fc2_w"], params["hoi_fc2_b"],
        out_dtype=jnp.bfloat16).reshape(bs, N, c)

    parse_mask = params["parse_attn_mask"][1:, 1:]            # (L+P, L+P) additive
    prompt_b = jnp.broadcast_to(prompt_hint[None], (bs, P, c)).astype(jnp.float32)

    attn_map = None
    n_blocks = len(params["blocks"])
    for li, blk in enumerate(params["blocks"]):
        last = li == n_blocks - 1

        # cross attention: q=ln_1(hoi), k=v=ln_1(image), residual fused in-kernel.
        # head-averaged probs only produced for the last block (the returned map).
        hoi, probs = fused_mha(blk["cross"], hoi, image_b,
                               blk["ln_1_g"], blk["ln_1_b"], n_head,
                               mask=None, return_probs=last)
        if last:
            attn_map = probs                                  # (bs, L, N)

        # mlp: hoi = hoi + c_proj(QuickGELU(c_fc(ln_2(hoi))))
        hoi = ln_mlp_residual(hoi.reshape(bs * L, c),
                              blk["ln_2_g"], blk["ln_2_b"],
                              blk["c_fc_w"], blk["c_fc_b"],
                              blk["c_proj_w"], blk["c_proj_b"]).reshape(bs, L, c)

        # HOI sequential parsing: masked self-attention over [hoi ; prompt_hint].
        x = jnp.concatenate([hoi, prompt_b], axis=1) if P > 0 else hoi
        x, _ = fused_mha(blk["parse"], x, None,
                         blk["hoi_ln1_g"], blk["hoi_ln1_b"], n_head,
                         mask=parse_mask, return_probs=False)
        hoi = x[:, :L]

    # output heads (enable_dec=False branch), one fused kernel.
    hf, score, boxes = fused_heads(hoi.reshape(bs * L, c), params)
    Do = params["proj"].shape[1]
    return {
        "hoi_features": hf.reshape(bs, L, Do),
        "pred_boxes": boxes.reshape(bs, L, 8),
        "box_scores": score.reshape(bs, L, 1),
        "attn_maps": attn_map,
    }


# ----------------------------------------------------------------------------
# Deterministic synthetic parameter init (shapes from __init__; no checkpoints).
# Attention weights are pre-arranged per head ((H, hd, D) rows of in_proj /
# out_proj^T) and the 1/sqrt(hd) softmax scale is folded into Wq/bq.
# ----------------------------------------------------------------------------
def init_params(key, width, layers, heads, output_dim, hoi_token_length, prompt_len):
    D = width
    hd = D // heads
    scale = D ** (-0.5)
    attn_scale = float(hd) ** -0.5
    keys = iter(jax.random.split(key, 1024))

    def randn(shape, s, dtype=jnp.float32):
        return (s * jax.random.normal(next(keys), shape)).astype(dtype)

    def lin(din, dout):
        # matmul weights stored bf16 (native MXU rate, half the HBM/VMEM traffic)
        return randn((din, dout), 0.02, jnp.bfloat16), jnp.zeros((dout,), jnp.float32)

    def ln(d):
        return jnp.ones((d,), jnp.float32), jnp.zeros((d,), jnp.float32)

    def mha():
        def proj():
            return (randn((heads, hd, D), 0.02, jnp.bfloat16),
                    jnp.zeros((heads, 1, hd), jnp.float32))
        wq, bq = proj()
        wk, bk = proj()
        wv, bv = proj()
        # fold the 1/sqrt(hd) attention scale into the query projection (exact reparam)
        wq = (wq.astype(jnp.float32) * attn_scale).astype(jnp.bfloat16)
        bq = bq * attn_scale
        wo, _ = proj()                       # (H, hd, D): per-head rows of out_proj^T
        bo = jnp.zeros((D,), jnp.float32)
        return dict(wq=wq, bq=bq, wk=wk, bk=bk, wv=wv, bv=bv, wo=wo, bo=bo)

    prm = {}
    prm["ln_pre_g"], prm["ln_pre_b"] = ln(D)
    prm["ln_post_g"], prm["ln_post_b"] = ln(D)
    prm["hoi_ln_g"], prm["hoi_ln_b"] = ln(D)
    prm["proj"] = randn((D, output_dim), scale, jnp.bfloat16)
    prm["hoi_token_embed"] = randn((hoi_token_length, D), scale)
    prm["hoi_pos_embed"] = randn((hoi_token_length, D), scale)
    prm["hoi_fc1_w"], prm["hoi_fc1_b"] = lin(D, 2 * D)
    prm["hoi_fc2_w"], prm["hoi_fc2_b"] = lin(2 * D, D)
    # bbox_score is a (D,1) linear; pad to (D,8) so the heads kernel avoids an
    # N=1 MXU matmul and can emit a single lane-dense (tm,16) output slab.
    ws, _ = lin(D, 1)
    prm["bbox_score_w8"] = jnp.pad(ws, ((0, 0), (0, 7)))
    prm["bbox_score_b8"] = jnp.zeros((8,), jnp.float32)
    prm["bbox_mlp_w0"], prm["bbox_mlp_b0"] = lin(D, D)
    prm["bbox_mlp_w1"], prm["bbox_mlp_b1"] = lin(D, D)
    prm["bbox_mlp_w2"], prm["bbox_mlp_b2"] = lin(D, 8)

    # hoi_parser_attn_mask: (1+L+P, 1+L+P) additive, -1e9 above the diagonal
    S = 1 + hoi_token_length + prompt_len
    prm["parse_attn_mask"] = jnp.triu(jnp.full((S, S), -1e9, jnp.float32), k=1)

    blocks = []
    for _ in range(layers):
        b = {}
        b["ln_1_g"], b["ln_1_b"] = ln(D)
        b["ln_2_g"], b["ln_2_b"] = ln(D)
        b["hoi_ln1_g"], b["hoi_ln1_b"] = ln(D)
        b["cross"] = mha()
        b["parse"] = mha()
        b["c_fc_w"], b["c_fc_b"] = lin(D, 4 * D)
        b["c_proj_w"], b["c_proj_b"] = lin(4 * D, D)
        blocks.append(b)
    prm["blocks"] = blocks
    return prm


# ----------------------------------------------------------------------------
if __name__ == "__main__":
    # Small shapes consistent with the module's forward signature.
    bs = 2
    num_of_grids = 16          # (image_resolution // patch_size) ** 2
    width = 32                 # d_model
    heads = 4
    layers = 2
    output_dim = 16
    hoi_token_length = 5
    prompt_len = 0             # matches default prompt_hint = torch.zeros(0, ...)

    key = jax.random.PRNGKey(0)
    k_img, k_par = jax.random.split(key)

    image = jax.random.normal(k_img, (bs, num_of_grids, width), jnp.float32)
    prompt_hint = jnp.zeros((prompt_len, width), jnp.float32)
    params = init_params(k_par, width, layers, heads, output_dim,
                         hoi_token_length, prompt_len)

    fwd = jax.jit(functools.partial(hoi_vit_forward, n_head=heads))
    out = fwd(params, image, prompt_hint)
    jax.block_until_ready(out)

    assert out["hoi_features"].shape == (bs, hoi_token_length, output_dim)
    assert out["pred_boxes"].shape == (bs, hoi_token_length, 8)
    assert out["box_scores"].shape == (bs, hoi_token_length, 1)
    assert out["attn_maps"].shape == (bs, hoi_token_length, num_of_grids)
    for k, v in out.items():
        assert bool(jnp.all(jnp.isfinite(v))), k
    print("KERNEL_OK")
</pallas_src>

<mosaic_0001>
module attributes {stable_mosaic.version = 11 : i64} {
  func.func @_ln_mlp_res_kernel(%arg0: i32, %arg1: memref<32x32xf32, #tpu.memory_space<vmem>>, %arg2: memref<1x32xf32, #tpu.memory_space<vmem>>, %arg3: memref<1x32xf32, #tpu.memory_space<vmem>>, %arg4: memref<32x64xbf16, #tpu.memory_space<vmem>>, %arg5: memref<1x64xf32, #tpu.memory_space<vmem>>, %arg6: memref<64x32xbf16, #tpu.memory_space<vmem>>, %arg7: memref<1x32xf32, #tpu.memory_space<vmem>>, %arg8: memref<32x32xbf16, #tpu.memory_space<vmem>>) attributes {dimension_semantics = [#tpu.dimension_semantics<parallel>], iteration_bounds = array<i64: 1>, scalar_prefetch = 0 : i64, scratch_operands = 0 : i64, tpu.core_type = #tpu.core_type<tc>, window_params = [{transform_indices = @transform_0, window_bounds = array<i64: 32, 32>}, {pipeline_mode = #tpu.pipeline_mode<synchronous>, transform_indices = @transform_1, window_bounds = array<i64: 1, 32>}, {pipeline_mode = #tpu.pipeline_mode<synchronous>, transform_indices = @transform_2, window_bounds = array<i64: 1, 32>}, {pipeline_mode = #tpu.pipeline_mode<synchronous>, transform_indices = @transform_3, window_bounds = array<i64: 32, 64>}, {pipeline_mode = #tpu.pipeline_mode<synchronous>, transform_indices = @transform_4, window_bounds = array<i64: 1, 64>}, {pipeline_mode = #tpu.pipeline_mode<synchronous>, transform_indices = @transform_5, window_bounds = array<i64: 64, 32>}, {pipeline_mode = #tpu.pipeline_mode<synchronous>, transform_indices = @transform_6, window_bounds = array<i64: 1, 32>}, {transform_indices = @transform_7, window_bounds = array<i64: 32, 32>}]} {
    %c0 = arith.constant 0 : index
    %c0_0 = arith.constant 0 : index
    %0 = vector.load %arg1[%c0, %c0_0] : memref<32x32xf32, #tpu.memory_space<vmem>>, vector<32x32xf32>
    %c0_1 = arith.constant 0 : index
    %c0_2 = arith.constant 0 : index
    %1 = vector.load %arg2[%c0_1, %c0_2] : memref<1x32xf32, #tpu.memory_space<vmem>>, vector<1x32xf32>
    %c0_3 = arith.constant 0 : index
    %c0_4 = arith.constant 0 : index
    %2 = vector.load %arg3[%c0_3, %c0_4] : memref<1x32xf32, #tpu.memory_space<vmem>>, vector<1x32xf32>
    %cst = arith.constant dense<0.000000e+00> : vector<32xf32>
    %3 = vector.multi_reduction <add>, %0, %cst [1] : vector<32x32xf32> to vector<32xf32>
    %4 = vector.shape_cast %3 : vector<32xf32> to vector<32x1xf32>
    %cst_5 = arith.constant 3.200000e+01 : f32
    %5 = vector.broadcast %cst_5 : f32 to vector<32x1xf32>
    %6 = arith.divf %4, %5 : vector<32x1xf32>
    %7 = vector.broadcast %6 : vector<32x1xf32> to vector<32x32xf32>
    %8 = arith.subf %0, %7 : vector<32x32xf32>
    %9 = arith.mulf %8, %8 : vector<32x32xf32>
    %cst_6 = arith.constant dense<0.000000e+00> : vector<32xf32>
    %10 = vector.multi_reduction <add>, %9, %cst_6 [1] : vector<32x32xf32> to vector<32xf32>
    %11 = vector.shape_cast %10 : vector<32xf32> to vector<32x1xf32>
    %cst_7 = arith.constant 3.200000e+01 : f32
    %12 = vector.broadcast %cst_7 : f32 to vector<32x1xf32>
    %13 = arith.divf %11, %12 : vector<32x1xf32>
    %cst_8 = arith.constant 9.99999974E-6 : f32
    %14 = vector.broadcast %cst_8 : f32 to vector<32x1xf32>
    %15 = arith.addf %13, %14 : vector<32x1xf32>
    %16 = math.rsqrt %15 : vector<32x1xf32>
    %17 = vector.broadcast %16 : vector<32x1xf32> to vector<32x32xf32>
    %18 = arith.mulf %8, %17 : vector<32x32xf32>
    %19 = vector.broadcast %1 : vector<1x32xf32> to vector<32x32xf32>
    %20 = arith.mulf %18, %19 : vector<32x32xf32>
    %21 = vector.broadcast %2 : vector<1x32xf32> to vector<32x32xf32>
    %22 = arith.addf %20, %21 : vector<32x32xf32>
    %c0_9 = arith.constant 0 : index
    %c0_10 = arith.constant 0 : index
    %23 = vector.load %arg4[%c0_9, %c0_10] : memref<32x64xbf16, #tpu.memory_space<vmem>>, vector<32x64xbf16>
    %c0_11 = arith.constant 0 : index
    %c0_12 = arith.constant 0 : index
    %24 = vector.load %arg5[%c0_11, %c0_12] : memref<1x64xf32, #tpu.memory_space<vmem>>, vector<1x64xf32>
    %25 = arith.truncf %22 : vector<32x32xf32> to vector<32x32xbf16>
    %cst_13 = arith.constant dense<0.000000e+00> : vector<32x64xf32>
    %26 = tpu.matmul %25, %23, %cst_13 {dimension_numbers = #tpu.dot_dimension_numbers<[1], [0], [0], [1], [0, 0, 1, 1], [], []>} : vector<32x32xbf16>, vector<32x64xbf16>, vector<32x64xf32> -> vector<32x64xf32>
    %27 = vector.broadcast %24 : vector<1x64xf32> to vector<32x64xf32>
    %28 = arith.addf %26, %27 : vector<32x64xf32>
    %cst_14 = arith.constant 1.702000e+00 : f32
    %29 = vector.broadcast %cst_14 : f32 to vector<32x64xf32>
    %30 = arith.mulf %29, %28 : vector<32x64xf32>
    %31 = arith.negf %30 : vector<32x64xf32>
    %32 = math.exp %31 : vector<32x64xf32>
    %cst_15 = arith.constant 1.000000e+00 : f32
    %33 = vector.broadcast %cst_15 : f32 to vector<32x64xf32>
    %34 = arith.addf %33, %32 : vector<32x64xf32>
    %35 = arith.divf %33, %34 : vector<32x64xf32>
    %36 = arith.mulf %28, %35 : vector<32x64xf32>
    %c0_16 = arith.constant 0 : index
    %c0_17 = arith.constant 0 : index
    %37 = vector.load %arg6[%c0_16, %c0_17] : memref<64x32xbf16, #tpu.memory_space<vmem>>, vector<64x32xbf16>
    %c0_18 = arith.constant 0 : index
    %c0_19 = arith.constant 0 : index
    %38 = vector.load %arg7[%c0_18, %c0_19] : memref<1x32xf32, #tpu.memory_space<vmem>>, vector<1x32xf32>
    %39 = arith.truncf %36 : vector<32x64xf32> to vector<32x64xbf16>
    %cst_20 = arith.constant dense<0.000000e+00> : vector<32x32xf32>
    %40 = tpu.matmul %39, %37, %cst_20 {dimension_numbers = #tpu.dot_dimension_numbers<[1], [0], [0], [1], [0, 0, 1, 1], [], []>} : vector<32x64xbf16>, vector<64x32xbf16>, vector<32x32xf32> -> vector<32x32xf32>
    %41 = vector.broadcast %38 : vector<1x32xf32> to vector<32x32xf32>
    %42 = arith.addf %40, %41 : vector<32x32xf32>
    %43 = arith.addf %0, %42 : vector<32x32xf32>
    %44 = arith.truncf %43 : vector<32x32xf32> to vector<32x32xbf16>
    %c0_21 = arith.constant 0 : index
    %c0_22 = arith.constant 0 : index
    %45 = vector.load %arg8[%c0_21, %c0_22] : memref<32x32xbf16, #tpu.memory_space<vmem>>, vector<32x32xbf16>
    tpu.vector_store %arg8[%c0_21, %c0_22], %44 {strides = array<i32>} : memref<32x32xbf16, #tpu.memory_space<vmem>>, vector<32x32xbf16>,
    return
  }
  func.func @transform_0(%arg0: i32) -> (i32, i32) {
    %c0_i32 = arith.constant 0 : i32
    %c0_i32_0 = arith.constant 0 : i32
    return %arg0, %c0_i32 : i32, i32
  }
  func.func @transform_1(%arg0: i32) -> (i32, i32) {
    %c0_i32 = arith.constant 0 : i32
    %c0_i32_0 = arith.constant 0 : i32
    %c0_i32_1 = arith.constant 0 : i32
    return %c0_i32, %c0_i32_0 : i32, i32
  }
  func.func @transform_2(%arg0: i32) -> (i32, i32) {
    %c0_i32 = arith.constant 0 : i32
    %c0_i32_0 = arith.constant 0 : i32
    %c0_i32_1 = arith.constant 0 : i32
    return %c0_i32, %c0_i32_0 : i32, i32
  }
  func.func @transform_3(%arg0: i32) -> (i32, i32) {
    %c0_i32 = arith.constant 0 : i32
    %c0_i32_0 = arith.constant 0 : i32
    %c0_i32_1 = arith.constant 0 : i32
    return %c0_i32, %c0_i32_0 : i32, i32
  }
  func.func @transform_4(%arg0: i32) -> (i32, i32) {
    %c0_i32 = arith.constant 0 : i32
    %c0_i32_0 = arith.constant 0 : i32
    %c0_i32_1 = arith.constant 0 : i32
    return %c0_i32, %c0_i32_0 : i32, i32
  }
  func.func @transform_5(%arg0: i32) -> (i32, i32) {
    %c0_i32 = arith.constant 0 : i32
    %c0_i32_0 = arith.constant 0 : i32
    %c0_i32_1 = arith.constant 0 : i32
    return %c0_i32, %c0_i32_0 : i32, i32
  }
  func.func @transform_6(%arg0: i32) -> (i32, i32) {
    %c0_i32 = arith.constant 0 : i32
    %c0_i32_0 = arith.constant 0 : i32
    %c0_i32_1 = arith.constant 0 : i32
    return %c0_i32, %c0_i32_0 : i32, i32
  }
  func.func @transform_7(%arg0: i32) -> (i32, i32) {
    %c0_i32 = arith.constant 0 : i32
    %c0_i32_0 = arith.constant 0 : i32
    return %arg0, %c0_i32 : i32, i32
  }
}

module attributes {stable_mosaic.version = 11 : i64} {
  func.func @_ln_mlp_res_kernel(%arg0: i32, %arg1: memref<16x32xf32, #tpu.memory_space<vmem>>, %arg2: memref<1x32xf32, #tpu.memory_space<vmem>>, %arg3: memref<1x32xf32, #tpu.memory_space<vmem>>, %arg4: memref<32x128xbf16, #tpu.memory_space<vmem>>, %arg5: memref<1x128xf32, #tpu.memory_space<vmem>>, %arg6: memref<128x32xbf16, #tpu.memory_space<vmem>>, %arg7: memref<1x32xf32, #tpu.memory_space<vmem>>, %arg8: memref<16x32xf32, #tpu.memory_space<vmem>>) attributes {dimension_semantics = [#tpu.dimension_semantics<parallel>], iteration_bounds = array<i64: 1>, scalar_prefetch = 0 : i64, scratch_operands = 0 : i64, tpu.core_type = #tpu.core_type<tc>, window_params = [{transform_indices = @transform_0, window_bounds = array<i64: 16, 32>}, {pipeline_mode = #tpu.pipeline_mode<synchronous>, transform_indices = @transform_1, window_bounds = array<i64: 1, 32>}, {pipeline_mode = #tpu.pipeline_mode<synchronous>, transform_indices = @transform_2, window_bounds = array<i64: 1, 32>}, {pipeline_mode = #tpu.pipeline_mode<synchronous>, transform_indices = @transform_3, window_bounds = array<i64: 32, 128>}, {pipeline_mode = #tpu.pipeline_mode<synchronous>, transform_indices = @transform_4, window_bounds = array<i64: 1, 128>}, {pipeline_mode = #tpu.pipeline_mode<synchronous>, transform_indices = @transform_5, window_bounds = array<i64: 128, 32>}, {pipeline_mode = #tpu.pipeline_mode<synchronous>, transform_indices = @transform_6, window_bounds = array<i64: 1, 32>}, {transform_indices = @transform_7, window_bounds = array<i64: 16, 32>}]} {
    %c0 = arith.constant 0 : index
    %c0_0 = arith.constant 0 : index
    %0 = vector.load %arg1[%c0, %c0_0] : memref<16x32xf32, #tpu.memory_space<vmem>>, vector<16x32xf32>
    %c0_1 = arith.constant 0 : index
    %c0_2 = arith.constant 0 : index
    %1 = vector.load %arg2[%c0_1, %c0_2] : memref<1x32xf32, #tpu.memory_space<vmem>>, vector<1x32xf32>
    %c0_3 = arith.constant 0 : index
    %c0_4 = arith.constant 0 : index
    %2 = vector.load %arg3[%c0_3, %c0_4] : memref<1x32xf32, #tpu.memory_space<vmem>>, vector<1x32xf32>
    %cst = arith.constant dense<0.000000e+00> : vector<16xf32>
    %3 = vector.multi_reduction <add>, %0, %cst [1] : vector<16x32xf32> to vector<16xf32>
    %4 = vector.shape_cast %3 : vector<16xf32> to vector<16x1xf32>
    %cst_5 = arith.constant 3.200000e+01 : f32
    %5 = vector.broadcast %cst_5 : f32 to vector<16x1xf32>
    %6 = arith.divf %4, %5 : vector<16x1xf32>
    %7 = vector.broadcast %6 : vector<16x1xf32> to vector<16x32xf32>
    %8 = arith.subf %0, %7 : vector<16x32xf32>
    %9 = arith.mulf %8, %8 : vector<16x32xf32>
    %cst_6 = arith.constant dense<0.000000e+00> : vector<16xf32>
    %10 = vector.multi_reduction <add>, %9, %cst_6 [1] : vector<16x32xf32> to vector<16xf32>
    %11 = vector.shape_cast %10 : vector<16xf32> to vector<16x1xf32>
    %cst_7 = arith.constant 3.200000e+01 : f32
    %12 = vector.broadcast %cst_7 : f32 to vector<16x1xf32>
    %13 = arith.divf %11, %12 : vector<16x1xf32>
    %cst_8 = arith.constant 9.99999974E-6 : f32
    %14 = vector.broadcast %cst_8 : f32 to vector<16x1xf32>
    %15 = arith.addf %13, %14 : vector<16x1xf32>
    %16 = math.rsqrt %15 : vector<16x1xf32>
    %17 = vector.broadcast %16 : vector<16x1xf32> to vector<16x32xf32>
    %18 = arith.mulf %8, %17 : vector<16x32xf32>
    %19 = vector.broadcast %1 : vector<1x32xf32> to vector<16x32xf32>
    %20 = arith.mulf %18, %19 : vector<16x32xf32>
    %21 = vector.broadcast %2 : vector<1x32xf32> to vector<16x32xf32>
    %22 = arith.addf %20, %21 : vector<16x32xf32>
    %c0_9 = arith.constant 0 : index
    %c0_10 = arith.constant 0 : index
    %23 = vector.load %arg4[%c0_9, %c0_10] : memref<32x128xbf16, #tpu.memory_space<vmem>>, vector<32x128xbf16>
    %c0_11 = arith.constant 0 : index
    %c0_12 = arith.constant 0 : index
    %24 = vector.load %arg5[%c0_11, %c0_12] : memref<1x128xf32, #tpu.memory_space<vmem>>, vector<1x128xf32>
    %25 = arith.truncf %22 : vector<16x32xf32> to vector<16x32xbf16>
    %cst_13 = arith.constant dense<0.000000e+00> : vector<16x128xf32>
    %26 = tpu.matmul %25, %23, %cst_13 {dimension_numbers = #tpu.dot_dimension_numbers<[1], [0], [0], [1], [0, 0, 1, 1], [], []>} : vector<16x32xbf16>, vector<32x128xbf16>, vector<16x128xf32> -> vector<16x128xf32>
    %27 = vector.broadcast %24 : vector<1x128xf32> to vector<16x128xf32>
    %28 = arith.addf %26, %27 : vector<16x128xf32>
    %cst_14 = arith.constant 1.702000e+00 : f32
    %29 = vector.broadcast %cst_14 : f32 to vector<16x128xf32>
    %30 = arith.mulf %29, %28 : vector<16x128xf32>
    %31 = arith.negf %30 : vector<16x128xf32>
    %32 = math.exp %31 : vector<16x128xf32>
    %cst_15 = arith.constant 1.000000e+00 : f32
    %33 = vector.broadcast %cst_15 : f32 to vector<16x128xf32>
    %34 = arith.addf %33, %32 : vector<16x128xf32>
    %35 = arith.divf %33, %34 : vector<16x128xf32>
    %36 = arith.mulf %28, %35 : vector<16x128xf32>
    %c0_16 = arith.constant 0 : index
    %c0_17 = arith.constant 0 : index
    %37 = vector.load %arg6[%c0_16, %c0_17] : memref<128x32xbf16, #tpu.memory_space<vmem>>, vector<128x32xbf16>
    %c0_18 = arith.constant 0 : index
    %c0_19 = arith.constant 0 : index
    %38 = vector.load %arg7[%c0_18, %c0_19] : memref<1x32xf32, #tpu.memory_space<vmem>>, vector<1x32xf32>
    %39 = arith.truncf %36 : vector<16x128xf32> to vector<16x128xbf16>
    %cst_20 = arith.constant dense<0.000000e+00> : vector<16x32xf32>
    %40 = tpu.matmul %39, %37, %cst_20 {dimension_numbers = #tpu.dot_dimension_numbers<[1], [0], [0], [1], [0, 0, 1, 1], [], []>} : vector<16x128xbf16>, vector<128x32xbf16>, vector<16x32xf32> -> vector<16x32xf32>
    %41 = vector.broadcast %38 : vector<1x32xf32> to vector<16x32xf32>
    %42 = arith.addf %40, %41 : vector<16x32xf32>
    %43 = arith.addf %0, %42 : vector<16x32xf32>
    %c0_21 = arith.constant 0 : index
    %c0_22 = arith.constant 0 : index
    %44 = vector.load %arg8[%c0_21, %c0_22] : memref<16x32xf32, #tpu.memory_space<vmem>>, vector<16x32xf32>
    tpu.vector_store %arg8[%c0_21, %c0_22], %43 {strides = array<i32>} : memref<16x32xf32, #tpu.memory_space<vmem>>, vector<16x32xf32>,
    return
  }
  func.func @transform_0(%arg0: i32) -> (i32, i32) {
    %c0_i32 = arith.constant 0 : i32
    %c0_i32_0 = arith.constant 0 : i32
    return %arg0, %c0_i32 : i32, i32
  }
  func.func @transform_1(%arg0: i32) -> (i32, i32) {
    %c0_i32 = arith.constant 0 : i32
    %c0_i32_0 = arith.constant 0 : i32
    %c0_i32_1 = arith.constant 0 : i32
    return %c0_i32, %c0_i32_0 : i32, i32
  }
  func.func @transform_2(%arg0: i32) -> (i32, i32) {
    %c0_i32 = arith.constant 0 : i32
    %c0_i32_0 = arith.constant 0 : i32
    %c0_i32_1 = arith.constant 0 : i32
    return %c0_i32, %c0_i32_0 : i32, i32
  }
  func.func @transform_3(%arg0: i32) -> (i32, i32) {
    %c0_i32 = arith.constant 0 : i32
    %c0_i32_0 = arith.constant 0 : i32
    %c0_i32_1 = arith.constant 0 : i32
    return %c0_i32, %c0_i32_0 : i32, i32
  }
  func.func @transform_4(%arg0: i32) -> (i32, i32) {
    %c0_i32 = arith.constant 0 : i32
    %c0_i32_0 = arith.constant 0 : i32
    %c0_i32_1 = arith.constant 0 : i32
    return %c0_i32, %c0_i32_0 : i32, i32
  }
  func.func @transform_5(%arg0: i32) -> (i32, i32) {
    %c0_i32 = arith.constant 0 : i32
    %c0_i32_0 = arith.constant 0 : i32
    %c0_i32_1 = arith.constant 0 : i32
    return %c0_i32, %c0_i32_0 : i32, i32
  }
  func.func @transform_6(%arg0: i32) -> (i32, i32) {
    %c0_i32 = arith.constant 0 : i32
    %c0_i32_0 = arith.constant 0 : i32
    %c0_i32_1 = arith.constant 0 : i32
    return %c0_i32, %c0_i32_0 : i32, i32
  }
  func.func @transform_7(%arg0: i32) -> (i32, i32) {
    %c0_i32 = arith.constant 0 : i32
    %c0_i32_0 = arith.constant 0 : i32
    return %arg0, %c0_i32 : i32, i32
  }
}

module attributes {stable_mosaic.version = 11 : i64} {
  func.func @_mha_head_kernel(%arg0: i32, %arg1: i32, %arg2: memref<1x5x32xf32, #tpu.memory_space<vmem>>, %arg3: memref<1x16x32xbf16, #tpu.memory_space<vmem>>, %arg4: memref<1x32xf32, #tpu.memory_space<vmem>>, %arg5: memref<1x32xf32, #tpu.memory_space<vmem>>, %arg6: memref<1x8x32xbf16, #tpu.memory_space<vmem>>, %arg7: memref<1x1x8xf32, #tpu.memory_space<vmem>>, %arg8: memref<1x8x32xbf16, #tpu.memory_space<vmem>>, %arg9: memref<1x1x8xf32, #tpu.memory_space<vmem>>, %arg10: memref<1x8x32xbf16, #tpu.memory_space<vmem>>, %arg11: memref<1x1x8xf32, #tpu.memory_space<vmem>>, %arg12: memref<1x8x32xbf16, #tpu.memory_space<vmem>>, %arg13: memref<1x32xf32, #tpu.memory_space<vmem>>, %arg14: memref<1x5x32xf32, #tpu.memory_space<vmem>>, %arg15: memref<5x32xbf16, #tpu.memory_space<vmem>>, %arg16: memref<16x32xbf16, #tpu.memory_space<vmem>>, %arg17: memref<5x32xf32, #tpu.memory_space<vmem>>) attributes {dimension_semantics = [#tpu.dimension_semantics<parallel>, #tpu.dimension_semantics<arbitrary>], iteration_bounds = array<i64: 2, 4>, scalar_prefetch = 0 : i64, scratch_operands = 3 : i64, tpu.core_type = #tpu.core_type<tc>, window_params = [{transform_indices = @transform_0, window_bounds = array<i64: 1, 5, 32>}, {transform_indices = @transform_1, window_bounds = array<i64: 1, 16, 32>}, {pipeline_mode = #tpu.pipeline_mode<synchronous>, transform_indices = @transform_2, window_bounds = array<i64: 1, 32>}, {pipeline_mode = #tpu.pipeline_mode<synchronous>, transform_indices = @transform_3, window_bounds = array<i64: 1, 32>}, {transform_indices = @transform_4, window_bounds = array<i64: 1, 8, 32>}, {transform_indices = @transform_5, window_bounds = array<i64: 1, 1, 8>}, {transform_indices = @transform_6, window_bounds = array<i64: 1, 8, 32>}, {transform_indices = @transform_7, window_bounds = array<i64: 1, 1, 8>}, {transform_indices = @transform_8, window_bounds = array<i64: 1, 8, 32>}, {transform_indices = @transform_9, window_bounds = array<i64: 1, 1, 8>}, {transform_indices = @transform_10, window_bounds = array<i64: 1, 8, 32>}, {pipeline_mode = #tpu.pipeline_mode<synchronous>, transform_indices = @transform_11, window_bounds = array<i64: 1, 32>}, {transform_indices = @transform_12, window_bounds = array<i64: 1, 5, 32>}]} {
    %c0_i32 = arith.constant 0 : i32
    %0 = arith.cmpi eq, %arg1, %c0_i32 : i32
    %1 = arith.extui %0 : i1 to i32
    %c0_i32_0 = arith.constant 0 : i32
    %2 = arith.cmpi ne, %1, %c0_i32_0 : i32
    scf.if %2 {
      %c0_37 = arith.constant 0 : index
      %c0_38 = arith.constant 0 : index
      %c0_39 = arith.constant 0 : index
      %51 = vector.load %arg2[%c0_37, %c0_38, %c0_39] : memref<1x5x32xf32, #tpu.memory_space<vmem>>, vector<1x5x32xf32>
      %52 = vector.shape_cast %51 : vector<1x5x32xf32> to vector<5x32xf32>
      %c0_40 = arith.constant 0 : index
      %c0_41 = arith.constant 0 : index
      %53 = vector.load %arg4[%c0_40, %c0_41] : memref<1x32xf32, #tpu.memory_space<vmem>>, vector<1x32xf32>
      %c0_42 = arith.constant 0 : index
      %c0_43 = arith.constant 0 : index
      %54 = vector.load %arg5[%c0_42, %c0_43] : memref<1x32xf32, #tpu.memory_space<vmem>>, vector<1x32xf32>
      %cst_44 = arith.constant dense<0.000000e+00> : vector<5xf32>
      %55 = vector.multi_reduction <add>, %52, %cst_44 [1] : vector<5x32xf32> to vector<5xf32>
      %56 = vector.shape_cast %55 : vector<5xf32> to vector<5x1xf32>
      %cst_45 = arith.constant 3.200000e+01 : f32
      %57 = vector.broadcast %cst_45 : f32 to vector<5x1xf32>
      %58 = arith.divf %56, %57 : vector<5x1xf32>
      %59 = vector.broadcast %58 : vector<5x1xf32> to vector<5x32xf32>
      %60 = arith.subf %52, %59 : vector<5x32xf32>
      %61 = arith.mulf %60, %60 : vector<5x32xf32>
      %cst_46 = arith.constant dense<0.000000e+00> : vector<5xf32>
      %62 = vector.multi_reduction <add>, %61, %cst_46 [1] : vector<5x32xf32> to vector<5xf32>
      %63 = vector.shape_cast %62 : vector<5xf32> to vector<5x1xf32>
      %cst_47 = arith.constant 3.200000e+01 : f32
      %64 = vector.broadcast %cst_47 : f32 to vector<5x1xf32>
      %65 = arith.divf %63, %64 : vector<5x1xf32>
      %cst_48 = arith.constant 9.99999974E-6 : f32
      %66 = vector.broadcast %cst_48 : f32 to vector<5x1xf32>
      %67 = arith.addf %65, %66 : vector<5x1xf32>
      %68 = math.rsqrt %67 : vector<5x1xf32>
      %69 = vector.broadcast %68 : vector<5x1xf32> to vector<5x32xf32>
      %70 = arith.mulf %60, %69 : vector<5x32xf32>
      %71 = vector.broadcast %53 : vector<1x32xf32> to vector<5x32xf32>
      %72 = arith.mulf %70, %71 : vector<5x32xf32>
      %73 = vector.broadcast %54 : vector<1x32xf32> to vector<5x32xf32>
      %74 = arith.addf %72, %73 : vector<5x32xf32>
      %75 = arith.truncf %74 : vector<5x32xf32> to vector<5x32xbf16>
      %c0_49 = arith.constant 0 : index
      %c0_50 = arith.constant 0 : index
      %76 = vector.load %arg15[%c0_49, %c0_50] : memref<5x32xbf16, #tpu.memory_space<vmem>>, vector<5x32xbf16>
      tpu.vector_store %arg15[%c0_49, %c0_50], %75 {strides = array<i32>} : memref<5x32xbf16, #tpu.memory_space<vmem>>, vector<5x32xbf16>,
      %c0_51 = arith.constant 0 : index
      %c0_52 = arith.constant 0 : index
      %c0_53 = arith.constant 0 : index
      %77 = vector.load %arg3[%c0_51, %c0_52, %c0_53] : memref<1x16x32xbf16, #tpu.memory_space<vmem>>, vector<1x16x32xbf16>
      %78 = vector.shape_cast %77 : vector<1x16x32xbf16> to vector<16x32xbf16>
      %c0_54 = arith.constant 0 : index
      %c0_55 = arith.constant 0 : index
      %79 = vector.load %arg4[%c0_54, %c0_55] : memref<1x32xf32, #tpu.memory_space<vmem>>, vector<1x32xf32>
      %c0_56 = arith.constant 0 : index
      %c0_57 = arith.constant 0 : index
      %80 = vector.load %arg5[%c0_56, %c0_57] : memref<1x32xf32, #tpu.memory_space<vmem>>, vector<1x32xf32>
      %81 = arith.extf %78 : vector<16x32xbf16> to vector<16x32xf32>
      %cst_58 = arith.constant dense<0.000000e+00> : vector<16xf32>
      %82 = vector.multi_reduction <add>, %81, %cst_58 [1] : vector<16x32xf32> to vector<16xf32>
      %83 = vector.shape_cast %82 : vector<16xf32> to vector<16x1xf32>
      %cst_59 = arith.constant 3.200000e+01 : f32
      %84 = vector.broadcast %cst_59 : f32 to vector<16x1xf32>
      %85 = arith.divf %83, %84 : vector<16x1xf32>
      %86 = vector.broadcast %85 : vector<16x1xf32> to vector<16x32xf32>
      %87 = arith.subf %81, %86 : vector<16x32xf32>
      %88 = arith.mulf %87, %87 : vector<16x32xf32>
      %cst_60 = arith.constant dense<0.000000e+00> : vector<16xf32>
      %89 = vector.multi_reduction <add>, %88, %cst_60 [1] : vector<16x32xf32> to vector<16xf32>
      %90 = vector.shape_cast %89 : vector<16xf32> to vector<16x1xf32>
      %cst_61 = arith.constant 3.200000e+01 : f32
      %91 = vector.broadcast %cst_61 : f32 to vector<16x1xf32>
      %92 = arith.divf %90, %91 : vector<16x1xf32>
      %cst_62 = arith.constant 9.99999974E-6 : f32
      %93 = vector.broadcast %cst_62 : f32 to vector<16x1xf32>
      %94 = arith.addf %92, %93 : vector<16x1xf32>
      %95 = math.rsqrt %94 : vector<16x1xf32>
      %96 = vector.broadcast %95 : vector<16x1xf32> to vector<16x32xf32>
      %97 = arith.mulf %87, %96 : vector<16x32xf32>
      %98 = vector.broadcast %79 : vector<1x32xf32> to vector<16x32xf32>
      %99 = arith.mulf %97, %98 : vector<16x32xf32>
      %100 = vector.broadcast %80 : vector<1x32xf32> to vector<16x32xf32>
      %101 = arith.addf %99, %100 : vector<16x32xf32>
      %102 = arith.truncf %101 : vector<16x32xf32> to vector<16x32xbf16>
      %c0_63 = arith.constant 0 : index
      %c0_64 = arith.constant 0 : index
      %103 = vector.load %arg16[%c0_63, %c0_64] : memref<16x32xbf16, #tpu.memory_space<vmem>>, vector<16x32xbf16>
      tpu.vector_store %arg16[%c0_63, %c0_64], %102 {strides = array<i32>} : memref<16x32xbf16, #tpu.memory_space<vmem>>, vector<16x32xbf16>,
      %cst_65 = arith.constant 0.000000e+00 : f32
      %104 = vector.broadcast %cst_65 : f32 to vector<5x32xf32>
      %c0_66 = arith.constant 0 : index
      %c0_67 = arith.constant 0 : index
      %105 = vector.load %arg17[%c0_66, %c0_67] : memref<5x32xf32, #tpu.memory_space<vmem>>, vector<5x32xf32>
      tpu.vector_store %arg17[%c0_66, %c0_67], %104 {strides = array<i32>} : memref<5x32xf32, #tpu.memory_space<vmem>>, vector<5x32xf32>,
    } else {
    }
    %c0 = arith.constant 0 : index
    %c0_1 = arith.constant 0 : index
    %3 = vector.load %arg15[%c0, %c0_1] : memref<5x32xbf16, #tpu.memory_space<vmem>>, vector<5x32xbf16>
    %c0_2 = arith.constant 0 : index
    %c0_3 = arith.constant 0 : index
    %4 = vector.load %arg16[%c0_2, %c0_3] : memref<16x32xbf16, #tpu.memory_space<vmem>>, vector<16x32xbf16>
    %c0_4 = arith.constant 0 : index
    %c0_5 = arith.constant 0 : index
    %c0_6 = arith.constant 0 : index
    %5 = vector.load %arg6[%c0_4, %c0_5, %c0_6] : memref<1x8x32xbf16, #tpu.memory_space<vmem>>, vector<1x8x32xbf16>
    %6 = vector.shape_cast %5 : vector<1x8x32xbf16> to vector<8x32xbf16>
    %c0_7 = arith.constant 0 : index
    %c0_8 = arith.constant 0 : index
    %c0_9 = arith.constant 0 : index
    %7 = vector.load %arg7[%c0_7, %c0_8, %c0_9] : memref<1x1x8xf32, #tpu.memory_space<vmem>>, vector<1x1x8xf32>
    %8 = vector.shape_cast %7 : vector<1x1x8xf32> to vector<1x8xf32>
    %cst = arith.constant dense<0.000000e+00> : vector<5x8xf32>
    %9 = tpu.matmul %3, %6, %cst {dimension_numbers = #tpu.dot_dimension_numbers<[1], [1], [0], [0], [0, 0, 1, 0], [], []>} : vector<5x32xbf16>, vector<8x32xbf16>, vector<5x8xf32> -> vector<5x8xf32>
    %10 = vector.broadcast %8 : vector<1x8xf32> to vector<5x8xf32>
    %11 = arith.addf %9, %10 : vector<5x8xf32>
    %c0_10 = arith.constant 0 : index
    %c0_11 = arith.constant 0 : index
    %c0_12 = arith.constant 0 : index
    %12 = vector.load %arg8[%c0_10, %c0_11, %c0_12] : memref<1x8x32xbf16, #tpu.memory_space<vmem>>, vector<1x8x32xbf16>
    %13 = vector.shape_cast %12 : vector<1x8x32xbf16> to vector<8x32xbf16>
    %c0_13 = arith.constant 0 : index
    %c0_14 = arith.constant 0 : index
    %c0_15 = arith.constant 0 : index
    %14 = vector.load %arg9[%c0_13, %c0_14, %c0_15] : memref<1x1x8xf32, #tpu.memory_space<vmem>>, vector<1x1x8xf32>
    %15 = vector.shape_cast %14 : vector<1x1x8xf32> to vector<1x8xf32>
    %cst_16 = arith.constant dense<0.000000e+00> : vector<16x8xf32>
    %16 = tpu.matmul %4, %13, %cst_16 {dimension_numbers = #tpu.dot_dimension_numbers<[1], [1], [0], [0], [0, 0, 1, 0], [], []>} : vector<16x32xbf16>, vector<8x32xbf16>, vector<16x8xf32> -> vector<16x8xf32>
    %17 = vector.broadcast %15 : vector<1x8xf32> to vector<16x8xf32>
    %18 = arith.addf %16, %17 : vector<16x8xf32>
    %c0_17 = arith.constant 0 : index
    %c0_18 = arith.constant 0 : index
    %c0_19 = arith.constant 0 : index
    %19 = vector.load %arg10[%c0_17, %c0_18, %c0_19] : memref<1x8x32xbf16, #tpu.memory_space<vmem>>, vector<1x8x32xbf16>
    %20 = vector.shape_cast %19 : vector<1x8x32xbf16> to vector<8x32xbf16>
    %c0_20 = arith.constant 0 : index
    %c0_21 = arith.constant 0 : index
    %c0_22 = arith.constant 0 : index
    %21 = vector.load %arg11[%c0_20, %c0_21, %c0_22] : memref<1x1x8xf32, #tpu.memory_space<vmem>>, vector<1x1x8xf32>
    %22 = vector.shape_cast %21 : vector<1x1x8xf32> to vector<1x8xf32>
    %cst_23 = arith.constant dense<0.000000e+00> : vector<16x8xf32>
    %23 = tpu.matmul %4, %20, %cst_23 {dimension_numbers = #tpu.dot_dimension_numbers<[1], [1], [0], [0], [0, 0, 1, 0], [], []>} : vector<16x32xbf16>, vector<8x32xbf16>, vector<16x8xf32> -> vector<16x8xf32>
    %24 = vector.broadcast %22 : vector<1x8xf32> to vector<16x8xf32>
    %25 = arith.addf %23, %24 : vector<16x8xf32>
    %26 = arith.truncf %11 : vector<5x8xf32> to vector<5x8xbf16>
    %27 = arith.truncf %18 : vector<16x8xf32> to vector<16x8xbf16>
    %cst_24 = arith.constant dense<0.000000e+00> : vector<5x16xf32>
    %28 = tpu.matmul %26, %27, %cst_24 {dimension_numbers = #tpu.dot_dimension_numbers<[1], [1], [0], [0], [0, 0, 1, 0], [], []>} : vector<5x8xbf16>, vector<16x8xbf16>, vector<5x16xf32> -> vector<5x16xf32>
    %cst_25 = arith.constant dense<0xFF800000> : vector<5xf32>
    %29 = vector.multi_reduction <maximumf>, %28, %cst_25 [1] : vector<5x16xf32> to vector<5xf32>
    %30 = vector.shape_cast %29 : vector<5xf32> to vector<5x1xf32>
    %31 = vector.broadcast %30 : vector<5x1xf32> to vector<5x16xf32>
    %32 = arith.subf %28, %31 : vector<5x16xf32>
    %33 = math.exp %32 : vector<5x16xf32>
    %cst_26 = arith.constant dense<0.000000e+00> : vector<5xf32>
    %34 = vector.multi_reduction <add>, %33, %cst_26 [1] : vector<5x16xf32> to vector<5xf32>
    %35 = vector.shape_cast %34 : vector<5xf32> to vector<5x1xf32>
    %36 = vector.broadcast %35 : vector<5x1xf32> to vector<5x16xf32>
    %37 = arith.divf %33, %36 : vector<5x16xf32>
    %38 = arith.truncf %37 : vector<5x16xf32> to vector<5x16xbf16>
    %39 = arith.truncf %25 : vector<16x8xf32> to vector<16x8xbf16>
    %cst_27 = arith.constant dense<0.000000e+00> : vector<5x8xf32>
    %40 = tpu.matmul %38, %39, %cst_27 {dimension_numbers = #tpu.dot_dimension_numbers<[1], [0], [0], [1], [0, 0, 1, 1], [], []>} : vector<5x16xbf16>, vector<16x8xbf16>, vector<5x8xf32> -> vector<5x8xf32>
    %c0_28 = arith.constant 0 : index
    %c0_29 = arith.constant 0 : index
    %41 = vector.load %arg17[%c0_28, %c0_29] : memref<5x32xf32, #tpu.memory_space<vmem>>, vector<5x32xf32>
    %42 = arith.truncf %40 : vector<5x8xf32> to vector<5x8xbf16>
    %c0_30 = arith.constant 0 : index
    %c0_31 = arith.constant 0 : index
    %c0_32 = arith.constant 0 : index
    %43 = vector.load %arg12[%c0_30, %c0_31, %c0_32] : memref<1x8x32xbf16, #tpu.memory_space<vmem>>, vector<1x8x32xbf16>
    %44 = vector.shape_cast %43 : vector<1x8x32xbf16> to vector<8x32xbf16>
    %cst_33 = arith.constant dense<0.000000e+00> : vector<5x32xf32>
    %45 = tpu.matmul %42, %44, %cst_33 {dimension_numbers = #tpu.dot_dimension_numbers<[1], [0], [0], [1], [0, 0, 1, 1], [], []>} : vector<5x8xbf16>, vector<8x32xbf16>, vector<5x32xf32> -> vector<5x32xf32>
    %46 = arith.addf %41, %45 : vector<5x32xf32>
    %c0_34 = arith.constant 0 : index
    %c0_35 = arith.constant 0 : index
    %47 = vector.load %arg17[%c0_34, %c0_35] : memref<5x32xf32, #tpu.memory_space<vmem>>, vector<5x32xf32>
    tpu.vector_store %arg17[%c0_34, %c0_35], %46 {strides = array<i32>} : memref<5x32xf32, #tpu.memory_space<vmem>>, vector<5x32xf32>,
    %c3_i32 = arith.constant 3 : i32
    %48 = arith.cmpi eq, %arg1, %c3_i32 : i32
    %49 = arith.extui %48 : i1 to i32
    %c0_i32_36 = arith.constant 0 : i32
    %50 = arith.cmpi ne, %49, %c0_i32_36 : i32
    scf.if %50 {
      %c0_37 = arith.constant 0 : index
      %c0_38 = arith.constant 0 : index
      %c0_39 = arith.constant 0 : index
      %51 = vector.load %arg2[%c0_37, %c0_38, %c0_39] : memref<1x5x32xf32, #tpu.memory_space<vmem>>, vector<1x5x32xf32>
      %52 = vector.shape_cast %51 : vector<1x5x32xf32> to vector<5x32xf32>
      %c0_40 = arith.constant 0 : index
      %c0_41 = arith.constant 0 : index
      %53 = vector.load %arg17[%c0_40, %c0_41] : memref<5x32xf32, #tpu.memory_space<vmem>>, vector<5x32xf32>
      %54 = arith.addf %52, %53 : vector<5x32xf32>
      %c0_42 = arith.constant 0 : index
      %c0_43 = arith.constant 0 : index
      %55 = vector.load %arg13[%c0_42, %c0_43] : memref<1x32xf32, #tpu.memory_space<vmem>>, vector<1x32xf32>
      %56 = vector.broadcast %55 : vector<1x32xf32> to vector<5x32xf32>
      %57 = arith.addf %54, %56 : vector<5x32xf32>
      %c0_44 = arith.constant 0 : index
      %c0_45 = arith.constant 0 : index
      %c0_46 = arith.constant 0 : index
      %58 = vector.load %arg14[%c0_44, %c0_45, %c0_46] : memref<1x5x32xf32, #tpu.memory_space<vmem>>, vector<1x5x32xf32>
      %59 = vector.shape_cast %58 : vector<1x5x32xf32> to vector<5x32xf32>
      %60 = vector.shape_cast %57 : vector<5x32xf32> to vector<1x5x32xf32>
      tpu.vector_store %arg14[%c0_44, %c0_45, %c0_46], %60 {strides = array<i32>} : memref<1x5x32xf32, #tpu.memory_space<vmem>>, vector<1x5x32xf32>,
    } else {
    }
    return
  }
  func.func @transform_0(%arg0: i32, %arg1: i32) -> (i32, i32, i32) {
    %c0_i32 = arith.constant 0 : i32
    %c0_i32_0 = arith.constant 0 : i32
    %c0_i32_1 = arith.constant 0 : i32
    return %arg0, %c0_i32, %c0_i32_0 : i32, i32, i32
  }
  func.func @transform_1(%arg0: i32, %arg1: i32) -> (i32, i32, i32) {
    %c0_i32 = arith.constant 0 : i32
    %c0_i32_0 = arith.constant 0 : i32
    %c0_i32_1 = arith.constant 0 : i32
    return %arg0, %c0_i32, %c0_i32_0 : i32, i32, i32
  }
  func.func @transform_2(%arg0: i32, %arg1: i32) -> (i32, i32) {
    %c0_i32 = arith.constant 0 : i32
    %c0_i32_0 = arith.constant 0 : i32
    %c0_i32_1 = arith.constant 0 : i32
    return %c0_i32, %c0_i32_0 : i32, i32
  }
  func.func @transform_3(%arg0: i32, %arg1: i32) -> (i32, i32) {
    %c0_i32 = arith.constant 0 : i32
    %c0_i32_0 = arith.constant 0 : i32
    %c0_i32_1 = arith.constant 0 : i32
    return %c0_i32, %c0_i32_0 : i32, i32
  }
  func.func @transform_4(%arg0: i32, %arg1: i32) -> (i32, i32, i32) {
    %c0_i32 = arith.constant 0 : i32
    %c0_i32_0 = arith.constant 0 : i32
    %c0_i32_1 = arith.constant 0 : i32
    return %arg1, %c0_i32, %c0_i32_0 : i32, i32, i32
  }
  func.func @transform_5(%arg0: i32, %arg1: i32) -> (i32, i32, i32) {
    %c0_i32 = arith.constant 0 : i32
    %c0_i32_0 = arith.constant 0 : i32
    %c0_i32_1 = arith.constant 0 : i32
    return %arg1, %c0_i32, %c0_i32_0 : i32, i32, i32
  }
  func.func @transform_6(%arg0: i32, %arg1: i32) -> (i32, i32, i32) {
    %c0_i32 = arith.constant 0 : i32
    %c0_i32_0 = arith.constant 0 : i32
    %c0_i32_1 = arith.constant 0 : i32
    return %arg1, %c0_i32, %c0_i32_0 : i32, i32, i32
  }
  func.func @transform_7(%arg0: i32, %arg1: i32) -> (i32, i32, i32) {
    %c0_i32 = arith.constant 0 : i32
    %c0_i32_0 = arith.constant 0 : i32
    %c0_i32_1 = arith.constant 0 : i32
    return %arg1, %c0_i32, %c0_i32_0 : i32, i32, i32
  }
  func.func @transform_8(%arg0: i32, %arg1: i32) -> (i32, i32, i32) {
    %c0_i32 = arith.constant 0 : i32
    %c0_i32_0 = arith.constant 0 : i32
    %c0_i32_1 = arith.constant 0 : i32
    return %arg1, %c0_i32, %c0_i32_0 : i32, i32, i32
  }
  func.func @transform_9(%arg0: i32, %arg1: i32) -> (i32, i32, i32) {
    %c0_i32 = arith.constant 0 : i32
    %c0_i32_0 = arith.constant 0 : i32
    %c0_i32_1 = arith.constant 0 : i32
    return %arg1, %c0_i32, %c0_i32_0 : i32, i32, i32
  }
  func.func @transform_10(%arg0: i32, %arg1: i32) -> (i32, i32, i32) {
    %c0_i32 = arith.constant 0 : i32
    %c0_i32_0 = arith.constant 0 : i32
    %c0_i32_1 = arith.constant 0 : i32
    return %arg1, %c0_i32, %c0_i32_0 : i32, i32, i32
  }
  func.func @transform_11(%arg0: i32, %arg1: i32) -> (i32, i32) {
    %c0_i32 = arith.constant 0 : i32
    %c0_i32_0 = arith.constant 0 : i32
    %c0_i32_1 = arith.constant 0 : i32
    return %c0_i32, %c0_i32_0 : i32, i32
  }
  func.func @transform_12(%arg0: i32, %arg1: i32) -> (i32, i32, i32) {
    %c0_i32 = arith.constant 0 : i32
    %c0_i32_0 = arith.constant 0 : i32
    %c0_i32_1 = arith.constant 0 : i32
    return %arg0, %c0_i32, %c0_i32_0 : i32, i32, i32
  }
}

module attributes {stable_mosaic.version = 11 : i64} {
  func.func @_mha_head_kernel(%arg0: i32, %arg1: i32, %arg2: memref<1x5x32xf32, #tpu.memory_space<vmem>>, %arg3: memref<1x32xf32, #tpu.memory_space<vmem>>, %arg4: memref<1x32xf32, #tpu.memory_space<vmem>>, %arg5: memref<1x8x32xbf16, #tpu.memory_space<vmem>>, %arg6: memref<1x1x8xf32, #tpu.memory_space<vmem>>, %arg7: memref<1x8x32xbf16, #tpu.memory_space<vmem>>, %arg8: memref<1x1x8xf32, #tpu.memory_space<vmem>>, %arg9: memref<1x8x32xbf16, #tpu.memory_space<vmem>>, %arg10: memref<1x1x8xf32, #tpu.memory_space<vmem>>, %arg11: memref<1x8x32xbf16, #tpu.memory_space<vmem>>, %arg12: memref<1x32xf32, #tpu.memory_space<vmem>>, %arg13: memref<5x5xf32, #tpu.memory_space<vmem>>, %arg14: memref<1x5x32xf32, #tpu.memory_space<vmem>>, %arg15: memref<5x32xbf16, #tpu.memory_space<vmem>>, %arg16: memref<5x32xf32, #tpu.memory_space<vmem>>) attributes {dimension_semantics = [#tpu.dimension_semantics<parallel>, #tpu.dimension_semantics<arbitrary>], iteration_bounds = array<i64: 2, 4>, scalar_prefetch = 0 : i64, scratch_operands = 2 : i64, tpu.core_type = #tpu.core_type<tc>, window_params = [{transform_indices = @transform_0, window_bounds = array<i64: 1, 5, 32>}, {pipeline_mode = #tpu.pipeline_mode<synchronous>, transform_indices = @transform_1, window_bounds = array<i64: 1, 32>}, {pipeline_mode = #tpu.pipeline_mode<synchronous>, transform_indices = @transform_2, window_bounds = array<i64: 1, 32>}, {transform_indices = @transform_3, window_bounds = array<i64: 1, 8, 32>}, {transform_indices = @transform_4, window_bounds = array<i64: 1, 1, 8>}, {transform_indices = @transform_5, window_bounds = array<i64: 1, 8, 32>}, {transform_indices = @transform_6, window_bounds = array<i64: 1, 1, 8>}, {transform_indices = @transform_7, window_bounds = array<i64: 1, 8, 32>}, {transform_indices = @transform_8, window_bounds = array<i64: 1, 1, 8>}, {transform_indices = @transform_9, window_bounds = array<i64: 1, 8, 32>}, {pipeline_mode = #tpu.pipeline_mode<synchronous>, transform_indices = @transform_10, window_bounds = array<i64: 1, 32>}, {pipeline_mode = #tpu.pipeline_mode<synchronous>, transform_indices = @transform_11, window_bounds = array<i64: 5, 5>}, {transform_indices = @transform_12, window_bounds = array<i64: 1, 5, 32>}]} {
    %c0_i32 = arith.constant 0 : i32
    %0 = arith.cmpi eq, %arg1, %c0_i32 : i32
    %1 = arith.extui %0 : i1 to i32
    %c0_i32_0 = arith.constant 0 : i32
    %2 = arith.cmpi ne, %1, %c0_i32_0 : i32
    scf.if %2 {
      %c0_39 = arith.constant 0 : index
      %c0_40 = arith.constant 0 : index
      %c0_41 = arith.constant 0 : index
      %53 = vector.load %arg2[%c0_39, %c0_40, %c0_41] : memref<1x5x32xf32, #tpu.memory_space<vmem>>, vector<1x5x32xf32>
      %54 = vector.shape_cast %53 : vector<1x5x32xf32> to vector<5x32xf32>
      %c0_42 = arith.constant 0 : index
      %c0_43 = arith.constant 0 : index
      %55 = vector.load %arg3[%c0_42, %c0_43] : memref<1x32xf32, #tpu.memory_space<vmem>>, vector<1x32xf32>
      %c0_44 = arith.constant 0 : index
      %c0_45 = arith.constant 0 : index
      %56 = vector.load %arg4[%c0_44, %c0_45] : memref<1x32xf32, #tpu.memory_space<vmem>>, vector<1x32xf32>
      %cst_46 = arith.constant dense<0.000000e+00> : vector<5xf32>
      %57 = vector.multi_reduction <add>, %54, %cst_46 [1] : vector<5x32xf32> to vector<5xf32>
      %58 = vector.shape_cast %57 : vector<5xf32> to vector<5x1xf32>
      %cst_47 = arith.constant 3.200000e+01 : f32
      %59 = vector.broadcast %cst_47 : f32 to vector<5x1xf32>
      %60 = arith.divf %58, %59 : vector<5x1xf32>
      %61 = vector.broadcast %60 : vector<5x1xf32> to vector<5x32xf32>
      %62 = arith.subf %54, %61 : vector<5x32xf32>
      %63 = arith.mulf %62, %62 : vector<5x32xf32>
      %cst_48 = arith.constant dense<0.000000e+00> : vector<5xf32>
      %64 = vector.multi_reduction <add>, %63, %cst_48 [1] : vector<5x32xf32> to vector<5xf32>
      %65 = vector.shape_cast %64 : vector<5xf32> to vector<5x1xf32>
      %cst_49 = arith.constant 3.200000e+01 : f32
      %66 = vector.broadcast %cst_49 : f32 to vector<5x1xf32>
      %67 = arith.divf %65, %66 : vector<5x1xf32>
      %cst_50 = arith.constant 9.99999974E-6 : f32
      %68 = vector.broadcast %cst_50 : f32 to vector<5x1xf32>
      %69 = arith.addf %67, %68 : vector<5x1xf32>
      %70 = math.rsqrt %69 : vector<5x1xf32>
      %71 = vector.broadcast %70 : vector<5x1xf32> to vector<5x32xf32>
      %72 = arith.mulf %62, %71 : vector<5x32xf32>
      %73 = vector.broadcast %55 : vector<1x32xf32> to vector<5x32xf32>
      %74 = arith.mulf %72, %73 : vector<5x32xf32>
      %75 = vector.broadcast %56 : vector<1x32xf32> to vector<5x32xf32>
      %76 = arith.addf %74, %75 : vector<5x32xf32>
      %77 = arith.truncf %76 : vector<5x32xf32> to vector<5x32xbf16>
      %c0_51 = arith.constant 0 : index
      %c0_52 = arith.constant 0 : index
      %78 = vector.load %arg15[%c0_51, %c0_52] : memref<5x32xbf16, #tpu.memory_space<vmem>>, vector<5x32xbf16>
      tpu.vector_store %arg15[%c0_51, %c0_52], %77 {strides = array<i32>} : memref<5x32xbf16, #tpu.memory_space<vmem>>, vector<5x32xbf16>,
      %cst_53 = arith.constant 0.000000e+00 : f32
      %79 = vector.broadcast %cst_53 : f32 to vector<5x32xf32>
      %c0_54 = arith.constant 0 : index
      %c0_55 = arith.constant 0 : index
      %80 = vector.load %arg16[%c0_54, %c0_55] : memref<5x32xf32, #tpu.memory_space<vmem>>, vector<5x32xf32>
      tpu.vector_store %arg16[%c0_54, %c0_55], %79 {strides = array<i32>} : memref<5x32xf32, #tpu.memory_space<vmem>>, vector<5x32xf32>,
    } else {
    }
    %c0 = arith.constant 0 : index
    %c0_1 = arith.constant 0 : index
    %3 = vector.load %arg15[%c0, %c0_1] : memref<5x32xbf16, #tpu.memory_space<vmem>>, vector<5x32xbf16>
    %c0_2 = arith.constant 0 : index
    %c0_3 = arith.constant 0 : index
    %4 = vector.load %arg15[%c0_2, %c0_3] : memref<5x32xbf16, #tpu.memory_space<vmem>>, vector<5x32xbf16>
    %c0_4 = arith.constant 0 : index
    %c0_5 = arith.constant 0 : index
    %c0_6 = arith.constant 0 : index
    %5 = vector.load %arg5[%c0_4, %c0_5, %c0_6] : memref<1x8x32xbf16, #tpu.memory_space<vmem>>, vector<1x8x32xbf16>
    %6 = vector.shape_cast %5 : vector<1x8x32xbf16> to vector<8x32xbf16>
    %c0_7 = arith.constant 0 : index
    %c0_8 = arith.constant 0 : index
    %c0_9 = arith.constant 0 : index
    %7 = vector.load %arg6[%c0_7, %c0_8, %c0_9] : memref<1x1x8xf32, #tpu.memory_space<vmem>>, vector<1x1x8xf32>
    %8 = vector.shape_cast %7 : vector<1x1x8xf32> to vector<1x8xf32>
    %cst = arith.constant dense<0.000000e+00> : vector<5x8xf32>
    %9 = tpu.matmul %3, %6, %cst {dimension_numbers = #tpu.dot_dimension_numbers<[1], [1], [0], [0], [0, 0, 1, 0], [], []>} : vector<5x32xbf16>, vector<8x32xbf16>, vector<5x8xf32> -> vector<5x8xf32>
    %10 = vector.broadcast %8 : vector<1x8xf32> to vector<5x8xf32>
    %11 = arith.addf %9, %10 : vector<5x8xf32>
    %c0_10 = arith.constant 0 : index
    %c0_11 = arith.constant 0 : index
    %c0_12 = arith.constant 0 : index
    %12 = vector.load %arg7[%c0_10, %c0_11, %c0_12] : memref<1x8x32xbf16, #tpu.memory_space<vmem>>, vector<1x8x32xbf16>
    %13 = vector.shape_cast %12 : vector<1x8x32xbf16> to vector<8x32xbf16>
    %c0_13 = arith.constant 0 : index
    %c0_14 = arith.constant 0 : index
    %c0_15 = arith.constant 0 : index
    %14 = vector.load %arg8[%c0_13, %c0_14, %c0_15] : memref<1x1x8xf32, #tpu.memory_space<vmem>>, vector<1x1x8xf32>
    %15 = vector.shape_cast %14 : vector<1x1x8xf32> to vector<1x8xf32>
    %cst_16 = arith.constant dense<0.000000e+00> : vector<5x8xf32>
    %16 = tpu.matmul %4, %13, %cst_16 {dimension_numbers = #tpu.dot_dimension_numbers<[1], [1], [0], [0], [0, 0, 1, 0], [], []>} : vector<5x32xbf16>, vector<8x32xbf16>, vector<5x8xf32> -> vector<5x8xf32>
    %17 = vector.broadcast %15 : vector<1x8xf32> to vector<5x8xf32>
    %18 = arith.addf %16, %17 : vector<5x8xf32>
    %c0_17 = arith.constant 0 : index
    %c0_18 = arith.constant 0 : index
    %c0_19 = arith.constant 0 : index
    %19 = vector.load %arg9[%c0_17, %c0_18, %c0_19] : memref<1x8x32xbf16, #tpu.memory_space<vmem>>, vector<1x8x32xbf16>
    %20 = vector.shape_cast %19 : vector<1x8x32xbf16> to vector<8x32xbf16>
    %c0_20 = arith.constant 0 : index
    %c0_21 = arith.constant 0 : index
    %c0_22 = arith.constant 0 : index
    %21 = vector.load %arg10[%c0_20, %c0_21, %c0_22] : memref<1x1x8xf32, #tpu.memory_space<vmem>>, vector<1x1x8xf32>
    %22 = vector.shape_cast %21 : vector<1x1x8xf32> to vector<1x8xf32>
    %cst_23 = arith.constant dense<0.000000e+00> : vector<5x8xf32>
    %23 = tpu.matmul %4, %20, %cst_23 {dimension_numbers = #tpu.dot_dimension_numbers<[1], [1], [0], [0], [0, 0, 1, 0], [], []>} : vector<5x32xbf16>, vector<8x32xbf16>, vector<5x8xf32> -> vector<5x8xf32>
    %24 = vector.broadcast %22 : vector<1x8xf32> to vector<5x8xf32>
    %25 = arith.addf %23, %24 : vector<5x8xf32>
    %26 = arith.truncf %11 : vector<5x8xf32> to vector<5x8xbf16>
    %27 = arith.truncf %18 : vector<5x8xf32> to vector<5x8xbf16>
    %cst_24 = arith.constant dense<0.000000e+00> : vector<5x5xf32>
    %28 = tpu.matmul %26, %27, %cst_24 {dimension_numbers = #tpu.dot_dimension_numbers<[1], [1], [0], [0], [0, 0, 1, 0], [], []>} : vector<5x8xbf16>, vector<5x8xbf16>, vector<5x5xf32> -> vector<5x5xf32>
    %c0_25 = arith.constant 0 : index
    %c0_26 = arith.constant 0 : index
    %29 = vector.load %arg13[%c0_25, %c0_26] : memref<5x5xf32, #tpu.memory_space<vmem>>, vector<5x5xf32>
    %30 = arith.addf %28, %29 : vector<5x5xf32>
    %cst_27 = arith.constant dense<0xFF800000> : vector<5xf32>
    %31 = vector.multi_reduction <maximumf>, %30, %cst_27 [1] : vector<5x5xf32> to vector<5xf32>
    %32 = vector.shape_cast %31 : vector<5xf32> to vector<5x1xf32>
    %33 = vector.broadcast %32 : vector<5x1xf32> to vector<5x5xf32>
    %34 = arith.subf %30, %33 : vector<5x5xf32>
    %35 = math.exp %34 : vector<5x5xf32>
    %cst_28 = arith.constant dense<0.000000e+00> : vector<5xf32>
    %36 = vector.multi_reduction <add>, %35, %cst_28 [1] : vector<5x5xf32> to vector<5xf32>
    %37 = vector.shape_cast %36 : vector<5xf32> to vector<5x1xf32>
    %38 = vector.broadcast %37 : vector<5x1xf32> to vector<5x5xf32>
    %39 = arith.divf %35, %38 : vector<5x5xf32>
    %40 = arith.truncf %39 : vector<5x5xf32> to vector<5x5xbf16>
    %41 = arith.truncf %25 : vector<5x8xf32> to vector<5x8xbf16>
    %cst_29 = arith.constant dense<0.000000e+00> : vector<5x8xf32>
    %42 = tpu.matmul %40, %41, %cst_29 {dimension_numbers = #tpu.dot_dimension_numbers<[1], [0], [0], [1], [0, 0, 1, 1], [], []>} : vector<5x5xbf16>, vector<5x8xbf16>, vector<5x8xf32> -> vector<5x8xf32>
    %c0_30 = arith.constant 0 : index
    %c0_31 = arith.constant 0 : index
    %43 = vector.load %arg16[%c0_30, %c0_31] : memref<5x32xf32, #tpu.memory_space<vmem>>, vector<5x32xf32>
    %44 = arith.truncf %42 : vector<5x8xf32> to vector<5x8xbf16>
    %c0_32 = arith.constant 0 : index
    %c0_33 = arith.constant 0 : index
    %c0_34 = arith.constant 0 : index
    %45 = vector.load %arg11[%c0_32, %c0_33, %c0_34] : memref<1x8x32xbf16, #tpu.memory_space<vmem>>, vector<1x8x32xbf16>
    %46 = vector.shape_cast %45 : vector<1x8x32xbf16> to vector<8x32xbf16>
    %cst_35 = arith.constant dense<0.000000e+00> : vector<5x32xf32>
    %47 = tpu.matmul %44, %46, %cst_35 {dimension_numbers = #tpu.dot_dimension_numbers<[1], [0], [0], [1], [0, 0, 1, 1], [], []>} : vector<5x8xbf16>, vector<8x32xbf16>, vector<5x32xf32> -> vector<5x32xf32>
    %48 = arith.addf %43, %47 : vector<5x32xf32>
    %c0_36 = arith.constant 0 : index
    %c0_37 = arith.constant 0 : index
    %49 = vector.load %arg16[%c0_36, %c0_37] : memref<5x32xf32, #tpu.memory_space<vmem>>, vector<5x32xf32>
    tpu.vector_store %arg16[%c0_36, %c0_37], %48 {strides = array<i32>} : memref<5x32xf32, #tpu.memory_space<vmem>>, vector<5x32xf32>,
    %c3_i32 = arith.constant 3 : i32
    %50 = arith.cmpi eq, %arg1, %c3_i32 : i32
    %51 = arith.extui %50 : i1 to i32
    %c0_i32_38 = arith.constant 0 : i32
    %52 = arith.cmpi ne, %51, %c0_i32_38 : i32
    scf.if %52 {
      %c0_39 = arith.constant 0 : index
      %c0_40 = arith.constant 0 : index
      %c0_41 = arith.constant 0 : index
      %53 = vector.load %arg2[%c0_39, %c0_40, %c0_41] : memref<1x5x32xf32, #tpu.memory_space<vmem>>, vector<1x5x32xf32>
      %54 = vector.shape_cast %53 : vector<1x5x32xf32> to vector<5x32xf32>
      %c0_42 = arith.constant 0 : index
      %c0_43 = arith.constant 0 : index
      %55 = vector.load %arg16[%c0_42, %c0_43] : memref<5x32xf32, #tpu.memory_space<vmem>>, vector<5x32xf32>
      %56 = arith.addf %54, %55 : vector<5x32xf32>
      %c0_44 = arith.constant 0 : index
      %c0_45 = arith.constant 0 : index
      %57 = vector.load %arg12[%c0_44, %c0_45] : memref<1x32xf32, #tpu.memory_space<vmem>>, vector<1x32xf32>
      %58 = vector.broadcast %57 : vector<1x32xf32> to vector<5x32xf32>
      %59 = arith.addf %56, %58 : vector<5x32xf32>
      %c0_46 = arith.constant 0 : index
      %c0_47 = arith.constant 0 : index
      %c0_48 = arith.constant 0 : index
      %60 = vector.load %arg14[%c0_46, %c0_47, %c0_48] : memref<1x5x32xf32, #tpu.memory_space<vmem>>, vector<1x5x32xf32>
      %61 = vector.shape_cast %60 : vector<1x5x32xf32> to vector<5x32xf32>
      %62 = vector.shape_cast %59 : vector<5x32xf32> to vector<1x5x32xf32>
      tpu.vector_store %arg14[%c0_46, %c0_47, %c0_48], %62 {strides = array<i32>} : memref<1x5x32xf32, #tpu.memory_space<vmem>>, vector<1x5x32xf32>,
    } else {
    }
    return
  }
  func.func @transform_0(%arg0: i32, %arg1: i32) -> (i32, i32, i32) {
    %c0_i32 = arith.constant 0 : i32
    %c0_i32_0 = arith.constant 0 : i32
    %c0_i32_1 = arith.constant 0 : i32
    return %arg0, %c0_i32, %c0_i32_0 : i32, i32, i32
  }
  func.func @transform_1(%arg0: i32, %arg1: i32) -> (i32, i32) {
    %c0_i32 = arith.constant 0 : i32
    %c0_i32_0 = arith.constant 0 : i32
    %c0_i32_1 = arith.constant 0 : i32
    return %c0_i32, %c0_i32_0 : i32, i32
  }
  func.func @transform_2(%arg0: i32, %arg1: i32) -> (i32, i32) {
    %c0_i32 = arith.constant 0 : i32
    %c0_i32_0 = arith.constant 0 : i32
    %c0_i32_1 = arith.constant 0 : i32
    return %c0_i32, %c0_i32_0 : i32, i32
  }
  func.func @transform_3(%arg0: i32, %arg1: i32) -> (i32, i32, i32) {
    %c0_i32 = arith.constant 0 : i32
    %c0_i32_0 = arith.constant 0 : i32
    %c0_i32_1 = arith.constant 0 : i32
    return %arg1, %c0_i32, %c0_i32_0 : i32, i32, i32
  }
  func.func @transform_4(%arg0: i32, %arg1: i32) -> (i32, i32, i32) {
    %c0_i32 = arith.constant 0 : i32
    %c0_i32_0 = arith.constant 0 : i32
    %c0_i32_1 = arith.constant 0 : i32
    return %arg1, %c0_i32, %c0_i32_0 : i32, i32, i32
  }
  func.func @transform_5(%arg0: i32, %arg1: i32) -> (i32, i32, i32) {
    %c0_i32 = arith.constant 0 : i32
    %c0_i32_0 = arith.constant 0 : i32
    %c0_i32_1 = arith.constant 0 : i32
    return %arg1, %c0_i32, %c0_i32_0 : i32, i32, i32
  }
  func.func @transform_6(%arg0: i32, %arg1: i32) -> (i32, i32, i32) {
    %c0_i32 = arith.constant 0 : i32
    %c0_i32_0 = arith.constant 0 : i32
    %c0_i32_1 = arith.constant 0 : i32
    return %arg1, %c0_i32, %c0_i32_0 : i32, i32, i32
  }
  func.func @transform_7(%arg0: i32, %arg1: i32) -> (i32, i32, i32) {
    %c0_i32 = arith.constant 0 : i32
    %c0_i32_0 = arith.constant 0 : i32
    %c0_i32_1 = arith.constant 0 : i32
    return %arg1, %c0_i32, %c0_i32_0 : i32, i32, i32
  }
  func.func @transform_8(%arg0: i32, %arg1: i32) -> (i32, i32, i32) {
    %c0_i32 = arith.constant 0 : i32
    %c0_i32_0 = arith.constant 0 : i32
    %c0_i32_1 = arith.constant 0 : i32
    return %arg1, %c0_i32, %c0_i32_0 : i32, i32, i32
  }
  func.func @transform_9(%arg0: i32, %arg1: i32) -> (i32, i32, i32) {
    %c0_i32 = arith.constant 0 : i32
    %c0_i32_0 = arith.constant 0 : i32
    %c0_i32_1 = arith.constant 0 : i32
    return %arg1, %c0_i32, %c0_i32_0 : i32, i32, i32
  }
  func.func @transform_10(%arg0: i32, %arg1: i32) -> (i32, i32) {
    %c0_i32 = arith.constant 0 : i32
    %c0_i32_0 = arith.constant 0 : i32
    %c0_i32_1 = arith.constant 0 : i32
    return %c0_i32, %c0_i32_0 : i32, i32
  }
  func.func @transform_11(%arg0: i32, %arg1: i32) -> (i32, i32) {
    %c0_i32 = arith.constant 0 : i32
    %c0_i32_0 = arith.constant 0 : i32
    %c0_i32_1 = arith.constant 0 : i32
    return %c0_i32, %c0_i32_0 : i32, i32
  }
  func.func @transform_12(%arg0: i32, %arg1: i32) -> (i32, i32, i32) {
    %c0_i32 = arith.constant 0 : i32
    %c0_i32_0 = arith.constant 0 : i32
    %c0_i32_1 = arith.constant 0 : i32
    return %arg0, %c0_i32, %c0_i32_0 : i32, i32, i32
  }
}

module attributes {stable_mosaic.version = 11 : i64} {
  func.func @_mha_head_kernel(%arg0: i32, %arg1: i32, %arg2: memref<1x5x32xf32, #tpu.memory_space<vmem>>, %arg3: memref<1x16x32xbf16, #tpu.memory_space<vmem>>, %arg4: memref<1x32xf32, #tpu.memory_space<vmem>>, %arg5: memref<1x32xf32, #tpu.memory_space<vmem>>, %arg6: memref<1x8x32xbf16, #tpu.memory_space<vmem>>, %arg7: memref<1x1x8xf32, #tpu.memory_space<vmem>>, %arg8: memref<1x8x32xbf16, #tpu.memory_space<vmem>>, %arg9: memref<1x1x8xf32, #tpu.memory_space<vmem>>, %arg10: memref<1x8x32xbf16, #tpu.memory_space<vmem>>, %arg11: memref<1x1x8xf32, #tpu.memory_space<vmem>>, %arg12: memref<1x8x32xbf16, #tpu.memory_space<vmem>>, %arg13: memref<1x32xf32, #tpu.memory_space<vmem>>, %arg14: memref<1x5x32xf32, #tpu.memory_space<vmem>>, %arg15: memref<1x5x16xf32, #tpu.memory_space<vmem>>, %arg16: memref<5x32xbf16, #tpu.memory_space<vmem>>, %arg17: memref<16x32xbf16, #tpu.memory_space<vmem>>, %arg18: memref<5x32xf32, #tpu.memory_space<vmem>>, %arg19: memref<5x16xf32, #tpu.memory_space<vmem>>) attributes {dimension_semantics = [#tpu.dimension_semantics<parallel>, #tpu.dimension_semantics<arbitrary>], iteration_bounds = array<i64: 2, 4>, scalar_prefetch = 0 : i64, scratch_operands = 4 : i64, tpu.core_type = #tpu.core_type<tc>, window_params = [{transform_indices = @transform_0, window_bounds = array<i64: 1, 5, 32>}, {transform_indices = @transform_1, window_bounds = array<i64: 1, 16, 32>}, {pipeline_mode = #tpu.pipeline_mode<synchronous>, transform_indices = @transform_2, window_bounds = array<i64: 1, 32>}, {pipeline_mode = #tpu.pipeline_mode<synchronous>, transform_indices = @transform_3, window_bounds = array<i64: 1, 32>}, {transform_indices = @transform_4, window_bounds = array<i64: 1, 8, 32>}, {transform_indices = @transform_5, window_bounds = array<i64: 1, 1, 8>}, {transform_indices = @transform_6, window_bounds = array<i64: 1, 8, 32>}, {transform_indices = @transform_7, window_bounds = array<i64: 1, 1, 8>}, {transform_indices = @transform_8, window_bounds = array<i64: 1, 8, 32>}, {transform_indices = @transform_9, window_bounds = array<i64: 1, 1, 8>}, {transform_indices = @transform_10, window_bounds = array<i64: 1, 8, 32>}, {pipeline_mode = #tpu.pipeline_mode<synchronous>, transform_indices = @transform_11, window_bounds = array<i64: 1, 32>}, {transform_indices = @transform_12, window_bounds = array<i64: 1, 5, 32>}, {transform_indices = @transform_13, window_bounds = array<i64: 1, 5, 16>}]} {
    %c0_i32 = arith.constant 0 : i32
    %0 = arith.cmpi eq, %arg1, %c0_i32 : i32
    %1 = arith.extui %0 : i1 to i32
    %c0_i32_0 = arith.constant 0 : i32
    %2 = arith.cmpi ne, %1, %c0_i32_0 : i32
    scf.if %2 {
      %c0_41 = arith.constant 0 : index
      %c0_42 = arith.constant 0 : index
      %c0_43 = arith.constant 0 : index
      %54 = vector.load %arg2[%c0_41, %c0_42, %c0_43] : memref<1x5x32xf32, #tpu.memory_space<vmem>>, vector<1x5x32xf32>
      %55 = vector.shape_cast %54 : vector<1x5x32xf32> to vector<5x32xf32>
      %c0_44 = arith.constant 0 : index
      %c0_45 = arith.constant 0 : index
      %56 = vector.load %arg4[%c0_44, %c0_45] : memref<1x32xf32, #tpu.memory_space<vmem>>, vector<1x32xf32>
      %c0_46 = arith.constant 0 : index
      %c0_47 = arith.constant 0 : index
      %57 = vector.load %arg5[%c0_46, %c0_47] : memref<1x32xf32, #tpu.memory_space<vmem>>, vector<1x32xf32>
      %cst_48 = arith.constant dense<0.000000e+00> : vector<5xf32>
      %58 = vector.multi_reduction <add>, %55, %cst_48 [1] : vector<5x32xf32> to vector<5xf32>
      %59 = vector.shape_cast %58 : vector<5xf32> to vector<5x1xf32>
      %cst_49 = arith.constant 3.200000e+01 : f32
      %60 = vector.broadcast %cst_49 : f32 to vector<5x1xf32>
      %61 = arith.divf %59, %60 : vector<5x1xf32>
      %62 = vector.broadcast %61 : vector<5x1xf32> to vector<5x32xf32>
      %63 = arith.subf %55, %62 : vector<5x32xf32>
      %64 = arith.mulf %63, %63 : vector<5x32xf32>
      %cst_50 = arith.constant dense<0.000000e+00> : vector<5xf32>
      %65 = vector.multi_reduction <add>, %64, %cst_50 [1] : vector<5x32xf32> to vector<5xf32>
      %66 = vector.shape_cast %65 : vector<5xf32> to vector<5x1xf32>
      %cst_51 = arith.constant 3.200000e+01 : f32
      %67 = vector.broadcast %cst_51 : f32 to vector<5x1xf32>
      %68 = arith.divf %66, %67 : vector<5x1xf32>
      %cst_52 = arith.constant 9.99999974E-6 : f32
      %69 = vector.broadcast %cst_52 : f32 to vector<5x1xf32>
      %70 = arith.addf %68, %69 : vector<5x1xf32>
      %71 = math.rsqrt %70 : vector<5x1xf32>
      %72 = vector.broadcast %71 : vector<5x1xf32> to vector<5x32xf32>
      %73 = arith.mulf %63, %72 : vector<5x32xf32>
      %74 = vector.broadcast %56 : vector<1x32xf32> to vector<5x32xf32>
      %75 = arith.mulf %73, %74 : vector<5x32xf32>
      %76 = vector.broadcast %57 : vector<1x32xf32> to vector<5x32xf32>
      %77 = arith.addf %75, %76 : vector<5x32xf32>
      %78 = arith.truncf %77 : vector<5x32xf32> to vector<5x32xbf16>
      %c0_53 = arith.constant 0 : index
      %c0_54 = arith.constant 0 : index
      %79 = vector.load %arg16[%c0_53, %c0_54] : memref<5x32xbf16, #tpu.memory_space<vmem>>, vector<5x32xbf16>
      tpu.vector_store %arg16[%c0_53, %c0_54], %78 {strides = array<i32>} : memref<5x32xbf16, #tpu.memory_space<vmem>>, vector<5x32xbf16>,
      %c0_55 = arith.constant 0 : index
      %c0_56 = arith.constant 0 : index
      %c0_57 = arith.constant 0 : index
      %80 = vector.load %arg3[%c0_55, %c0_56, %c0_57] : memref<1x16x32xbf16, #tpu.memory_space<vmem>>, vector<1x16x32xbf16>
      %81 = vector.shape_cast %80 : vector<1x16x32xbf16> to vector<16x32xbf16>
      %c0_58 = arith.constant 0 : index
      %c0_59 = arith.constant 0 : index
      %82 = vector.load %arg4[%c0_58, %c0_59] : memref<1x32xf32, #tpu.memory_space<vmem>>, vector<1x32xf32>
      %c0_60 = arith.constant 0 : index
      %c0_61 = arith.constant 0 : index
      %83 = vector.load %arg5[%c0_60, %c0_61] : memref<1x32xf32, #tpu.memory_space<vmem>>, vector<1x32xf32>
      %84 = arith.extf %81 : vector<16x32xbf16> to vector<16x32xf32>
      %cst_62 = arith.constant dense<0.000000e+00> : vector<16xf32>
      %85 = vector.multi_reduction <add>, %84, %cst_62 [1] : vector<16x32xf32> to vector<16xf32>
      %86 = vector.shape_cast %85 : vector<16xf32> to vector<16x1xf32>
      %cst_63 = arith.constant 3.200000e+01 : f32
      %87 = vector.broadcast %cst_63 : f32 to vector<16x1xf32>
      %88 = arith.divf %86, %87 : vector<16x1xf32>
      %89 = vector.broadcast %88 : vector<16x1xf32> to vector<16x32xf32>
      %90 = arith.subf %84, %89 : vector<16x32xf32>
      %91 = arith.mulf %90, %90 : vector<16x32xf32>
      %cst_64 = arith.constant dense<0.000000e+00> : vector<16xf32>
      %92 = vector.multi_reduction <add>, %91, %cst_64 [1] : vector<16x32xf32> to vector<16xf32>
      %93 = vector.shape_cast %92 : vector<16xf32> to vector<16x1xf32>
      %cst_65 = arith.constant 3.200000e+01 : f32
      %94 = vector.broadcast %cst_65 : f32 to vector<16x1xf32>
      %95 = arith.divf %93, %94 : vector<16x1xf32>
      %cst_66 = arith.constant 9.99999974E-6 : f32
      %96 = vector.broadcast %cst_66 : f32 to vector<16x1xf32>
      %97 = arith.addf %95, %96 : vector<16x1xf32>
      %98 = math.rsqrt %97 : vector<16x1xf32>
      %99 = vector.broadcast %98 : vector<16x1xf32> to vector<16x32xf32>
      %100 = arith.mulf %90, %99 : vector<16x32xf32>
      %101 = vector.broadcast %82 : vector<1x32xf32> to vector<16x32xf32>
      %102 = arith.mulf %100, %101 : vector<16x32xf32>
      %103 = vector.broadcast %83 : vector<1x32xf32> to vector<16x32xf32>
      %104 = arith.addf %102, %103 : vector<16x32xf32>
      %105 = arith.truncf %104 : vector<16x32xf32> to vector<16x32xbf16>
      %c0_67 = arith.constant 0 : index
      %c0_68 = arith.constant 0 : index
      %106 = vector.load %arg17[%c0_67, %c0_68] : memref<16x32xbf16, #tpu.memory_space<vmem>>, vector<16x32xbf16>
      tpu.vector_store %arg17[%c0_67, %c0_68], %105 {strides = array<i32>} : memref<16x32xbf16, #tpu.memory_space<vmem>>, vector<16x32xbf16>,
      %cst_69 = arith.constant 0.000000e+00 : f32
      %107 = vector.broadcast %cst_69 : f32 to vector<5x32xf32>
      %c0_70 = arith.constant 0 : index
      %c0_71 = arith.constant 0 : index
      %108 = vector.load %arg18[%c0_70, %c0_71] : memref<5x32xf32, #tpu.memory_space<vmem>>, vector<5x32xf32>
      tpu.vector_store %arg18[%c0_70, %c0_71], %107 {strides = array<i32>} : memref<5x32xf32, #tpu.memory_space<vmem>>, vector<5x32xf32>,
      %cst_72 = arith.constant 0.000000e+00 : f32
      %109 = vector.broadcast %cst_72 : f32 to vector<5x16xf32>
      %c0_73 = arith.constant 0 : index
      %c0_74 = arith.constant 0 : index
      %110 = vector.load %arg19[%c0_73, %c0_74] : memref<5x16xf32, #tpu.memory_space<vmem>>, vector<5x16xf32>
      tpu.vector_store %arg19[%c0_73, %c0_74], %109 {strides = array<i32>} : memref<5x16xf32, #tpu.memory_space<vmem>>, vector<5x16xf32>,
    } else {
    }
    %c0 = arith.constant 0 : index
    %c0_1 = arith.constant 0 : index
    %3 = vector.load %arg16[%c0, %c0_1] : memref<5x32xbf16, #tpu.memory_space<vmem>>, vector<5x32xbf16>
    %c0_2 = arith.constant 0 : index
    %c0_3 = arith.constant 0 : index
    %4 = vector.load %arg17[%c0_2, %c0_3] : memref<16x32xbf16, #tpu.memory_space<vmem>>, vector<16x32xbf16>
    %c0_4 = arith.constant 0 : index
    %c0_5 = arith.constant 0 : index
    %c0_6 = arith.constant 0 : index
    %5 = vector.load %arg6[%c0_4, %c0_5, %c0_6] : memref<1x8x32xbf16, #tpu.memory_space<vmem>>, vector<1x8x32xbf16>
    %6 = vector.shape_cast %5 : vector<1x8x32xbf16> to vector<8x32xbf16>
    %c0_7 = arith.constant 0 : index
    %c0_8 = arith.constant 0 : index
    %c0_9 = arith.constant 0 : index
    %7 = vector.load %arg7[%c0_7, %c0_8, %c0_9] : memref<1x1x8xf32, #tpu.memory_space<vmem>>, vector<1x1x8xf32>
    %8 = vector.shape_cast %7 : vector<1x1x8xf32> to vector<1x8xf32>
    %cst = arith.constant dense<0.000000e+00> : vector<5x8xf32>
    %9 = tpu.matmul %3, %6, %cst {dimension_numbers = #tpu.dot_dimension_numbers<[1], [1], [0], [0], [0, 0, 1, 0], [], []>} : vector<5x32xbf16>, vector<8x32xbf16>, vector<5x8xf32> -> vector<5x8xf32>
    %10 = vector.broadcast %8 : vector<1x8xf32> to vector<5x8xf32>
    %11 = arith.addf %9, %10 : vector<5x8xf32>
    %c0_10 = arith.constant 0 : index
    %c0_11 = arith.constant 0 : index
    %c0_12 = arith.constant 0 : index
    %12 = vector.load %arg8[%c0_10, %c0_11, %c0_12] : memref<1x8x32xbf16, #tpu.memory_space<vmem>>, vector<1x8x32xbf16>
    %13 = vector.shape_cast %12 : vector<1x8x32xbf16> to vector<8x32xbf16>
    %c0_13 = arith.constant 0 : index
    %c0_14 = arith.constant 0 : index
    %c0_15 = arith.constant 0 : index
    %14 = vector.load %arg9[%c0_13, %c0_14, %c0_15] : memref<1x1x8xf32, #tpu.memory_space<vmem>>, vector<1x1x8xf32>
    %15 = vector.shape_cast %14 : vector<1x1x8xf32> to vector<1x8xf32>
    %cst_16 = arith.constant dense<0.000000e+00> : vector<16x8xf32>
    %16 = tpu.matmul %4, %13, %cst_16 {dimension_numbers = #tpu.dot_dimension_numbers<[1], [1], [0], [0], [0, 0, 1, 0], [], []>} : vector<16x32xbf16>, vector<8x32xbf16>, vector<16x8xf32> -> vector<16x8xf32>
    %17 = vector.broadcast %15 : vector<1x8xf32> to vector<16x8xf32>
    %18 = arith.addf %16, %17 : vector<16x8xf32>
    %c0_17 = arith.constant 0 : index
    %c0_18 = arith.constant 0 : index
    %c0_19 = arith.constant 0 : index
    %19 = vector.load %arg10[%c0_17, %c0_18, %c0_19] : memref<1x8x32xbf16, #tpu.memory_space<vmem>>, vector<1x8x32xbf16>
    %20 = vector.shape_cast %19 : vector<1x8x32xbf16> to vector<8x32xbf16>
    %c0_20 = arith.constant 0 : index
    %c0_21 = arith.constant 0 : index
    %c0_22 = arith.constant 0 : index
    %21 = vector.load %arg11[%c0_20, %c0_21, %c0_22] : memref<1x1x8xf32, #tpu.memory_space<vmem>>, vector<1x1x8xf32>
    %22 = vector.shape_cast %21 : vector<1x1x8xf32> to vector<1x8xf32>
    %cst_23 = arith.constant dense<0.000000e+00> : vector<16x8xf32>
    %23 = tpu.matmul %4, %20, %cst_23 {dimension_numbers = #tpu.dot_dimension_numbers<[1], [1], [0], [0], [0, 0, 1, 0], [], []>} : vector<16x32xbf16>, vector<8x32xbf16>, vector<16x8xf32> -> vector<16x8xf32>
    %24 = vector.broadcast %22 : vector<1x8xf32> to vector<16x8xf32>
    %25 = arith.addf %23, %24 : vector<16x8xf32>
    %26 = arith.truncf %11 : vector<5x8xf32> to vector<5x8xbf16>
    %27 = arith.truncf %18 : vector<16x8xf32> to vector<16x8xbf16>
    %cst_24 = arith.constant dense<0.000000e+00> : vector<5x16xf32>
    %28 = tpu.matmul %26, %27, %cst_24 {dimension_numbers = #tpu.dot_dimension_numbers<[1], [1], [0], [0], [0, 0, 1, 0], [], []>} : vector<5x8xbf16>, vector<16x8xbf16>, vector<5x16xf32> -> vector<5x16xf32>
    %cst_25 = arith.constant dense<0xFF800000> : vector<5xf32>
    %29 = vector.multi_reduction <maximumf>, %28, %cst_25 [1] : vector<5x16xf32> to vector<5xf32>
    %30 = vector.shape_cast %29 : vector<5xf32> to vector<5x1xf32>
    %31 = vector.broadcast %30 : vector<5x1xf32> to vector<5x16xf32>
    %32 = arith.subf %28, %31 : vector<5x16xf32>
    %33 = math.exp %32 : vector<5x16xf32>
    %cst_26 = arith.constant dense<0.000000e+00> : vector<5xf32>
    %34 = vector.multi_reduction <add>, %33, %cst_26 [1] : vector<5x16xf32> to vector<5xf32>
    %35 = vector.shape_cast %34 : vector<5xf32> to vector<5x1xf32>
    %36 = vector.broadcast %35 : vector<5x1xf32> to vector<5x16xf32>
    %37 = arith.divf %33, %36 : vector<5x16xf32>
    %38 = arith.truncf %37 : vector<5x16xf32> to vector<5x16xbf16>
    %39 = arith.truncf %25 : vector<16x8xf32> to vector<16x8xbf16>
    %cst_27 = arith.constant dense<0.000000e+00> : vector<5x8xf32>
    %40 = tpu.matmul %38, %39, %cst_27 {dimension_numbers = #tpu.dot_dimension_numbers<[1], [0], [0], [1], [0, 0, 1, 1], [], []>} : vector<5x16xbf16>, vector<16x8xbf16>, vector<5x8xf32> -> vector<5x8xf32>
    %c0_28 = arith.constant 0 : index
    %c0_29 = arith.constant 0 : index
    %41 = vector.load %arg18[%c0_28, %c0_29] : memref<5x32xf32, #tpu.memory_space<vmem>>, vector<5x32xf32>
    %42 = arith.truncf %40 : vector<5x8xf32> to vector<5x8xbf16>
    %c0_30 = arith.constant 0 : index
    %c0_31 = arith.constant 0 : index
    %c0_32 = arith.constant 0 : index
    %43 = vector.load %arg12[%c0_30, %c0_31, %c0_32] : memref<1x8x32xbf16, #tpu.memory_space<vmem>>, vector<1x8x32xbf16>
    %44 = vector.shape_cast %43 : vector<1x8x32xbf16> to vector<8x32xbf16>
    %cst_33 = arith.constant dense<0.000000e+00> : vector<5x32xf32>
    %45 = tpu.matmul %42, %44, %cst_33 {dimension_numbers = #tpu.dot_dimension_numbers<[1], [0], [0], [1], [0, 0, 1, 1], [], []>} : vector<5x8xbf16>, vector<8x32xbf16>, vector<5x32xf32> -> vector<5x32xf32>
    %46 = arith.addf %41, %45 : vector<5x32xf32>
    %c0_34 = arith.constant 0 : index
    %c0_35 = arith.constant 0 : index
    %47 = vector.load %arg18[%c0_34, %c0_35] : memref<5x32xf32, #tpu.memory_space<vmem>>, vector<5x32xf32>
    tpu.vector_store %arg18[%c0_34, %c0_35], %46 {strides = array<i32>} : memref<5x32xf32, #tpu.memory_space<vmem>>, vector<5x32xf32>,
    %c0_36 = arith.constant 0 : index
    %c0_37 = arith.constant 0 : index
    %48 = vector.load %arg19[%c0_36, %c0_37] : memref<5x16xf32, #tpu.memory_space<vmem>>, vector<5x16xf32>
    %49 = arith.addf %48, %37 : vector<5x16xf32>
    %c0_38 = arith.constant 0 : index
    %c0_39 = arith.constant 0 : index
    %50 = vector.load %arg19[%c0_38, %c0_39] : memref<5x16xf32, #tpu.memory_space<vmem>>, vector<5x16xf32>
    tpu.vector_store %arg19[%c0_38, %c0_39], %49 {strides = array<i32>} : memref<5x16xf32, #tpu.memory_space<vmem>>, vector<5x16xf32>,
    %c3_i32 = arith.constant 3 : i32
    %51 = arith.cmpi eq, %arg1, %c3_i32 : i32
    %52 = arith.extui %51 : i1 to i32
    %c0_i32_40 = arith.constant 0 : i32
    %53 = arith.cmpi ne, %52, %c0_i32_40 : i32
    scf.if %53 {
      %c0_41 = arith.constant 0 : index
      %c0_42 = arith.constant 0 : index
      %c0_43 = arith.constant 0 : index
      %54 = vector.load %arg2[%c0_41, %c0_42, %c0_43] : memref<1x5x32xf32, #tpu.memory_space<vmem>>, vector<1x5x32xf32>
      %55 = vector.shape_cast %54 : vector<1x5x32xf32> to vector<5x32xf32>
      %c0_44 = arith.constant 0 : index
      %c0_45 = arith.constant 0 : index
      %56 = vector.load %arg18[%c0_44, %c0_45] : memref<5x32xf32, #tpu.memory_space<vmem>>, vector<5x32xf32>
      %57 = arith.addf %55, %56 : vector<5x32xf32>
      %c0_46 = arith.constant 0 : index
      %c0_47 = arith.constant 0 : index
      %58 = vector.load %arg13[%c0_46, %c0_47] : memref<1x32xf32, #tpu.memory_space<vmem>>, vector<1x32xf32>
      %59 = vector.broadcast %58 : vector<1x32xf32> to vector<5x32xf32>
      %60 = arith.addf %57, %59 : vector<5x32xf32>
      %c0_48 = arith.constant 0 : index
      %c0_49 = arith.constant 0 : index
      %c0_50 = arith.constant 0 : index
      %61 = vector.load %arg14[%c0_48, %c0_49, %c0_50] : memref<1x5x32xf32, #tpu.memory_space<vmem>>, vector<1x5x32xf32>
      %62 = vector.shape_cast %61 : vector<1x5x32xf32> to vector<5x32xf32>
      %63 = vector.shape_cast %60 : vector<5x32xf32> to vector<1x5x32xf32>
      tpu.vector_store %arg14[%c0_48, %c0_49, %c0_50], %63 {strides = array<i32>} : memref<1x5x32xf32, #tpu.memory_space<vmem>>, vector<1x5x32xf32>,
      %c0_51 = arith.constant 0 : index
      %c0_52 = arith.constant 0 : index
      %64 = vector.load %arg19[%c0_51, %c0_52] : memref<5x16xf32, #tpu.memory_space<vmem>>, vector<5x16xf32>
      %cst_53 = arith.constant 2.500000e-01 : f32
      %65 = vector.broadcast %cst_53 : f32 to vector<5x16xf32>
      %66 = arith.mulf %64, %65 : vector<5x16xf32>
      %c0_54 = arith.constant 0 : index
      %c0_55 = arith.constant 0 : index
      %c0_56 = arith.constant 0 : index
      %67 = vector.load %arg15[%c0_54, %c0_55, %c0_56] : memref<1x5x16xf32, #tpu.memory_space<vmem>>, vector<1x5x16xf32>
      %68 = vector.shape_cast %67 : vector<1x5x16xf32> to vector<5x16xf32>
      %69 = vector.shape_cast %66 : vector<5x16xf32> to vector<1x5x16xf32>
      tpu.vector_store %arg15[%c0_54, %c0_55, %c0_56], %69 {strides = array<i32>} : memref<1x5x16xf32, #tpu.memory_space<vmem>>, vector<1x5x16xf32>,
    } else {
    }
    return
  }
  func.func @transform_0(%arg0: i32, %arg1: i32) -> (i32, i32, i32) {
    %c0_i32 = arith.constant 0 : i32
    %c0_i32_0 = arith.constant 0 : i32
    %c0_i32_1 = arith.constant 0 : i32
    return %arg0, %c0_i32, %c0_i32_0 : i32, i32, i32
  }
  func.func @transform_1(%arg0: i32, %arg1: i32) -> (i32, i32, i32) {
    %c0_i32 = arith.constant 0 : i32
    %c0_i32_0 = arith.constant 0 : i32
    %c0_i32_1 = arith.constant 0 : i32
    return %arg0, %c0_i32, %c0_i32_0 : i32, i32, i32
  }
  func.func @transform_2(%arg0: i32, %arg1: i32) -> (i32, i32) {
    %c0_i32 = arith.constant 0 : i32
    %c0_i32_0 = arith.constant 0 : i32
    %c0_i32_1 = arith.constant 0 : i32
    return %c0_i32, %c0_i32_0 : i32, i32
  }
  func.func @transform_3(%arg0: i32, %arg1: i32) -> (i32, i32) {
    %c0_i32 = arith.constant 0 : i32
    %c0_i32_0 = arith.constant 0 : i32
    %c0_i32_1 = arith.constant 0 : i32
    return %c0_i32, %c0_i32_0 : i32, i32
  }
  func.func @transform_4(%arg0: i32, %arg1: i32) -> (i32, i32, i32) {
    %c0_i32 = arith.constant 0 : i32
    %c0_i32_0 = arith.constant 0 : i32
    %c0_i32_1 = arith.constant 0 : i32
    return %arg1, %c0_i32, %c0_i32_0 : i32, i32, i32
  }
  func.func @transform_5(%arg0: i32, %arg1: i32) -> (i32, i32, i32) {
    %c0_i32 = arith.constant 0 : i32
    %c0_i32_0 = arith.constant 0 : i32
    %c0_i32_1 = arith.constant 0 : i32
    return %arg1, %c0_i32, %c0_i32_0 : i32, i32, i32
  }
  func.func @transform_6(%arg0: i32, %arg1: i32) -> (i32, i32, i32) {
    %c0_i32 = arith.constant 0 : i32
    %c0_i32_0 = arith.constant 0 : i32
    %c0_i32_1 = arith.constant 0 : i32
    return %arg1, %c0_i32, %c0_i32_0 : i32, i32, i32
  }
  func.func @transform_7(%arg0: i32, %arg1: i32) -> (i32, i32, i32) {
    %c0_i32 = arith.constant 0 : i32
    %c0_i32_0 = arith.constant 0 : i32
    %c0_i32_1 = arith.constant 0 : i32
    return %arg1, %c0_i32, %c0_i32_0 : i32, i32, i32
  }
  func.func @transform_8(%arg0: i32, %arg1: i32) -> (i32, i32, i32) {
    %c0_i32 = arith.constant 0 : i32
    %c0_i32_0 = arith.constant 0 : i32
    %c0_i32_1 = arith.constant 0 : i32
    return %arg1, %c0_i32, %c0_i32_0 : i32, i32, i32
  }
  func.func @transform_9(%arg0: i32, %arg1: i32) -> (i32, i32, i32) {
    %c0_i32 = arith.constant 0 : i32
    %c0_i32_0 = arith.constant 0 : i32
    %c0_i32_1 = arith.constant 0 : i32
    return %arg1, %c0_i32, %c0_i32_0 : i32, i32, i32
  }
  func.func @transform_10(%arg0: i32, %arg1: i32) -> (i32, i32, i32) {
    %c0_i32 = arith.constant 0 : i32
    %c0_i32_0 = arith.constant 0 : i32
    %c0_i32_1 = arith.constant 0 : i32
    return %arg1, %c0_i32, %c0_i32_0 : i32, i32, i32
  }
  func.func @transform_11(%arg0: i32, %arg1: i32) -> (i32, i32) {
    %c0_i32 = arith.constant 0 : i32
    %c0_i32_0 = arith.constant 0 : i32
    %c0_i32_1 = arith.constant 0 : i32
    return %c0_i32, %c0_i32_0 : i32, i32
  }
  func.func @transform_12(%arg0: i32, %arg1: i32) -> (i32, i32, i32) {
    %c0_i32 = arith.constant 0 : i32
    %c0_i32_0 = arith.constant 0 : i32
    %c0_i32_1 = arith.constant 0 : i32
    return %arg0, %c0_i32, %c0_i32_0 : i32, i32, i32
  }
  func.func @transform_13(%arg0: i32, %arg1: i32) -> (i32, i32, i32) {
    %c0_i32 = arith.constant 0 : i32
    %c0_i32_0 = arith.constant 0 : i32
    %c0_i32_1 = arith.constant 0 : i32
    return %arg0, %c0_i32, %c0_i32_0 : i32, i32, i32
  }
}

module attributes {stable_mosaic.version = 11 : i64} {
  func.func @_heads_kernel(%arg0: i32, %arg1: memref<16x32xf32, #tpu.memory_space<vmem>>, %arg2: memref<1x32xf32, #tpu.memory_space<vmem>>, %arg3: memref<1x32xf32, #tpu.memory_space<vmem>>, %arg4: memref<32x16xbf16, #tpu.memory_space<vmem>>, %arg5: memref<32x8xbf16, #tpu.memory_space<vmem>>, %arg6: memref<1x8xf32, #tpu.memory_space<vmem>>, %arg7: memref<32x32xbf16, #tpu.memory_space<vmem>>, %arg8: memref<1x32xf32, #tpu.memory_space<vmem>>, %arg9: memref<32x32xbf16, #tpu.memory_space<vmem>>, %arg10: memref<1x32xf32, #tpu.memory_space<vmem>>, %arg11: memref<32x8xbf16, #tpu.memory_space<vmem>>, %arg12: memref<1x8xf32, #tpu.memory_space<vmem>>, %arg13: memref<16x16xf32, #tpu.memory_space<vmem>>, %arg14: memref<16x16xf32, #tpu.memory_space<vmem>>) attributes {dimension_semantics = [#tpu.dimension_semantics<parallel>], iteration_bounds = array<i64: 1>, scalar_prefetch = 0 : i64, scratch_operands = 0 : i64, tpu.core_type = #tpu.core_type<tc>, window_params = [{transform_indices = @transform_0, window_bounds = array<i64: 16, 32>}, {pipeline_mode = #tpu.pipeline_mode<synchronous>, transform_indices = @transform_1, window_bounds = array<i64: 1, 32>}, {pipeline_mode = #tpu.pipeline_mode<synchronous>, transform_indices = @transform_2, window_bounds = array<i64: 1, 32>}, {pipeline_mode = #tpu.pipeline_mode<synchronous>, transform_indices = @transform_3, window_bounds = array<i64: 32, 16>}, {pipeline_mode = #tpu.pipeline_mode<synchronous>, transform_indices = @transform_4, window_bounds = array<i64: 32, 8>}, {pipeline_mode = #tpu.pipeline_mode<synchronous>, transform_indices = @transform_5, window_bounds = array<i64: 1, 8>}, {pipeline_mode = #tpu.pipeline_mode<synchronous>, transform_indices = @transform_6, window_bounds = array<i64: 32, 32>}, {pipeline_mode = #tpu.pipeline_mode<synchronous>, transform_indices = @transform_7, window_bounds = array<i64: 1, 32>}, {pipeline_mode = #tpu.pipeline_mode<synchronous>, transform_indices = @transform_8, window_bounds = array<i64: 32, 32>}, {pipeline_mode = #tpu.pipeline_mode<synchronous>, transform_indices = @transform_9, window_bounds = array<i64: 1, 32>}, {pipeline_mode = #tpu.pipeline_mode<synchronous>, transform_indices = @transform_10, window_bounds = array<i64: 32, 8>}, {pipeline_mode = #tpu.pipeline_mode<synchronous>, transform_indices = @transform_11, window_bounds = array<i64: 1, 8>}, {transform_indices = @transform_12, window_bounds = array<i64: 16, 16>}, {transform_indices = @transform_13, window_bounds = array<i64: 16, 16>}]} {
    %c0 = arith.constant 0 : index
    %c0_0 = arith.constant 0 : index
    %0 = vector.load %arg1[%c0, %c0_0] : memref<16x32xf32, #tpu.memory_space<vmem>>, vector<16x32xf32>
    %c0_1 = arith.constant 0 : index
    %c0_2 = arith.constant 0 : index
    %1 = vector.load %arg2[%c0_1, %c0_2] : memref<1x32xf32, #tpu.memory_space<vmem>>, vector<1x32xf32>
    %c0_3 = arith.constant 0 : index
    %c0_4 = arith.constant 0 : index
    %2 = vector.load %arg3[%c0_3, %c0_4] : memref<1x32xf32, #tpu.memory_space<vmem>>, vector<1x32xf32>
    %cst = arith.constant dense<0.000000e+00> : vector<16xf32>
    %3 = vector.multi_reduction <add>, %0, %cst [1] : vector<16x32xf32> to vector<16xf32>
    %4 = vector.shape_cast %3 : vector<16xf32> to vector<16x1xf32>
    %cst_5 = arith.constant 3.200000e+01 : f32
    %5 = vector.broadcast %cst_5 : f32 to vector<16x1xf32>
    %6 = arith.divf %4, %5 : vector<16x1xf32>
    %7 = vector.broadcast %6 : vector<16x1xf32> to vector<16x32xf32>
    %8 = arith.subf %0, %7 : vector<16x32xf32>
    %9 = arith.mulf %8, %8 : vector<16x32xf32>
    %cst_6 = arith.constant dense<0.000000e+00> : vector<16xf32>
    %10 = vector.multi_reduction <add>, %9, %cst_6 [1] : vector<16x32xf32> to vector<16xf32>
    %11 = vector.shape_cast %10 : vector<16xf32> to vector<16x1xf32>
    %cst_7 = arith.constant 3.200000e+01 : f32
    %12 = vector.broadcast %cst_7 : f32 to vector<16x1xf32>
    %13 = arith.divf %11, %12 : vector<16x1xf32>
    %cst_8 = arith.constant 9.99999974E-6 : f32
    %14 = vector.broadcast %cst_8 : f32 to vector<16x1xf32>
    %15 = arith.addf %13, %14 : vector<16x1xf32>
    %16 = math.rsqrt %15 : vector<16x1xf32>
    %17 = vector.broadcast %16 : vector<16x1xf32> to vector<16x32xf32>
    %18 = arith.mulf %8, %17 : vector<16x32xf32>
    %19 = vector.broadcast %1 : vector<1x32xf32> to vector<16x32xf32>
    %20 = arith.mulf %18, %19 : vector<16x32xf32>
    %21 = vector.broadcast %2 : vector<1x32xf32> to vector<16x32xf32>
    %22 = arith.addf %20, %21 : vector<16x32xf32>
    %c0_9 = arith.constant 0 : index
    %c0_10 = arith.constant 0 : index
    %23 = vector.load %arg4[%c0_9, %c0_10] : memref<32x16xbf16, #tpu.memory_space<vmem>>, vector<32x16xbf16>
    %24 = arith.truncf %22 : vector<16x32xf32> to vector<16x32xbf16>
    %cst_11 = arith.constant dense<0.000000e+00> : vector<16x16xf32>
    %25 = tpu.matmul %24, %23, %cst_11 {dimension_numbers = #tpu.dot_dimension_numbers<[1], [0], [0], [1], [0, 0, 1, 1], [], []>} : vector<16x32xbf16>, vector<32x16xbf16>, vector<16x16xf32> -> vector<16x16xf32>
    %c0_12 = arith.constant 0 : index
    %c0_13 = arith.constant 0 : index
    %26 = vector.load %arg13[%c0_12, %c0_13] : memref<16x16xf32, #tpu.memory_space<vmem>>, vector<16x16xf32>
    tpu.vector_store %arg13[%c0_12, %c0_13], %25 {strides = array<i32>} : memref<16x16xf32, #tpu.memory_space<vmem>>, vector<16x16xf32>,
    %c0_14 = arith.constant 0 : index
    %c0_15 = arith.constant 0 : index
    %27 = vector.load %arg5[%c0_14, %c0_15] : memref<32x8xbf16, #tpu.memory_space<vmem>>, vector<32x8xbf16>
    %c0_16 = arith.constant 0 : index
    %c0_17 = arith.constant 0 : index
    %28 = vector.load %arg6[%c0_16, %c0_17] : memref<1x8xf32, #tpu.memory_space<vmem>>, vector<1x8xf32>
    %29 = arith.truncf %0 : vector<16x32xf32> to vector<16x32xbf16>
    %cst_18 = arith.constant dense<0.000000e+00> : vector<16x8xf32>
    %30 = tpu.matmul %29, %27, %cst_18 {dimension_numbers = #tpu.dot_dimension_numbers<[1], [0], [0], [1], [0, 0, 1, 1], [], []>} : vector<16x32xbf16>, vector<32x8xbf16>, vector<16x8xf32> -> vector<16x8xf32>
    %31 = vector.broadcast %28 : vector<1x8xf32> to vector<16x8xf32>
    %32 = arith.addf %30, %31 : vector<16x8xf32>
    %c0_19 = arith.constant 0 : index
    %c0_20 = arith.constant 0 : index
    %33 = vector.load %arg7[%c0_19, %c0_20] : memref<32x32xbf16, #tpu.memory_space<vmem>>, vector<32x32xbf16>
    %c0_21 = arith.constant 0 : index
    %c0_22 = arith.constant 0 : index
    %34 = vector.load %arg8[%c0_21, %c0_22] : memref<1x32xf32, #tpu.memory_space<vmem>>, vector<1x32xf32>
    %35 = arith.truncf %0 : vector<16x32xf32> to vector<16x32xbf16>
    %cst_23 = arith.constant dense<0.000000e+00> : vector<16x32xf32>
    %36 = tpu.matmul %35, %33, %cst_23 {dimension_numbers = #tpu.dot_dimension_numbers<[1], [0], [0], [1], [0, 0, 1, 1], [], []>} : vector<16x32xbf16>, vector<32x32xbf16>, vector<16x32xf32> -> vector<16x32xf32>
    %37 = vector.broadcast %34 : vector<1x32xf32> to vector<16x32xf32>
    %38 = arith.addf %36, %37 : vector<16x32xf32>
    %cst_24 = arith.constant 0.000000e+00 : f32
    %39 = vector.broadcast %cst_24 : f32 to vector<16x32xf32>
    %40 = arith.maximumf %38, %39 : vector<16x32xf32>
    %c0_25 = arith.constant 0 : index
    %c0_26 = arith.constant 0 : index
    %41 = vector.load %arg9[%c0_25, %c0_26] : memref<32x32xbf16, #tpu.memory_space<vmem>>, vector<32x32xbf16>
    %c0_27 = arith.constant 0 : index
    %c0_28 = arith.constant 0 : index
    %42 = vector.load %arg10[%c0_27, %c0_28] : memref<1x32xf32, #tpu.memory_space<vmem>>, vector<1x32xf32>
    %43 = arith.truncf %40 : vector<16x32xf32> to vector<16x32xbf16>
    %cst_29 = arith.constant dense<0.000000e+00> : vector<16x32xf32>
    %44 = tpu.matmul %43, %41, %cst_29 {dimension_numbers = #tpu.dot_dimension_numbers<[1], [0], [0], [1], [0, 0, 1, 1], [], []>} : vector<16x32xbf16>, vector<32x32xbf16>, vector<16x32xf32> -> vector<16x32xf32>
    %45 = vector.broadcast %42 : vector<1x32xf32> to vector<16x32xf32>
    %46 = arith.addf %44, %45 : vector<16x32xf32>
    %cst_30 = arith.constant 0.000000e+00 : f32
    %47 = vector.broadcast %cst_30 : f32 to vector<16x32xf32>
    %48 = arith.maximumf %46, %47 : vector<16x32xf32>
    %c0_31 = arith.constant 0 : index
    %c0_32 = arith.constant 0 : index
    %49 = vector.load %arg11[%c0_31, %c0_32] : memref<32x8xbf16, #tpu.memory_space<vmem>>, vector<32x8xbf16>
    %c0_33 = arith.constant 0 : index
    %c0_34 = arith.constant 0 : index
    %50 = vector.load %arg12[%c0_33, %c0_34] : memref<1x8xf32, #tpu.memory_space<vmem>>, vector<1x8xf32>
    %51 = arith.truncf %48 : vector<16x32xf32> to vector<16x32xbf16>
    %cst_35 = arith.constant dense<0.000000e+00> : vector<16x8xf32>
    %52 = tpu.matmul %51, %49, %cst_35 {dimension_numbers = #tpu.dot_dimension_numbers<[1], [0], [0], [1], [0, 0, 1, 1], [], []>} : vector<16x32xbf16>, vector<32x8xbf16>, vector<16x8xf32> -> vector<16x8xf32>
    %53 = vector.broadcast %50 : vector<1x8xf32> to vector<16x8xf32>
    %54 = arith.addf %52, %53 : vector<16x8xf32>
    %55 = arith.negf %54 : vector<16x8xf32>
    %56 = math.exp %55 : vector<16x8xf32>
    %cst_36 = arith.constant 1.000000e+00 : f32
    %57 = vector.broadcast %cst_36 : f32 to vector<16x8xf32>
    %58 = arith.addf %57, %56 : vector<16x8xf32>
    %59 = arith.divf %57, %58 : vector<16x8xf32>
    %60 = tpu.concatenate %32, %59 in 1 : vector<16x8xf32>, vector<16x8xf32> -> vector<16x16xf32>
    %c0_37 = arith.constant 0 : index
    %c0_38 = arith.constant 0 : index
    %61 = vector.load %arg14[%c0_37, %c0_38] : memref<16x16xf32, #tpu.memory_space<vmem>>, vector<16x16xf32>
    tpu.vector_store %arg14[%c0_37, %c0_38], %60 {strides = array<i32>} : memref<16x16xf32, #tpu.memory_space<vmem>>, vector<16x16xf32>,
    return
  }
  func.func @transform_0(%arg0: i32) -> (i32, i32) {
    %c0_i32 = arith.constant 0 : i32
    %c0_i32_0 = arith.constant 0 : i32
    return %arg0, %c0_i32 : i32, i32
  }
  func.func @transform_1(%arg0: i32) -> (i32, i32) {
    %c0_i32 = arith.constant 0 : i32
    %c0_i32_0 = arith.constant 0 : i32
    %c0_i32_1 = arith.constant 0 : i32
    return %c0_i32, %c0_i32_0 : i32, i32
  }
  func.func @transform_2(%arg0: i32) -> (i32, i32) {
    %c0_i32 = arith.constant 0 : i32
    %c0_i32_0 = arith.constant 0 : i32
    %c0_i32_1 = arith.constant 0 : i32
    return %c0_i32, %c0_i32_0 : i32, i32
  }
  func.func @transform_3(%arg0: i32) -> (i32, i32) {
    %c0_i32 = arith.constant 0 : i32
    %c0_i32_0 = arith.constant 0 : i32
    %c0_i32_1 = arith.constant 0 : i32
    return %c0_i32, %c0_i32_0 : i32, i32
  }
  func.func @transform_4(%arg0: i32) -> (i32, i32) {
    %c0_i32 = arith.constant 0 : i32
    %c0_i32_0 = arith.constant 0 : i32
    %c0_i32_1 = arith.constant 0 : i32
    return %c0_i32, %c0_i32_0 : i32, i32
  }
  func.func @transform_5(%arg0: i32) -> (i32, i32) {
    %c0_i32 = arith.constant 0 : i32
    %c0_i32_0 = arith.constant 0 : i32
    %c0_i32_1 = arith.constant 0 : i32
    return %c0_i32, %c0_i32_0 : i32, i32
  }
  func.func @transform_6(%arg0: i32) -> (i32, i32) {
    %c0_i32 = arith.constant 0 : i32
    %c0_i32_0 = arith.constant 0 : i32
    %c0_i32_1 = arith.constant 0 : i32
    return %c0_i32, %c0_i32_0 : i32, i32
  }
  func.func @transform_7(%arg0: i32) -> (i32, i32) {
    %c0_i32 = arith.constant 0 : i32
    %c0_i32_0 = arith.constant 0 : i32
    %c0_i32_1 = arith.constant 0 : i32
    return %c0_i32, %c0_i32_0 : i32, i32
  }
  func.func @transform_8(%arg0: i32) -> (i32, i32) {
    %c0_i32 = arith.constant 0 : i32
    %c0_i32_0 = arith.constant 0 : i32
    %c0_i32_1 = arith.constant 0 : i32
    return %c0_i32, %c0_i32_0 : i32, i32
  }
  func.func @transform_9(%arg0: i32) -> (i32, i32) {
    %c0_i32 = arith.constant 0 : i32
    %c0_i32_0 = arith.constant 0 : i32
    %c0_i32_1 = arith.constant 0 : i32
    return %c0_i32, %c0_i32_0 : i32, i32
  }
  func.func @transform_10(%arg0: i32) -> (i32, i32) {
    %c0_i32 = arith.constant 0 : i32
    %c0_i32_0 = arith.constant 0 : i32
    %c0_i32_1 = arith.constant 0 : i32
    return %c0_i32, %c0_i32_0 : i32, i32
  }
  func.func @transform_11(%arg0: i32) -> (i32, i32) {
    %c0_i32 = arith.constant 0 : i32
    %c0_i32_0 = arith.constant 0 : i32
    %c0_i32_1 = arith.constant 0 : i32
    return %c0_i32, %c0_i32_0 : i32, i32
  }
  func.func @transform_12(%arg0: i32) -> (i32, i32) {
    %c0_i32 = arith.constant 0 : i32
    %c0_i32_0 = arith.constant 0 : i32
    return %arg0, %c0_i32 : i32, i32
  }
  func.func @transform_13(%arg0: i32) -> (i32, i32) {
    %c0_i32 = arith.constant 0 : i32
    %c0_i32_0 = arith.constant 0 : i32
    return %arg0, %c0_i32 : i32, i32
  }
}

</mosaic_0001>

<bundles_post_ra>
// kernel: hoi_vit_forward.8
= control target key start
LH: loop header
LB: loop body
LE: loop exit
PB: predicated region body
PF: predicated region fallthrough
CT: control target
= control target key end

     0   :  { %vm33_vm0 = vcmask 261120   ;;  %vm260_vm1 = vcmask 523264   ;;  %vm336_vm2 = vcmask 257024   ;;  %s555_s0 = inlined_call_operand.vmem [shape: f32[32,32], index: 0, kind: input, shape index: {}]   ;;  %s556_s3 = inlined_call_operand.vmem [shape: bf16[32,64], index: 3, kind: input, shape index: {}]   ;;  %s557_s1 = inlined_call_operand.vmem [shape: f32[1,32], index: 1, kind: input, shape index: {}]   ;;  %s558_s2 = inlined_call_operand.vmem [shape: f32[1,32], index: 2, kind: input, shape index: {}]   ;;  %s559_s5 = inlined_call_operand.vmem [shape: bf16[64,32], index: 5, kind: input, shape index: {}]   ;;  %s560_s4 = inlined_call_operand.vmem [shape: f32[1,64], index: 4, kind: input, shape index: {}]   ;;  %s561_s6 = inlined_call_operand.vmem [shape: f32[1,32], index: 6, kind: input, shape index: {}]   ;;  %s562_s7 = inlined_call_operand.vmem [shape: bf16[32,32], index: 7, kind: output, shape index: {}]  }
   0x1   :  { %v474_v0 = vld [vmem:[%s555_s0] sm:$0xff]  ;;  %v479_v1 = vld [vmem:[%s555_s0 + $0x10] sm:$0xff]  ;;  %v484_v2 = vld [vmem:[%s555_s0 + $0x8] sm:$0xff] }
   0x2   :  { %v34_v3 = vsel %vm33_vm0, %v474_v0, 0.0  ;;  %v40_v4 = vsel %vm33_vm0, %v479_v1, 0.0  ;;  %v493_v5 = vld [vmem:[%s555_s0 + $0x18] sm:$0xff]  ;;  %v37_v6 = vsel %vm33_vm0, %v484_v2, 0.0  ;;  %v401_v28 = vld [vmem:[%s556_s3 + $0x8] sm:$0xff]   ;;  %v402_v29 = vld [vmem:[%s556_s3] sm:$0xff]  }
   0x3   :  { %35 = vadd.xlane.f32.xlu0 %v34_v3  ;;  %41 = vadd.xlane.f32.xlu1 %v40_v4  ;;  %v43_v7 = vsel %vm33_vm0, %v493_v5, 0.0  ;;  %v345_v44 = vld [vmem:[%s557_s1] ss:$0 sm:$0xff]  ;;  %v403_v62 = vld [vmem:[%s559_s5 + $0x18] sm:$0xff]   ;;  %v404_v63 = vld [vmem:[%s559_s5 + $0x10] sm:$0xff]  }
   0x4   :  { %381 = vmatprep.subr.bf16.mxu0 %v401_v28  ;;  %v346_v49 = vld [vmem:[%s558_s2] ss:$0 sm:$0xff]  ;;  %389 = vmatprep.subr.bf16.mxu1 %v403_v62  ;;  %v405_v3 = vld [vmem:[%s559_s5 + $0x8] sm:$0xff]  }
   0x5   :  { %382 = vmatpush3.bf16.msra.mxu0 %v401_v28  ;;  %390 = vmatpush3.bf16.msra.mxu1 %v403_v62  ;;  %v406_v4 = vld [vmem:[%s559_s5] sm:$0xff]  }
   0x6   :  { %383 = vmatprep.subr.bf16.mxu0 %v402_v29  ;;  %391 = vmatprep.subr.bf16.mxu1 %v404_v63 }
   0x7   :  { %38 = vadd.xlane.f32.xlu0 %v37_v6  ;;  %44 = vadd.xlane.f32.xlu1 %v43_v7  ;;  %v347_v6 = vld [vmem:[%s560_s4] ss:$0 sm:$0xff] }
   0x9   :  { %384 = vmatpush3.bf16.msra.mxu0 %v402_v29  ;;  %392 = vmatpush3.bf16.msra.mxu1 %v404_v63 }
   0xa   :  { %393 = vmatprep.subr.bf16.mxu1 %v405_v3 }
   0xd   :  { %394 = vmatpush3.bf16.msra.mxu1 %v405_v3 }
   0xe   :  { %395 = vmatprep.subr.bf16.mxu1 %v406_v4 }
  0x11   :  { %396 = vmatpush3.bf16.msra.mxu1 %v406_v4 }
  0x8c   :  { %v36_v8 = vpop.xlane.xlu0 %35  ;;  %v42_v9 = vpop.xlane.xlu1 %41 }
  0x8d   :  { %v47_v10 = vmul.f32 0.03125, %v36_v8  ;;  %v49_v11 = vmul.f32 0.03125, %v42_v9 }
  0x8f   :  { %v51_v12 = vsub.f32 %v474_v0, %v47_v10  ;;  %v53_v13 = vsub.f32 %v479_v1, %v49_v11 }
  0x90   :  { %v39_v14 = vpop.xlane.xlu0 %38  ;;  %v45_v15 = vpop.xlane.xlu1 %44 }
  0x91   :  { %v48_v16 = vmul.f32 0.03125, %v39_v14  ;;  %v50_v17 = vmul.f32 0.03125, %v45_v15  ;;  %v55_v18 = vmul.f32 %v51_v12, %v51_v12  ;;  %v57_v19 = vmul.f32 %v53_v13, %v53_v13 }
  0x93   :  { %v52_v20 = vsub.f32 %v484_v2, %v48_v16  ;;  %v54_v21 = vsub.f32 %v493_v5, %v50_v17  ;;  %v59_v22 = vsel %vm33_vm0, %v55_v18, 0.0  ;;  %v65_v23 = vsel %vm33_vm0, %v57_v19, 0.0 }
  0x94   :  { %60 = vadd.xlane.f32.xlu0 %v59_v22 }
  0x95   :  { %v56_v24 = vmul.f32 %v52_v20, %v52_v20  ;;  %v58_v25 = vmul.f32 %v54_v21, %v54_v21 }
  0x97   :  { %v62_v26 = vsel %vm33_vm0, %v56_v24, 0.0  ;;  %v68_v27 = vsel %vm33_vm0, %v58_v25, 0.0 }
  0x98   :  { %66 = vadd.xlane.f32.xlu0 %v65_v23  ;;  %63 = vadd.xlane.f32.xlu1 %v62_v26 }
  0x9c   :  { %69 = vadd.xlane.f32.xlu1 %v68_v27 }
 0x11d   :  { %v61_v30 = vpop.xlane.xlu0 %60 }
 0x11e   :  { %v71_v31 = vmul.f32 0.03125, %v61_v30 }
 0x120   :  { %v75_v32 = vadd.f32 1e-05, %v71_v31 }
 0x121   :  { %v64_v33 = vpop.xlane.xlu1 %63  ;;  %v67_v34 = vpop.xlane.xlu0 %66 }
 0x122   :  { %407 = vrsqrt.f32 %v75_v32  ;;  %v72_v35 = vmul.f32 0.03125, %v64_v33  ;;  %v73_v36 = vmul.f32 0.03125, %v67_v34 }
 0x124   :  { %v76_v37 = vadd.f32 1e-05, %v72_v35  ;;  %v77_v38 = vadd.f32 1e-05, %v73_v36 }
 0x125   :  { %v70_v39 = vpop.xlane.xlu1 %69 }
 0x126   :  { %409 = vrsqrt.f32 %v76_v37  ;;  %v74_v40 = vmul.f32 0.03125, %v70_v39 }
 0x127   :  { %411 = vrsqrt.f32 %v77_v38 }
 0x128   :  { %v78_v41 = vadd.f32 1e-05, %v74_v40 }
 0x12a   :  { %413 = vrsqrt.f32 %v78_v41  ;;  %v356_v41 = vld [vmem:[%s561_s6] ss:$0 sm:$0xff] }
 0x12f   :  { %v408_v42 = vpop.eup %407 }
 0x130   :  { %v83_v43 = vmul.f32 %v408_v42, %v51_v12 }
 0x132   :  { %v93_v48 = vmul.f32 %v345_v44, %v83_v43 }
 0x133   :  { %v410_v45 = vpop.eup %409 }
 0x134   :  { %v412_v46 = vpop.eup %411  ;;  %v84_v47 = vmul.f32 %v410_v45, %v52_v20  ;;  %v103_v53 = vadd.f32 %v346_v49, %v93_v48 }
 0x135   :  { %v85_v50 = vmul.f32 %v412_v46, %v53_v13 }
 0x136   :  { %v94_v51 = vmul.f32 %v345_v44, %v84_v47 }
 0x137   :  { %v414_v52 = vpop.eup %413  ;;  %v95_v56 = vmul.f32 %v345_v44, %v85_v50 }
 0x138   :  { %v104_v54 = vadd.f32 %v346_v49, %v94_v51  ;;  %v86_v55 = vmul.f32 %v414_v52, %v54_v21 }
 0x139   :  { %v105_v59 = vadd.f32 %v346_v49, %v95_v56 }
 0x13a   :  { %v112_v57 = vpack.c.bf16 %v104_v54, %v103_v53  ;;  %v96_v58 = vmul.f32 %v345_v44, %v86_v55 }
 0x13c   :  { %385 = vmatprep.mubr.msk.bf16.mxu0 %vm33_vm0, %v112_v57  ;;  %v106_v60 = vadd.f32 %v346_v49, %v96_v58 }
 0x13e   :  { %v113_v61 = vpack.c.bf16 %v106_v60, %v105_v59 }
 0x140   :  { %386 = vmatmul.mubr.msk.bf16.vlgmr.msra.gmra.mxu0 %vm33_vm0, %v113_v61 }
 0x200   :  { %v387_v7 = vpop.f32.mrf.mxu0 }
 0x201   :  { %v181_v8 = vadd.f32 %v387_v7, %v347_v6 }
 0x202   :  { %v172_v9 = vpop.f32.mrf.mxu0 }
 0x203   :  { %v354_v10 = vmul.f32 -1.702, %v181_v8  ;;  %v173_v11 = vadd.f32 %v347_v6, %v172_v9 }
 0x204   :  { %v388_v12 = vpop.f32.mrf.mxu0 }
 0x205   :  { %v199_v13 = vmul.f32 1.442695, %v354_v10  ;;  %v352_v14 = vmul.f32 -1.702, %v173_v11  ;;  %v184_v15 = vadd.f32 %v388_v12, %v347_v6 }
 0x206   :  { %v175_v16 = vpop.f32.mrf.mxu0 }
 0x207   :  { %v195_v17 = vmul.f32 1.442695, %v352_v14  ;;  %v355_v18 = vmul.f32 -1.702, %v184_v15  ;;  %v176_v19 = vadd.f32 %v347_v6, %v175_v16  ;;  %415 = vpow2.f32 %v199_v13 }
 0x209   :  { %417 = vpow2.f32 %v195_v17  ;;  %v201_v20 = vmul.f32 1.442695, %v355_v18  ;;  %v353_v21 = vmul.f32 -1.702, %v176_v19 }
 0x20b   :  { %419 = vpow2.f32 %v201_v20  ;;  %v197_v22 = vmul.f32 1.442695, %v353_v21 }
 0x20d   :  { %421 = vpow2.f32 %v197_v22 }
 0x214   :  { %v416_v23 = vpop.eup %415 }
 0x215   :  { %v205_v27 = vadd.f32 1.0, %v416_v23 }
 0x216   :  { %v418_v24 = vpop.eup %417 }
 0x217   :  { %v203_v25 = vadd.f32 1.0, %v418_v24 }
 0x218   :  { %v420_v26 = vpop.eup %419 }
 0x219   :  { %v206_v28 = vadd.f32 1.0, %v420_v26  ;;  %423 = vrcp.f32 %v203_v25 }
 0x21a   :  { %v422_v29 = vpop.eup %421 }
 0x21b   :  { %425 = vrcp.f32 %v206_v28  ;;  %v204_v30 = vadd.f32 1.0, %v422_v29 }
 0x21c   :  { %427 = vrcp.f32 %v205_v27 }
 0x21d   :  { %429 = vrcp.f32 %v204_v30 }
 0x226   :  { %v424_v31 = vpop.eup %423 }
 0x227   :  { %v215_v36 = vmul.f32 %v424_v31, %v173_v11 }
 0x228   :  { %v426_v32 = vpop.eup %425 }
 0x229   :  { %v428_v33 = vpop.eup %427  ;;  %v218_v35 = vmul.f32 %v426_v32, %v184_v15 }
 0x22a   :  { %v430_v34 = vpop.eup %429  ;;  %v217_v38 = vmul.f32 %v428_v33, %v181_v8 }
 0x22b   :  { %v216_v37 = vmul.f32 %v430_v34, %v176_v19 }
 0x22c   :  { %v229_v40 = vpack.c.bf16 %v218_v35, %v217_v38 }
 0x22d   :  { %v228_v39 = vpack.c.bf16 %v216_v37, %v215_v36 }
 0x22f   :  { %397 = vmatprep.mubr.msk.bf16.mxu1 %vm260_vm1, %v228_v39 }
 0x230   :  { %398 = vmatmul.mubr.msk.bf16.vlgmr.msra.gmra.mxu1 %vm260_vm1, %v229_v40 }
 0x2f0   :  { %v399_v42 = vpop.f32.mrf.mxu1 }
 0x2f1   :  { %v310_v43 = vadd.f32 %v399_v42, %v356_v41 }
 0x2f2   :  { %v301_v44 = vpop.f32.mrf.mxu1 }
 0x2f3   :  { %v318_v45 = vadd.f32 %v310_v43, %v479_v1  ;;  %v302_v46 = vadd.f32 %v356_v41, %v301_v44 }
 0x2f4   :  { %v400_v47 = vpop.f32.mrf.mxu1 }
 0x2f5   :  { %v369_v48 = vpack.c.bf16 %v318_v45, %v318_v45  ;;  %v316_v49 = vadd.f32 %v302_v46, %v474_v0  ;;  %v313_v50 = vadd.f32 %v400_v47, %v356_v41 }
 0x2f6   :  { %v304_v51 = vpop.f32.mrf.mxu1 }
 0x2f7   :  { %339 = vst.msk [vmem:[%s562_s7 + $0x8] sm:$0xf] %vm336_vm2, %v369_v48  ;;  %v367_v52 = vpack.c.bf16 %v316_v49, %v316_v49  ;;  %v319_v53 = vadd.f32 %v313_v50, %v493_v5  ;;  %v305_v54 = vadd.f32 %v356_v41, %v304_v51 }
 0x2f9   :  { %337 = vst.msk [vmem:[%s562_s7] sm:$0xf] %vm336_vm2, %v367_v52  ;;  %v370_v1 = vpack.c.bf16 %v319_v53, %v319_v53  ;;  %v317_v55 = vadd.f32 %v305_v54, %v484_v2 }
 0x2fb   :  { %340 = vst.msk [vmem:[%s562_s7 + $0xc] sm:$0xf] %vm336_vm2, %v370_v1  ;;  %v368_v0 = vpack.c.bf16 %v317_v55, %v317_v55 }
 0x2fd   :  { %338 = vst.msk [vmem:[%s562_s7 + $0x4] sm:$0xf] %vm336_vm2, %v368_v0 }

// kernel: hoi_vit_forward.10
= control target key start
LH: loop header
LB: loop body
LE: loop exit
PB: predicated region body
PF: predicated region fallthrough
CT: control target
= control target key end

     0   :  { %vm31_vm0 = vcmask 261120   ;;  %v361_v14 = vmov 0.0   ;;  %vm362_vm1 = vmmov 0   ;;  %s474_s0 = inlined_call_operand.vmem [shape: f32[16,32], index: 0, kind: input, shape index: {}]   ;;  %s475_s3 = inlined_call_operand.vmem [shape: bf16[32,128], index: 3, kind: input, shape index: {}]   ;;  %s476_s1 = inlined_call_operand.vmem [shape: f32[1,32], index: 1, kind: input, shape index: {}]   ;;  %s477_s2 = inlined_call_operand.vmem [shape: f32[1,32], index: 2, kind: input, shape index: {}]   ;;  %s478_s5 = inlined_call_operand.vmem [shape: bf16[128,32], index: 5, kind: input, shape index: {}]   ;;  %s479_s4 = inlined_call_operand.vmem [shape: f32[1,128], index: 4, kind: input, shape index: {}]   ;;  %s480_s6 = inlined_call_operand.vmem [shape: f32[1,32], index: 6, kind: input, shape index: {}]   ;;  %s481_s7 = inlined_call_operand.vmem [shape: f32[16,32], index: 7, kind: output, shape index: {}]  }
   0x1   :  { %v406_v0 = vld [vmem:[%s474_s0] sm:$0xff]  ;;  %v411_v1 = vld [vmem:[%s474_s0 + $0x8] sm:$0xff]  ;;  %309 = vmatprep.subr.bf16.mxu0 %v361_v14  ;;  %313 = vmatprep.mubr.msk.bf16.mxu0 %vm362_vm1, %v361_v14  ;;  %v341_v34 = vld [vmem:[%s478_s5 + $0x38] sm:$0xff]  }
   0x2   :  { %v32_v2 = vsel %vm31_vm0, %v406_v0, 0.0  ;;  %v35_v3 = vsel %vm31_vm0, %v411_v1, 0.0  ;;  %v339_v15 = vld [vmem:[%s475_s3 + $0x8] sm:$0xff]   ;;  %317 = vmatprep.subr.bf16.mxu1 %v361_v14  ;;  %333 = vmatprep.mubr.msk.bf16.mxu1 %vm362_vm1, %v361_v14  ;;  %v340_v16 = vld [vmem:[%s475_s3] sm:$0xff]   ;;  %v342_v35 = vld [vmem:[%s478_s5 + $0x30] sm:$0xff]  }
   0x3   :  { %33 = vadd.xlane.f32.xlu0 %v32_v2  ;;  %310 = vmatpush3.bf16.msra.mxu0 %v339_v15  ;;  %v280_v25 = vld [vmem:[%s476_s1] ss:$0 sm:$0xff]  ;;  %v343_v36 = vld [vmem:[%s478_s5 + $0x28] sm:$0xff]   ;;  %v345_v38 = vld [vmem:[%s478_s5 + $0x18] sm:$0xff]  }
   0x4   :  { %311 = vmatprep.subr.bf16.mxu0 %v361_v14  ;;  %v281_v29 = vld [vmem:[%s477_s2] ss:$0 sm:$0xff]  ;;  %318 = vmatpush3.bf16.msra.mxu1 %v341_v34  ;;  %v346_v39 = vld [vmem:[%s478_s5 + $0x10] sm:$0xff]   ;;  %v347_v40 = vld [vmem:[%s478_s5 + $0x8] sm:$0xff]  }
   0x5   :  { %319 = vmatprep.subr.bf16.mxu1 %v361_v14  ;;  %v344_v37 = vld [vmem:[%s478_s5 + $0x20] sm:$0xff]  }
   0x6   :  { %v348_v41 = vld [vmem:[%s478_s5] sm:$0xff]  }
   0x7   :  { %36 = vadd.xlane.f32.xlu0 %v35_v3  ;;  %312 = vmatpush3.bf16.msra.mxu0 %v340_v16  ;;  %v282_v42 = vld [vmem:[%s479_s4] ss:$0 sm:$0xff] }
   0x8   :  { %320 = vmatpush3.bf16.msra.mxu1 %v342_v35  ;;  %v288_v62 = vld [vmem:[%s480_s6] ss:$0 sm:$0xff] }
   0x9   :  { %321 = vmatprep.subr.bf16.mxu1 %v361_v14 }
   0xc   :  { %322 = vmatpush3.bf16.msra.mxu1 %v343_v36 }
   0xd   :  { %323 = vmatprep.subr.bf16.mxu1 %v361_v14 }
  0x10   :  { %324 = vmatpush3.bf16.msra.mxu1 %v344_v37 }
  0x11   :  { %325 = vmatprep.subr.bf16.mxu1 %v361_v14 }
  0x14   :  { %326 = vmatpush3.bf16.msra.mxu1 %v345_v38 }
  0x15   :  { %327 = vmatprep.subr.bf16.mxu1 %v361_v14 }
  0x18   :  { %328 = vmatpush3.bf16.msra.mxu1 %v346_v39 }
  0x19   :  { %329 = vmatprep.subr.bf16.mxu1 %v361_v14 }
  0x1c   :  { %330 = vmatpush3.bf16.msra.mxu1 %v347_v40 }
  0x1d   :  { %331 = vmatprep.subr.bf16.mxu1 %v361_v14 }
  0x20   :  { %332 = vmatpush3.bf16.msra.mxu1 %v348_v41 }
  0x8c   :  { %v34_v4 = vpop.xlane.xlu0 %33 }
  0x8d   :  { %v39_v5 = vmul.f32 0.03125, %v34_v4 }
  0x8f   :  { %v41_v6 = vsub.f32 %v406_v0, %v39_v5 }
  0x90   :  { %v37_v7 = vpop.xlane.xlu0 %36 }
  0x91   :  { %v40_v8 = vmul.f32 0.03125, %v37_v7  ;;  %v43_v9 = vmul.f32 %v41_v6, %v41_v6 }
  0x93   :  { %v42_v10 = vsub.f32 %v411_v1, %v40_v8  ;;  %v45_v11 = vsel %vm31_vm0, %v43_v9, 0.0 }
  0x94   :  { %46 = vadd.xlane.f32.xlu1 %v45_v11 }
  0x95   :  { %v44_v12 = vmul.f32 %v42_v10, %v42_v10 }
  0x97   :  { %v48_v13 = vsel %vm31_vm0, %v44_v12, 0.0 }
  0x98   :  { %49 = vadd.xlane.f32.xlu1 %v48_v13 }
 0x11d   :  { %v47_v17 = vpop.xlane.xlu1 %46 }
 0x11e   :  { %v51_v18 = vmul.f32 0.03125, %v47_v17 }
 0x120   :  { %v53_v19 = vadd.f32 1e-05, %v51_v18 }
 0x121   :  { %v50_v20 = vpop.xlane.xlu1 %49 }
 0x122   :  { %349 = vrsqrt.f32 %v53_v19  ;;  %v52_v21 = vmul.f32 0.03125, %v50_v20 }
 0x124   :  { %v54_v22 = vadd.f32 1e-05, %v52_v21 }
 0x126   :  { %351 = vrsqrt.f32 %v54_v22 }
 0x12f   :  { %v350_v23 = vpop.eup %349 }
 0x130   :  { %v57_v24 = vmul.f32 %v350_v23, %v41_v6 }
 0x132   :  { %v65_v28 = vmul.f32 %v280_v25, %v57_v24 }
 0x133   :  { %v352_v26 = vpop.eup %351 }
 0x134   :  { %v58_v27 = vmul.f32 %v352_v26, %v42_v10  ;;  %v73_v31 = vadd.f32 %v281_v29, %v65_v28 }
 0x136   :  { %v66_v30 = vmul.f32 %v280_v25, %v58_v27 }
 0x138   :  { %v74_v32 = vadd.f32 %v281_v29, %v66_v30 }
 0x13a   :  { %v80_v33 = vpack.c.bf16 %v74_v32, %v73_v31 }
 0x13c   :  { %314 = vmatmul.mubr.msk.bf16.vlgmr.msra.gmra.mxu0 %vm31_vm0, %v80_v33 }
 0x1fc   :  { %v136_v43 = vpop.f32.mrf.mxu0 }
 0x1fd   :  { %v137_v44 = vadd.f32 %v282_v42, %v136_v43 }
 0x1fe   :  { %v315_v45 = vpop.f32.mrf.mxu0 }
 0x1ff   :  { %v286_v46 = vmul.f32 -1.702, %v137_v44 }
 0x200   :  { %v139_v47 = vpop.f32.mrf.mxu0 }
 0x201   :  { %v147_v48 = vmul.f32 1.442695, %v286_v46  ;;  %v140_v49 = vadd.f32 %v282_v42, %v139_v47 }
 0x202   :  { %v316_v50 = vpop.f32.mrf.mxu0 }
 0x203   :  { %353 = vpow2.f32 %v147_v48  ;;  %v287_v51 = vmul.f32 -1.702, %v140_v49 }
 0x205   :  { %v149_v52 = vmul.f32 1.442695, %v287_v51 }
 0x207   :  { %355 = vpow2.f32 %v149_v52 }
 0x210   :  { %v354_v53 = vpop.eup %353 }
 0x211   :  { %v151_v54 = vadd.f32 1.0, %v354_v53 }
 0x213   :  { %357 = vrcp.f32 %v151_v54 }
 0x214   :  { %v356_v55 = vpop.eup %355 }
 0x215   :  { %v152_v56 = vadd.f32 1.0, %v356_v55 }
 0x217   :  { %359 = vrcp.f32 %v152_v56 }
 0x220   :  { %v358_v57 = vpop.eup %357 }
 0x221   :  { %v157_v59 = vmul.f32 %v358_v57, %v137_v44 }
 0x224   :  { %v360_v58 = vpop.eup %359 }
 0x225   :  { %v158_v60 = vmul.f32 %v360_v58, %v140_v49 }
 0x227   :  { %v176_v61 = vpack.c.bf16 %v158_v60, %v157_v59 }
 0x229   :  { %334 = vmatmul.mubr.bf16.vlgmr.msra.gmra.mxu1 %v176_v61 }
 0x2e9   :  { %v265_v63 = vpop.f32.mrf.mxu1 }
 0x2ea   :  { %v266_v2 = vadd.f32 %v288_v62, %v265_v63 }
 0x2eb   :  { %v335_v3 = vpop.f32.mrf.mxu1 }
 0x2ec   :  { %v272_v4 = vadd.f32 %v266_v2, %v406_v0 }
 0x2ed   :  { %v268_v5 = vpop.f32.mrf.mxu1 }
 0x2ee   :  { %274 = vst.msk [vmem:[%s481_s7] sm:$0xff] %vm31_vm0, %v272_v4  ;;  %v269_v6 = vadd.f32 %v288_v62, %v268_v5 }
 0x2ef   :  { %v336_v7 = vpop.f32.mrf.mxu1 }
 0x2f0   :  { %v273_v8 = vadd.f32 %v269_v6, %v411_v1 }
 0x2f2   :  { %275 = vst.msk [vmem:[%s481_s7 + $0x8] sm:$0xff] %vm31_vm0, %v273_v8 }

// kernel: hoi_vit_forward.11
= control target key start
LH: loop header
LB: loop body
LE: loop exit
PB: predicated region body
PF: predicated region fallthrough
CT: control target
= control target key end

     0   :  { %s1291_s21 = smov 0   ;;  %s1293_s22 = smov 0   ;;  %s1452_s0 = inlined_call_operand.vmem [shape: f32[2,5,32], index: 0, kind: input, shape index: {}]   ;;  %s1453_s1 = inlined_call_operand.vmem [shape: f32[1,32], index: 1, kind: input, shape index: {}]   ;;  %s1454_s2 = inlined_call_operand.vmem [shape: f32[1,32], index: 2, kind: input, shape index: {}]   ;;  %s1455_s3 = inlined_call_operand.vmem [shape: bf16[4,8,32], index: 3, kind: input, shape index: {}]   ;;  %s1456_s4 = inlined_call_operand.vmem [shape: f32[4,1,8], index: 4, kind: input, shape index: {}]   ;;  %s1457_s5 = inlined_call_operand.vmem [shape: bf16[4,8,32], index: 5, kind: input, shape index: {}]   ;;  %s1458_s6 = inlined_call_operand.vmem [shape: f32[4,1,8], index: 6, kind: input, shape index: {}]   ;;  %s1459_s7 = inlined_call_operand.vmem [shape: bf16[4,8,32], index: 7, kind: input, shape index: {}]   ;;  %s1460_s8 = inlined_call_operand.vmem [shape: f32[4,1,8], index: 8, kind: input, shape index: {}]   ;;  %s1461_s9 = inlined_call_operand.vmem [shape: bf16[4,8,32], index: 9, kind: input, shape index: {}]   ;;  %s1462_s10 = inlined_call_operand.vmem [shape: f32[1,32], index: 10, kind: input, shape index: {}]   ;;  %s1463_s11 = inlined_call_operand.vmem [shape: f32[5,5], index: 11, kind: input, shape index: {}]   ;;  %s1464_s12 = inlined_call_operand.vmem [shape: f32[2,5,32], index: 12, kind: output, shape index: {}]  }
   0x1   :  { %1468 = sst [smem:[#allocation9_spill]] %s1452_s0  ;;  %s1295_s23 = smov 0  }
   0x2   :  { %1469 = sst [smem:[#allocation10_spill]] %s1455_s3  ;;  %s1297_s24 = smov 0  }
   0x3   :  { %1470 = sst [smem:[#allocation11_spill]] %s1462_s10  ;;  %s1299_s25 = smov 0  }
   0x4   :  { %1471 = sst [smem:[#allocation12_spill]] %s1463_s11 }
   0x5 LB: > { %1472 = sst [smem:[#allocation4_spill]] %s1212_s23  ;;  %s31_s26 = sadd.s32 1, %s1212_s23  ;;  %s1220_s25 = sphi %s1299_s25, %s22_s25   ;;  %s1216_s24 = sphi %s1297_s24, %s1488_s24   ;;  %s1212_s23 = sphi %s1295_s23, %s1487_s23   ;;  %s1208_s22 = sphi %s1293_s22, %s1486_s22   ;;  %s1204_s21 = sphi %s1291_s21, %s1485_s21  }
   0x6   : > { %1473 = sst [smem:[#allocation5_spill]] %s1216_s24  ;;  %s34_s27 = sadd.s32 1, %s1216_s24 }
   0x7   : > { %1474 = sst [smem:[#allocation6_spill]] %s1220_s25  ;;  %p32_p0 = scmp.ge.s32.totalorder %s31_s26, 4 }
   0x8   : > { %p1061_p1 = scmp.ge.s32.totalorder %s1220_s25, 1  ;;  %p433_p2 = scmp.lt.s32.totalorder %s1220_s25, 9 }
   0x9   : > { %s1490_s26 = smov (%p32_p0, %s31_s26), 0  ;;  %s1492_s27 = smov (!%p32_p0, %s34_s27), %s1216_s24 }
   0xa   : > { %1475 = sst [smem:[#allocation7_spill]] %s1490_s26  ;;  %p434_p3 = pnand %p1061_p1, %p433_p2 }
   0xb   : > { %p36_p4 = scmp.ge.s32.totalorder %s1492_s27, 2  ;;  %p498_p5 = scmp.lt.s32.totalorder (!%p434_p3), %s1208_s22, 1 }
   0xc   : > { %437 = sbr.rel (%p434_p3) target bundleno = 1463 (0x5b7), region = 68  ;;  %p502_p6 = scmp.lt.s32.totalorder (!%p434_p3), %s1204_s21, 3 }
   0xd   : > { %s1494_s27 = smov (%p36_p4, %s1492_s27), 0  ;;  %s1477_s0 = sld [smem:[#allocation9_spill]] (!%p434_p3) }
   0xe   : > { %1476 = sst [smem:[#allocation8_spill]] %s1494_s27  ;;  %p1068_p7 = scmp.ne.s32.totalorder (!%p434_p3), %s1204_s21, 0 }
  0x11   : > { %s1496_s22 = smov (!%p498_p5, %s1208_s22), 1 }
  0x12   : > { %s1325_s28 = scalar_select %p502_p6, %s1204_s21, 3 }
  0x13   : > { %s1062_s29 = sshll.u32 %s1496_s22, 3  ;;  %535 = sbr.rel (%p1068_p7) target bundleno = 337 (0x151), region = 72 }
  0x14   : > { %s1330_s14 = scalar_lea.vmem %s1477_s0, %s1062_s29  ;;  %s1333_s15 = sshll.u32 %s1325_s28, 2 }
  0x15   : > { %s512_s30 = scalar_lea.vmem %s1457_s5, %s1333_s15  ;;  %s515_s24 = scalar_lea.vmem %s1458_s6, %s1325_s28 }
  0x16   : > { %s519_s16 = scalar_lea.vmem %s1459_s7, %s1333_s15  ;;  %s522_s18 = scalar_lea.vmem %s1460_s8, %s1325_s28 }
  0x17   : > { %s526_s19 = scalar_lea.vmem %s1461_s9, %s1333_s15  ;;  %s1366_s26 = scalar_lea.vmem %s1464_s12, %s1062_s29 }
  0x18   : > { %v536_v0 = vld [vmem:[%s1330_s14] sm:$0x1f]  ;;  %vm539_vm0 = vcmask 258048   ;;  %v1222_v2 = vmov 0.0   ;;  %vm569_vm1 = vcmask 256000  }
  0x19   : > { %v540_v1 = vsel %vm539_vm0, %v536_v0, 0.0  ;;  %575 = vst.msk [vmem:[#allocation3] sm:$0x1f] %vm539_vm0, %v1222_v2  ;;  %v1069_v12 = vld [vmem:[%s1453_s1] ss:$0 sm:$0xff] }
  0x1a   : > { %541 = vadd.xlane.f32.xlu0 %v540_v1  ;;  %v1070_v14 = vld [vmem:[%s1454_s2] ss:$0 sm:$0xff]  ;;  %vm570_vm2 = vsmask.f32 2304 }
  0x1b   : > { %vm571_vm3 = vmand %vm569_vm1, %vm570_vm2  ;;  %v572_v17 = vld [vmem:[#allocation2] sm:$0x7] }
  0xa3   : > { %v542_v3 = vpop.xlane.xlu0 %541 }
  0xa4   : > { %v544_v4 = vmul.f32 0.03125, %v542_v3 }
  0xa6   : > { %v545_v5 = vsub.f32 %v536_v0, %v544_v4 }
  0xa8   : > { %v546_v6 = vmul.f32 %v545_v5, %v545_v5 }
  0xaa   : > { %v547_v7 = vsel %vm539_vm0, %v546_v6, 0.0 }
  0xab   : > { %548 = vadd.xlane.f32.xlu0 %v547_v7 }
 0x134   : > { %v549_v8 = vpop.xlane.xlu0 %548 }
 0x135   : > { %v550_v9 = vmul.f32 0.03125, %v549_v8 }
 0x137   : > { %v551_v10 = vadd.f32 1e-05, %v550_v9 }
 0x139   : > { %1176 = vrsqrt.f32 %v551_v10 }
 0x146   : > { %v1177_v11 = vpop.eup %1176 }
 0x147   : > { %v553_v13 = vmul.f32 %v1177_v11, %v545_v5 }
 0x149   : > { %v560_v15 = vmul.f32 %v1069_v12, %v553_v13 }
 0x14b   : > { %v567_v16 = vadd.f32 %v1070_v14, %v560_v15 }
 0x14d   : > { %v568_v18 = vpack.c.bf16 %v567_v16, %v567_v16 }
 0x14f   : > { %v573_v19 = vsel %vm571_vm3, %v568_v18, %v572_v17 }
 0x150   : > { %574 = vst [vmem:[#allocation2] sm:$0x7] %v573_v19 }
 0x151 PF: > { %vm585_vm4 = vcmask 261120   ;;  %v632_v20 = vld [vmem:[%s512_s30] sm:$0xf]  ;;  %s1479_s22 = sld [smem:[#allocation10_spill]]  ;;  %v1223_v22 = vmov 0.0   ;;  %vm1224_vm5 = vmmov 0   ;;  %s1481_s3 = scalar_lea.vmem %s1456_s4, %s1325_s28 }
 0x152   : > { %1102 = vmatprep.subr.bf16.mxu1 %v1223_v22  ;;  %v641_v23 = vsel %vm585_vm4, %v632_v20, 0  ;;  %1096 = vmatprep.subr.bf16.mxu0 %v1223_v22  ;;  %v1073_v26 = vld [vmem:[%s515_s24] ss:$0 sm:$0xff]  ;;  %vm737_vm6 = vcmask 64512   ;;  %s1482_s25 = sld [smem:[#allocation12_spill]]  ;;  %vm784_vm7 = vcmask 36864  }
 0x153   : > { %1103 = vmatpush3.bf16.xpose.msra.mxu1 %v641_v23  ;;  %1104 = vmatprep.mubr.msk.bf16.mxu1 %vm1224_vm5, %v1223_v22  ;;  %v1071_v31 = vld [vmem:[%s1481_s3] ss:$0 sm:$0xff]  ;;  %vm802_vm8 = vcmask 1041408   ;;  %vm803_vm9 = vcmask 1042432   ;;  %v1225_v51 = vmov 65535   ;;  %vm855_vm10 = vcmask 1043456  }
 0x154   : > { %1098 = vmatprep.mubr.msk.bf16.mxu0 %vm1224_vm5, %v1223_v22  ;;  %1114 = vmatprep.subr.bf16.mxu1 %v1223_v22  ;;  %v683_v41 = vld [vmem:[%s519_s16] sm:$0xf]  ;;  %v804_v52 = vsel %vm802_vm8, 4294967295, %v1225_v51  ;;  %vm798_vm11 = vcmask 39936   ;;  %v849_v13 = vld [vmem:[#allocation3] sm:$0x1f] }
 0x155   : > { %v692_v42 = vsel %vm585_vm4, %v683_v41, 0  ;;  %v1075_v50 = vld [vmem:[%s522_s18] ss:$0 sm:$0xff]  ;;  %v805_v55 = vsel %vm803_vm9, %v804_v52, 0  ;;  %vm900_vm12 = vcmask 258048   ;;  %p1080_p8 = scmp.ne.s32.totalorder %s1204_s21, 3 }
 0x156   : > { %v851_v2 = vld [vmem:[%s526_s19] sm:$0xf]  ;;  %s1483_s29 = sld [smem:[#allocation11_spill]] (!%p1080_p8) }
 0x157   : > { %s1480_s13 = scalar_lea.vmem %s1479_s22, %s1333_s15  ;;  %v576_v25 = vld [vmem:[#allocation2] sm:$0x7]  ;;  %v857_v3 = vsel %vm855_vm10, %v851_v2, 0 }
 0x158   : > { %v577_v21 = vld [vmem:[%s1480_s13] sm:$0xf] }
 0x159   : > { %v590_v24 = vsel %vm585_vm4, %v577_v21, 0  ;;  %v736_v43 = vld [vmem:[%s1482_s25] sm:$0x1f] }
 0x15a   : > { %1097 = vmatpush3.bf16.xpose.msra.mxu0 %v590_v24  ;;  %1105 = vmatmul.mubr.msk.bf16.vlgmr.msra.gmra.mxu1 %vm585_vm4, %v576_v25 }
 0x15b   : > { %1108 = vmatprep.subr.bf16.mxu0 %v1223_v22  ;;  %1116 = vmatprep.mubr.msk.bf16.mxu1 %vm1224_vm5, %v1223_v22 }
 0x161   : > { %1099 = vmatmul.mubr.msk.bf16.vlgmr.msra.gmra.mxu0 %vm585_vm4, %v576_v25 }
 0x162   : > { %1110 = vmatprep.mubr.msk.bf16.mxu0 %vm1224_vm5, %v1223_v22  ;;  %1109 = vmatpush3.bf16.xpose.msra.mxu0 %v692_v42 }
 0x163   : > { %1120 = vmatprep.subr.bf16.mxu0 %v1223_v22 }
 0x169   : > { %1111 = vmatmul.mubr.msk.bf16.vlgmr.msra.gmra.mxu0 %vm585_vm4, %v576_v25 }
 0x16a   : > { %1122 = vmatprep.mubr.msk.bf16.mxu0 %vm1224_vm5, %v1223_v22 }
 0x21a   : > { %v677_v27 = vpop.f32.mrf.mxu1 }
 0x21b   : > { %v678_v29 = vadd.f32 %v1073_v26, %v677_v27 }
 0x21c   : > { %v1106_v30 = vpop.f32.mrf.mxu1 }
 0x21d   : > { %v735_v33 = vpack.c.bf16 %v678_v29, %v678_v29 }
 0x21e   : > { %v680_v34 = vpop.f32.mrf.mxu1 }
 0x21f   : > { %v742_v36 = vsel %vm737_vm6, %v735_v33, 0 }
 0x220   : > { %v1107_v38 = vpop.f32.mrf.mxu1  ;;  %1115 = vmatpush3.bf16.xpose.msra.mxu1 %v742_v36 }
 0x221   : > { %v626_v28 = vpop.f32.mrf.mxu0  ;;  %1126 = vmatprep.subr.bf16.mxu1 %v1223_v22 }
 0x222   : > { %v627_v37 = vadd.f32 %v1071_v31, %v626_v28 }
 0x223   : > { %v1100_v32 = vpop.f32.mrf.mxu0 }
 0x224   : > { %v734_v40 = vpack.c.bf16 %v627_v37, %v627_v37 }
 0x225   : > { %v629_v35 = vpop.f32.mrf.mxu0 }
 0x227   : > { %v1101_v39 = vpop.f32.mrf.mxu0  ;;  %1117 = vmatmul.mubr.msk.bf16.vlgmr.msra.gmra.mxu1 %vm737_vm6, %v734_v40 }
 0x228   : > { %1128 = vmatprep.mubr.msk.bf16.mxu1 %vm1224_vm5, %v1223_v22  ;;  %1127 = vmatpush3.bf16.msra.mxu1 %v857_v3 }
 0x229   : > { %v728_v53 = vpop.f32.mrf.mxu0 }
 0x22a   : > { %v729_v54 = vadd.f32 %v1075_v50, %v728_v53 }
 0x22b   : > { %v1112_v56 = vpop.f32.mrf.mxu0 }
 0x22c   : > { %v797_v57 = vpack.c.bf16 %v729_v54, %v729_v54 }
 0x22d   : > { %v731_v58 = vpop.f32.mrf.mxu0 }
 0x22e   : > { %v807_v59 = vand.u32 %v805_v55, %v797_v57 }
 0x22f   : > { %v1113_v60 = vpop.f32.mrf.mxu0 }
 0x230   : > { %1121 = vmatpush3.bf16.msra.mxu0 %v807_v59 }
 0x2e7   : > { %v778_v44 = vpop.f32.mrf.mxu1 }
 0x2e8   : > { %v779_v45 = vadd.f32 %v778_v44, %v736_v43 }
 0x2e9   : > { %v1118_v46 = vpop.f32.mrf.mxu1 }
 0x2ea   : > { %v785_v47 = vsel %vm784_vm7, %v779_v45, -inf }
 0x2eb   : > { %786 = vmax.xlane.f32.xlu0 %v785_v47  ;;  %v781_v48 = vpop.f32.mrf.mxu1 }
 0x2ed   : > { %v1119_v49 = vpop.f32.mrf.mxu1 }
 0x374   : > { %v787_v61 = vpop.xlane.xlu0 %786 }
 0x375   : > { %v788_v62 = vsub.f32 %v779_v45, %v787_v61 }
 0x377   : > { %v789_v63 = vmul.f32 1.442695, %v788_v62 }
 0x379   : > { %1178 = vpow2.f32 %v789_v63 }
 0x386   : > { %v1179_v0 = vpop.eup %1178 }
 0x387   : > { %v791_v1 = vsel %vm784_vm7, %v1179_v0, 0.0 }
 0x388   : > { %792 = vadd.xlane.f32.xlu0 %v791_v1 }
 0x411   : > { %v793_v4 = vpop.xlane.xlu0 %792 }
 0x412   : > { %1180 = vrcp.f32 %v793_v4 }
 0x41f   : > { %v1181_v5 = vpop.eup %1180 }
 0x420   : > { %v795_v6 = vmul.f32 %v1181_v5, %v1179_v0 }
 0x422   : > { %v796_v7 = vpack.c.bf16 %v795_v6, %v795_v6 }
 0x424   : > { %1123 = vmatmul.mubr.msk.bf16.vlgmr.msra.gmra.mxu0 %vm798_vm11, %v796_v7 }
 0x4e4   : > { %v843_v8 = vpop.f32.mrf.mxu0 }
 0x4e5   : > { %v850_v9 = vpack.c.bf16 %v843_v8, %v843_v8 }
 0x4e6   : > { %v1124_v10 = vpop.f32.mrf.mxu0 }
 0x4e7   : > { %1129 = vmatmul.mubr.msk.bf16.vlgmr.msra.gmra.mxu1 %vm737_vm6, %v850_v9 }
 0x4e8   : > { %v846_v11 = vpop.f32.mrf.mxu0 }
 0x4ea   : > { %v1125_v12 = vpop.f32.mrf.mxu0 }
 0x5a7   : > { %v893_v14 = vpop.f32.mrf.mxu1 }
 0x5a8   : > { %v899_v15 = vadd.f32 %v893_v14, %v849_v13 }
 0x5a9   : > { %v1130_v16 = vpop.f32.mrf.mxu1  ;;  %905 = sbr.rel (%p1080_p8) target bundleno = 1463 (0x5b7), region = 76 }
 0x5aa   : > { %901 = vst.msk [vmem:[#allocation3] sm:$0x1f] %vm900_vm12, %v899_v15 }
 0x5ab   : > { %v896_v17 = vpop.f32.mrf.mxu1 }
 0x5ad   : > { %v1131_v18 = vpop.f32.mrf.mxu1 }
 0x5ae   : > { %v906_v19 = vld [vmem:[%s1330_s14] sm:$0x1f] }
 0x5af   : > { %v1081_v21 = vld [vmem:[%s1483_s29] ss:$0 sm:$0xff] }
 0x5b1   : > { %v907_v20 = vld [vmem:[#allocation3] sm:$0x1f] }
 0x5b2   : > { %v908_v22 = vadd.f32 %v907_v20, %v906_v19 }
 0x5b4   : > { %v916_v23 = vadd.f32 %v1081_v21, %v908_v22 }
 0x5b6   : > { %917 = vst.msk [vmem:[%s1366_s26] sm:$0x1f] %vm900_vm12, %v916_v23 }
 0x5b7 PF: > { %s1484_s22 = sld [smem:[#allocation6_spill]] }
 0x5b8   : > { %s1485_s21 = sld [smem:[#allocation4_spill]] }
 0x5b9   : > { %s1487_s23 = sld [smem:[#allocation7_spill]] }
 0x5ba   : > { %s1488_s24 = sld [smem:[#allocation8_spill]] }
 0x5bd   : > { %s22_s25 = sadd.s32 1, %s1484_s22   ;;  %s1486_s22 = sld [smem:[#allocation5_spill]] }
 0x5be   : > { %p19_p9 = scmp.ge.s32.totalorder %s22_s25, 10  }
 0x5c0   :  { %21 = sbr.rel (!%p19_p9) target bundleno = 5 (0x5), region = 127 }

// kernel: hoi_vit_forward.9
= control target key start
LH: loop header
LB: loop body
LE: loop exit
PB: predicated region body
PF: predicated region fallthrough
CT: control target
= control target key end

     0   :  { %s1404_s21 = smov 0   ;;  %s1406_s22 = smov 0   ;;  %s1577_s0 = inlined_call_operand.vmem [shape: f32[2,5,32], index: 0, kind: input, shape index: {}]   ;;  %s1578_s1 = inlined_call_operand.vmem [shape: bf16[2,16,32], index: 1, kind: input, shape index: {}]   ;;  %s1579_s2 = inlined_call_operand.vmem [shape: f32[1,32], index: 2, kind: input, shape index: {}]   ;;  %s1580_s3 = inlined_call_operand.vmem [shape: f32[1,32], index: 3, kind: input, shape index: {}]   ;;  %s1581_s4 = inlined_call_operand.vmem [shape: bf16[4,8,32], index: 4, kind: input, shape index: {}]   ;;  %s1582_s5 = inlined_call_operand.vmem [shape: f32[4,1,8], index: 5, kind: input, shape index: {}]   ;;  %s1583_s6 = inlined_call_operand.vmem [shape: bf16[4,8,32], index: 6, kind: input, shape index: {}]   ;;  %s1584_s7 = inlined_call_operand.vmem [shape: f32[4,1,8], index: 7, kind: input, shape index: {}]   ;;  %s1585_s8 = inlined_call_operand.vmem [shape: bf16[4,8,32], index: 8, kind: input, shape index: {}]   ;;  %s1586_s9 = inlined_call_operand.vmem [shape: f32[4,1,8], index: 9, kind: input, shape index: {}]   ;;  %s1587_s10 = inlined_call_operand.vmem [shape: bf16[4,8,32], index: 10, kind: input, shape index: {}]   ;;  %s1588_s11 = inlined_call_operand.vmem [shape: f32[1,32], index: 11, kind: input, shape index: {}]   ;;  %s1589_s12 = inlined_call_operand.vmem [shape: f32[2,5,32], index: 12, kind: output, shape index: {}]  }
   0x1   :  { %1593 = sst [smem:[#allocation10_spill]] %s1577_s0  ;;  %s1408_s23 = smov 0  }
   0x2   :  { %1594 = sst [smem:[#allocation11_spill]] %s1578_s1  ;;  %s1410_s24 = smov 0  }
   0x3   :  { %1595 = sst [smem:[#allocation12_spill]] %s1580_s3  ;;  %s1412_s25 = smov 0  }
   0x4   :  { %1596 = sst [smem:[#allocation13_spill]] %s1582_s5 }
   0x5   :  { %1597 = sst [smem:[#allocation14_spill]] %s1588_s11 }
   0x6 LB: > { %1598 = sst [smem:[#allocation5_spill]] %s1326_s23  ;;  %s31_s26 = sadd.s32 1, %s1326_s23  ;;  %s1334_s25 = sphi %s1412_s25, %s22_s25   ;;  %s1330_s24 = sphi %s1410_s24, %s1615_s24   ;;  %s1326_s23 = sphi %s1408_s23, %s1614_s23   ;;  %s1322_s22 = sphi %s1406_s22, %s1613_s22   ;;  %s1318_s21 = sphi %s1404_s21, %s1612_s21  }
   0x7   : > { %1599 = sst [smem:[#allocation6_spill]] %s1330_s24  ;;  %s34_s27 = sadd.s32 1, %s1330_s24 }
   0x8   : > { %1600 = sst [smem:[#allocation7_spill]] %s1334_s25  ;;  %p32_p0 = scmp.ge.s32.totalorder %s31_s26, 4 }
   0x9   : > { %p1157_p1 = scmp.ge.s32.totalorder %s1334_s25, 1  ;;  %p443_p2 = scmp.lt.s32.totalorder %s1334_s25, 9 }
   0xa   : > { %s1617_s26 = smov (%p32_p0, %s31_s26), 0  ;;  %s1619_s27 = smov (!%p32_p0, %s34_s27), %s1330_s24 }
   0xb   : > { %1601 = sst [smem:[#allocation8_spill]] %s1617_s26  ;;  %p444_p3 = pnand %p1157_p1, %p443_p2 }
   0xc   : > { %p36_p4 = scmp.ge.s32.totalorder %s1619_s27, 2  ;;  %p513_p5 = scmp.lt.s32.totalorder (!%p444_p3), %s1322_s22, 1 }
   0xd   : > { %447 = sbr.rel (%p444_p3) target bundleno = 1475 (0x5c3), region = 68  ;;  %p522_p6 = scmp.lt.s32.totalorder (!%p444_p3), %s1318_s21, 3 }
   0xe   : > { %s1621_s27 = smov (%p36_p4, %s1619_s27), 0  ;;  %s1603_s0 = sld [smem:[#allocation10_spill]] (!%p444_p3) }
   0xf   : > { %1602 = sst [smem:[#allocation9_spill]] %s1621_s27  ;;  %p1166_p7 = scmp.ne.s32.totalorder (!%p444_p3), %s1318_s21, 0 }
  0x10   : > { %s1604_s1 = sld [smem:[#allocation11_spill]] (!%p444_p3) }
  0x12   : > { %s1623_s22 = smov (!%p513_p5, %s1322_s22), 1  ;;  %s1606_s25 = sld [smem:[#allocation12_spill]] (!%p1166_p7) }
  0x13   : > { %s1438_s28 = scalar_select %p522_p6, %s1318_s21, 3 }
  0x14   : > { %s1440_s29 = sshll.u32 %s1623_s22, 3 }
  0x15   : > { %s1446_s14 = scalar_lea.vmem %s1603_s0, %s1440_s29  ;;  %s1453_s18 = sshll.u32 %s1438_s28, 2 }
  0x16   : > { %s521_s17 = scalar_lea.vmem %s1604_s1, %s1440_s29  ;;  %s532_s24 = scalar_lea.vmem %s1583_s6, %s1453_s18 }
  0x17   : > { %s535_s1 = scalar_lea.vmem %s1584_s7, %s1438_s28  ;;  %s539_s19 = scalar_lea.vmem %s1585_s8, %s1453_s18 }
  0x18   : > { %s542_s22 = scalar_lea.vmem %s1586_s9, %s1438_s28  ;;  %s546_s27 = scalar_lea.vmem %s1587_s10, %s1453_s18 }
  0x19   : > { %s550_s0 = scalar_lea.vmem %s1589_s12, %s1440_s29  ;;  %555 = sbr.rel (%p1166_p7) target bundleno = 347 (0x15b), region = 72 }
  0x1e   : > { %v556_v0 = vld [vmem:[%s1446_s14] sm:$0x1f]  ;;  %vm559_vm0 = vcmask 258048   ;;  %vm601_vm1 = vcmask 261120   ;;  %v1336_v3 = vmov 0.0   ;;  %vm589_vm2 = vcmask 256000  }
  0x1f   : > { %v1191_v1 = vld [vmem:[%s521_s17] sm:$0xff]   ;;  %v560_v2 = vsel %vm559_vm0, %v556_v0, 0.0  ;;  %655 = vst.msk [vmem:[#allocation4] sm:$0x1f] %vm559_vm0, %v1336_v3  ;;  %vm590_vm3 = vsmask.f32 2304 }
  0x20   : > { %v1193_v4 = vunpack.c.h.bf16 %v1191_v1  ;;  %v1192_v5 = vunpack.c.l.bf16 %v1191_v1  ;;  %561 = vadd.xlane.f32.xlu0 %v560_v2  ;;  %v1167_v33 = vld [vmem:[%s1579_s2] ss:$0 sm:$0xff]  ;;  %vm591_vm4 = vmand %vm589_vm2, %vm590_vm3  ;;  %vm652_vm5 = vcmask 257024  }
  0x21   : > { %v1168_v35 = vld [vmem:[%s1606_s25] ss:$0 sm:$0xff] }
  0x22   : > { %v605_v6 = vsel %vm601_vm1, %v1193_v4, 0.0  ;;  %v602_v7 = vsel %vm601_vm1, %v1192_v5, 0.0  ;;  %v592_v41 = vld [vmem:[#allocation2] sm:$0x7] }
  0x23   : > { %606 = vadd.xlane.f32.xlu1 %v605_v6 }
  0x24   : > { %603 = vadd.xlane.f32.xlu0 %v602_v7 }
  0xa9   : > { %v562_v8 = vpop.xlane.xlu0 %561 }
  0xaa   : > { %v564_v9 = vmul.f32 0.03125, %v562_v8 }
  0xac   : > { %v607_v10 = vpop.xlane.xlu1 %606  ;;  %v565_v11 = vsub.f32 %v556_v0, %v564_v9 }
  0xad   : > { %v609_v12 = vmul.f32 0.03125, %v607_v10  ;;  %v604_v13 = vpop.xlane.xlu0 %603 }
  0xae   : > { %v608_v15 = vmul.f32 0.03125, %v604_v13  ;;  %v566_v16 = vmul.f32 %v565_v11, %v565_v11 }
  0xaf   : > { %v611_v14 = vsub.f32 %v1193_v4, %v609_v12 }
  0xb0   : > { %v610_v17 = vsub.f32 %v1192_v5, %v608_v15  ;;  %v567_v18 = vsel %vm559_vm0, %v566_v16, 0.0 }
  0xb1   : > { %v613_v19 = vmul.f32 %v611_v14, %v611_v14  ;;  %568 = vadd.xlane.f32.xlu1 %v567_v18 }
  0xb2   : > { %v612_v21 = vmul.f32 %v610_v17, %v610_v17 }
  0xb3   : > { %v617_v20 = vsel %vm601_vm1, %v613_v19, 0.0 }
  0xb4   : > { %v614_v22 = vsel %vm601_vm1, %v612_v21, 0.0 }
  0xb5   : > { %618 = vadd.xlane.f32.xlu1 %v617_v20  ;;  %615 = vadd.xlane.f32.xlu0 %v614_v22 }
 0x13a   : > { %v569_v23 = vpop.xlane.xlu1 %568 }
 0x13b   : > { %v570_v24 = vmul.f32 0.03125, %v569_v23 }
 0x13d   : > { %v571_v25 = vadd.f32 1e-05, %v570_v24 }
 0x13e   : > { %v619_v26 = vpop.xlane.xlu1 %618  ;;  %v616_v27 = vpop.xlane.xlu0 %615 }
 0x13f   : > { %1285 = vrsqrt.f32 %v571_v25  ;;  %v621_v28 = vmul.f32 0.03125, %v619_v26  ;;  %v620_v29 = vmul.f32 0.03125, %v616_v27 }
 0x141   : > { %v623_v30 = vadd.f32 1e-05, %v621_v28  ;;  %v622_v31 = vadd.f32 1e-05, %v620_v29 }
 0x143   : > { %1287 = vrsqrt.f32 %v623_v30 }
 0x144   : > { %1289 = vrsqrt.f32 %v622_v31 }
 0x14c   : > { %v1286_v32 = vpop.eup %1285 }
 0x14d   : > { %v573_v34 = vmul.f32 %v1286_v32, %v565_v11 }
 0x14f   : > { %v580_v36 = vmul.f32 %v1167_v33, %v573_v34 }
 0x150   : > { %v1288_v37 = vpop.eup %1287 }
 0x151   : > { %v1290_v38 = vpop.eup %1289  ;;  %v587_v39 = vadd.f32 %v1168_v35, %v580_v36  ;;  %v627_v40 = vmul.f32 %v1288_v37, %v611_v14 }
 0x152   : > { %v626_v42 = vmul.f32 %v1290_v38, %v610_v17 }
 0x153   : > { %v588_v43 = vpack.c.bf16 %v587_v39, %v587_v39  ;;  %v635_v44 = vmul.f32 %v1167_v33, %v627_v40 }
 0x154   : > { %v634_v45 = vmul.f32 %v1167_v33, %v626_v42 }
 0x155   : > { %v593_v46 = vsel %vm591_vm4, %v588_v43, %v592_v41  ;;  %v643_v47 = vadd.f32 %v1168_v35, %v635_v44 }
 0x156   : > { %594 = vst [vmem:[#allocation2] sm:$0x7] %v593_v46  ;;  %v642_v48 = vadd.f32 %v1168_v35, %v634_v45 }
 0x157   : > { %v1189_v49 = vpack.c.bf16 %v643_v47, %v643_v47 }
 0x158   : > { %v1188_v50 = vpack.c.bf16 %v642_v48, %v642_v48 }
 0x159   : > { %654 = vst.msk [vmem:[#allocation3 + $0x4] sm:$0xf] %vm652_vm5, %v1189_v49 }
 0x15a   : > { %653 = vst.msk [vmem:[#allocation3] sm:$0xf] %vm652_vm5, %v1188_v50 }
 0x15b PF: > { %vm667_vm6 = vcmask 261120   ;;  %v714_v51 = vld [vmem:[%s532_s24] sm:$0xf]  ;;  %v1337_v52 = vmov 0.0   ;;  %s1607_s16 = scalar_lea.vmem %s1581_s4, %s1453_s18  ;;  %vm1338_vm7 = vmmov 0   ;;  %s1608_s5 = sld [smem:[#allocation13_spill]] }
 0x15c   : > { %1212 = vmatprep.subr.bf16.mxu1 %v1337_v52  ;;  %v731_v53 = vsel %vm667_vm6, %v714_v51, 0  ;;  %1206 = vmatprep.subr.bf16.mxu0 %v1337_v52  ;;  %v659_v54 = vld [vmem:[%s1607_s16] sm:$0xf]  ;;  %vm828_vm8 = vcmask 64512   ;;  %vm875_vm9 = vcmask 126976   ;;  %vm939_vm10 = vcmask 1043456  }
 0x15d   : > { %1213 = vmatpush3.bf16.xpose.msra.mxu1 %v731_v53  ;;  %1214 = vmatprep.mubr.msk.bf16.mxu1 %vm1338_vm7, %v1337_v52  ;;  %v672_v55 = vsel %vm667_vm6, %v659_v54, 0  ;;  %v656_v57 = vld [vmem:[#allocation2] sm:$0x7]  ;;  %vm889_vm11 = vcmask 130048   ;;  %v933_v41 = vld [vmem:[#allocation4] sm:$0x1f] }
 0x15e   : > { %1207 = vmatpush3.bf16.xpose.msra.mxu0 %v672_v55  ;;  %1208 = vmatprep.mubr.msk.bf16.mxu0 %vm1338_vm7, %v1337_v52  ;;  %v1175_v60 = vld [vmem:[%s535_s1] ss:$0 sm:$0xff]  ;;  %vm984_vm12 = vcmask 258048   ;;  %p1183_p8 = scmp.ne.s32.totalorder %s1318_s21, 3 }
 0x15f   : > { %1224 = vmatprep.subr.bf16.mxu1 %v1337_v52  ;;  %1218 = vmatprep.subr.bf16.mxu0 %v1337_v52  ;;  %v774_v10 = vld [vmem:[%s539_s19] sm:$0xf] }
 0x160   : > { %v783_v11 = vsel %vm667_vm6, %v774_v10, 0  ;;  %v1178_v24 = vld [vmem:[%s542_s22] ss:$0 sm:$0xff]  ;;  %s1610_s22 = sld [smem:[#allocation14_spill]] (!%p1183_p8) }
 0x161   : > { %v1291_v56 = vld [vmem:[#allocation3] sm:$0xff]   ;;  %s1609_s11 = scalar_lea.vmem %s1608_s5, %s1438_s28  ;;  %v935_v30 = vld [vmem:[%s546_s27] sm:$0xf] }
 0x162   : > { %v1173_v4 = vld [vmem:[%s1609_s11] ss:$0 sm:$0xff]  ;;  %v941_v31 = vsel %vm939_vm10, %v935_v30, 0 }
 0x164   : > { %1215 = vmatmul.mubr.msk.bf16.vlgmr.msra.gmra.mxu1 %vm667_vm6, %v1291_v56 }
 0x165   : > { %1209 = vmatmul.mubr.msk.bf16.vlgmr.msra.gmra.mxu0 %vm667_vm6, %v656_v57  ;;  %1226 = vmatprep.mubr.msk.bf16.mxu1 %vm1338_vm7, %v1337_v52 }
 0x166   : > { %1220 = vmatprep.mubr.msk.bf16.mxu0 %vm1338_vm7, %v1337_v52  ;;  %1219 = vmatpush3.bf16.xpose.msra.mxu0 %v783_v11 }
 0x167   : > { %1230 = vmatprep.subr.bf16.mxu0 %v1337_v52 }
 0x16d   : > { %1221 = vmatmul.mubr.msk.bf16.vlgmr.msra.gmra.mxu0 %vm667_vm6, %v1291_v56 }
 0x16e   : > { %1232 = vmatprep.mubr.msk.bf16.mxu0 %vm1338_vm7, %v1337_v52 }
 0x224   : > { %v767_v58 = vpop.f32.mrf.mxu1 }
 0x225   : > { %v708_v59 = vpop.f32.mrf.mxu0  ;;  %v768_v0 = vadd.f32 %v1175_v60, %v767_v58 }
 0x226   : > { %v1216_v61 = vpop.f32.mrf.mxu1  ;;  %v709_v7 = vadd.f32 %v1173_v4, %v708_v59 }
 0x227   : > { %v1210_v62 = vpop.f32.mrf.mxu0 }
 0x228   : > { %v770_v63 = vpop.f32.mrf.mxu1  ;;  %v826_v9 = vpack.c.bf16 %v709_v7, %v709_v7 }
 0x229   : > { %v771_v1 = vadd.f32 %v1175_v60, %v770_v63  ;;  %v711_v2 = vpop.f32.mrf.mxu0 }
 0x22a   : > { %v1217_v3 = vpop.f32.mrf.mxu1 }
 0x22b   : > { %v827_v5 = vpack.c.bf16 %v771_v1, %v768_v0  ;;  %v1211_v6 = vpop.f32.mrf.mxu0 }
 0x22d   : > { %v833_v8 = vsel %vm828_vm8, %v827_v5, 0  ;;  %v819_v17 = vpop.f32.mrf.mxu0 }
 0x22e   : > { %1225 = vmatpush3.bf16.xpose.msra.mxu1 %v833_v8  ;;  %v820_v25 = vadd.f32 %v1178_v24, %v819_v17 }
 0x22f   : > { %1236 = vmatprep.subr.bf16.mxu1 %v1337_v52  ;;  %v1222_v18 = vpop.f32.mrf.mxu0 }
 0x231   : > { %v822_v26 = vpop.f32.mrf.mxu0 }
 0x232   : > { %v823_v27 = vadd.f32 %v1178_v24, %v822_v26 }
 0x233   : > { %v1223_v28 = vpop.f32.mrf.mxu0 }
 0x234   : > { %v888_v29 = vpack.c.bf16 %v823_v27, %v820_v25 }
 0x235   : > { %1227 = vmatmul.mubr.msk.bf16.vlgmr.msra.gmra.mxu1 %vm828_vm8, %v826_v9 }
 0x236   : > { %1238 = vmatprep.mubr.msk.bf16.mxu1 %vm1338_vm7, %v1337_v52  ;;  %1231 = vmatpush3.bf16.msra.mxu0 %v888_v29 }
 0x237   : > { %1237 = vmatpush3.bf16.msra.mxu1 %v941_v31 }
 0x2f5   : > { %v869_v12 = vpop.f32.mrf.mxu1 }
 0x2f6   : > { %v876_v13 = vsel %vm875_vm9, %v869_v12, -inf }
 0x2f7   : > { %877 = vmax.xlane.f32.xlu0 %v876_v13  ;;  %v1228_v14 = vpop.f32.mrf.mxu1 }
 0x2f9   : > { %v872_v15 = vpop.f32.mrf.mxu1 }
 0x2fb   : > { %v1229_v16 = vpop.f32.mrf.mxu1 }
 0x380   : > { %v878_v19 = vpop.xlane.xlu0 %877 }
 0x381   : > { %v879_v20 = vsub.f32 %v869_v12, %v878_v19 }
 0x383   : > { %v880_v21 = vmul.f32 1.442695, %v879_v20 }
 0x385   : > { %1292 = vpow2.f32 %v880_v21 }
 0x392   : > { %v1293_v22 = vpop.eup %1292 }
 0x393   : > { %v882_v23 = vsel %vm875_vm9, %v1293_v22, 0.0 }
 0x394   : > { %883 = vadd.xlane.f32.xlu0 %v882_v23 }
 0x41d   : > { %v884_v32 = vpop.xlane.xlu0 %883 }
 0x41e   : > { %1294 = vrcp.f32 %v884_v32 }
 0x42b   : > { %v1295_v33 = vpop.eup %1294 }
 0x42c   : > { %v886_v34 = vmul.f32 %v1295_v33, %v1293_v22 }
 0x42e   : > { %v887_v35 = vpack.c.bf16 %v886_v34, %v886_v34 }
 0x430   : > { %1233 = vmatmul.mubr.msk.bf16.vlgmr.msra.gmra.mxu0 %vm889_vm11, %v887_v35 }
 0x4f0   : > { %v927_v36 = vpop.f32.mrf.mxu0 }
 0x4f1   : > { %v934_v37 = vpack.c.bf16 %v927_v36, %v927_v36 }
 0x4f2   : > { %v1234_v38 = vpop.f32.mrf.mxu0 }
 0x4f3   : > { %1239 = vmatmul.mubr.msk.bf16.vlgmr.msra.gmra.mxu1 %vm828_vm8, %v934_v37 }
 0x4f4   : > { %v930_v39 = vpop.f32.mrf.mxu0 }
 0x4f6   : > { %v1235_v40 = vpop.f32.mrf.mxu0 }
 0x5b3   : > { %v977_v42 = vpop.f32.mrf.mxu1 }
 0x5b4   : > { %v983_v43 = vadd.f32 %v977_v42, %v933_v41 }
 0x5b5   : > { %v1240_v44 = vpop.f32.mrf.mxu1  ;;  %989 = sbr.rel (%p1183_p8) target bundleno = 1475 (0x5c3), region = 76 }
 0x5b6   : > { %985 = vst.msk [vmem:[#allocation4] sm:$0x1f] %vm984_vm12, %v983_v43 }
 0x5b7   : > { %v980_v45 = vpop.f32.mrf.mxu1 }
 0x5b9   : > { %v1241_v46 = vpop.f32.mrf.mxu1 }
 0x5ba   : > { %v990_v47 = vld [vmem:[%s1446_s14] sm:$0x1f] }
 0x5bb   : > { %v1184_v49 = vld [vmem:[%s1610_s22] ss:$0 sm:$0xff] }
 0x5bd   : > { %v991_v48 = vld [vmem:[#allocation4] sm:$0x1f] }
 0x5be   : > { %v992_v50 = vadd.f32 %v991_v48, %v990_v47 }
 0x5c0   : > { %v1000_v51 = vadd.f32 %v1184_v49, %v992_v50 }
 0x5c2   : > { %1001 = vst.msk [vmem:[%s550_s0] sm:$0x1f] %vm984_vm12, %v1000_v51 }
 0x5c3 PF: > { %s1611_s15 = sld [smem:[#allocation7_spill]] }
 0x5c4   : > { %s1612_s21 = sld [smem:[#allocation5_spill]] }
 0x5c5   : > { %s1613_s22 = sld [smem:[#allocation6_spill]] }
 0x5c6   : > { %s1614_s23 = sld [smem:[#allocation8_spill]] }
 0x5c7   : > { %s1615_s24 = sld [smem:[#allocation9_spill]] }
 0x5c9   : > { %s22_s25 = sadd.s32 1, %s1611_s15  }
 0x5ca   : > { %p19_p9 = scmp.ge.s32.totalorder %s22_s25, 10  }
 0x5cc   :  { %21 = sbr.rel (!%p19_p9) target bundleno = 6 (0x6), region = 130 }

// kernel: hoi_vit_forward.15
= control target key start
LH: loop header
LB: loop body
LE: loop exit
PB: predicated region body
PF: predicated region fallthrough
CT: control target
= control target key end

     0   :  { %vm48_vm0 = vcmask 261120   ;;  %v564_v14 = vmov 0.0   ;;  %vm565_vm1 = vmmov 0   ;;  %vm153_vm2 = vcmask 130048   ;;  %s741_s0 = inlined_call_operand.vmem [shape: f32[16,32], index: 0, kind: input, shape index: {}]   ;;  %s742_s3 = inlined_call_operand.vmem [shape: bf16[32,16], index: 3, kind: input, shape index: {}]   ;;  %s743_s6 = inlined_call_operand.vmem [shape: bf16[32,32], index: 6, kind: input, shape index: {}]   ;;  %s744_s4 = inlined_call_operand.vmem [shape: bf16[32,8], index: 4, kind: input, shape index: {}]   ;;  %s745_s1 = inlined_call_operand.vmem [shape: f32[1,32], index: 1, kind: input, shape index: {}]   ;;  %s746_s2 = inlined_call_operand.vmem [shape: f32[1,32], index: 2, kind: input, shape index: {}]   ;;  %s747_s8 = inlined_call_operand.vmem [shape: bf16[32,32], index: 8, kind: input, shape index: {}]   ;;  %s748_s12 = inlined_call_operand.vmem [shape: f32[16,16], index: 12, kind: output, shape index: {0}]   ;;  %s749_s7 = inlined_call_operand.vmem [shape: f32[1,32], index: 7, kind: input, shape index: {}]   ;;  %s750_s10 = inlined_call_operand.vmem [shape: bf16[32,8], index: 10, kind: input, shape index: {}]   ;;  %s751_s9 = inlined_call_operand.vmem [shape: f32[1,32], index: 9, kind: input, shape index: {}]   ;;  %s752_s11 = inlined_call_operand.vmem [shape: f32[1,8], index: 11, kind: input, shape index: {}]   ;;  %s753_s5 = inlined_call_operand.vmem [shape: f32[1,8], index: 5, kind: input, shape index: {}]   ;;  %s754_s13 = inlined_call_operand.vmem [shape: f32[16,16], index: 13, kind: output, shape index: {1}]  }
   0x1   :  { %v640_v0 = vld [vmem:[%s741_s0] sm:$0xff]  ;;  %v45_v1 = vld [vmem:[%s741_s0 + $0x8] sm:$0xff]  ;;  %499 = vmatprep.subr.bf16.mxu0 %v564_v14  ;;  %503 = vmatprep.mubr.msk.bf16.mxu0 %vm565_vm1, %v564_v14  ;;  %vm448_vm3 = vcmask 64512  }
   0x2   :  { %v49_v2 = vsel %vm48_vm0, %v640_v0, 0.0  ;;  %v52_v3 = vsel %vm48_vm0, %v45_v1, 0.0  ;;  %v542_v15 = vld [vmem:[%s742_s3 + $0x8] sm:$0xff]   ;;  %507 = vmatprep.subr.bf16.mxu1 %v564_v14  ;;  %511 = vmatprep.mubr.msk.bf16.mxu1 %vm565_vm1, %v564_v14  ;;  %v543_v16 = vld [vmem:[%s742_s3] sm:$0xff]   ;;  %v161_v37 = vpack.c.bf16 %v45_v1, %v640_v0 }
   0x3   :  { %50 = vadd.xlane.f32.xlu0 %v49_v2  ;;  %500 = vmatpush3.bf16.msra.mxu0 %v542_v15  ;;  %v546_v17 = vld [vmem:[%s744_s4 + $0x8] sm:$0xff]   ;;  %v461_v26 = vld [vmem:[%s745_s1] ss:$0 sm:$0xff] }
   0x4   :  { %501 = vmatprep.subr.bf16.mxu0 %v564_v14  ;;  %508 = vmatpush3.bf16.msra.mxu1 %v546_v17  ;;  %v462_v30 = vld [vmem:[%s746_s2] ss:$0 sm:$0xff]  ;;  %v544_v34 = vld [vmem:[%s743_s6 + $0x8] sm:$0xff]  }
   0x5   :  { %509 = vmatprep.subr.bf16.mxu1 %v564_v14  ;;  %v545_v36 = vld [vmem:[%s743_s6] sm:$0xff]   ;;  %v548_v39 = vld [vmem:[%s747_s8 + $0x8] sm:$0xff]  }
   0x6   :  { %v547_v38 = vld [vmem:[%s744_s4] sm:$0xff]   ;;  %v550_v59 = vld [vmem:[%s750_s10 + $0x8] sm:$0xff]  }
   0x7   :  { %53 = vadd.xlane.f32.xlu0 %v52_v3  ;;  %502 = vmatpush3.bf16.msra.mxu0 %v543_v16  ;;  %v549_v40 = vld [vmem:[%s747_s8] sm:$0xff]  }
   0x8   :  { %515 = vmatprep.subr.bf16.mxu0 %v564_v14  ;;  %510 = vmatpush3.bf16.msra.mxu1 %v547_v38  ;;  %v470_v45 = vld [vmem:[%s749_s7] ss:$0 sm:$0xff] }
   0x9   :  { %523 = vmatprep.subr.bf16.mxu1 %v564_v14  ;;  %v551_v60 = vld [vmem:[%s750_s10] sm:$0xff]  }
   0xa   :  { %v474_v61 = vld [vmem:[%s751_s9] ss:$0 sm:$0xff]  ;;  %s566_s9 = smov 8  }
   0xb   :  { %512 = vmatmul.mubr.msk.bf16.vlgmr.msra.gmra.mxu1 %vm48_vm0, %v161_v37 }
   0xc   :  { %527 = vmatprep.mubr.msk.bf16.mxu1 %vm565_vm1, %v564_v14  ;;  %524 = vmatpush3.bf16.msra.mxu1 %v548_v39 }
   0xd   :  { %525 = vmatprep.subr.bf16.mxu1 %v564_v14 }
  0x10   :  { %526 = vmatpush3.bf16.msra.mxu1 %v549_v40 }
  0x8c   :  { %v51_v4 = vpop.xlane.xlu0 %50 }
  0x8d   :  { %v56_v5 = vmul.f32 0.03125, %v51_v4 }
  0x8f   :  { %v58_v6 = vsub.f32 %v640_v0, %v56_v5 }
  0x90   :  { %v54_v7 = vpop.xlane.xlu0 %53 }
  0x91   :  { %v57_v8 = vmul.f32 0.03125, %v54_v7  ;;  %v60_v9 = vmul.f32 %v58_v6, %v58_v6  ;;  %v478_v7 = vld [vmem:[%s752_s11] ss:$0 sm:$0xff] }
  0x93   :  { %v59_v10 = vsub.f32 %v45_v1, %v57_v8  ;;  %v62_v11 = vsel %vm48_vm0, %v60_v9, 0.0 }
  0x94   :  { %63 = vadd.xlane.f32.xlu1 %v62_v11 }
  0x95   :  { %v61_v12 = vmul.f32 %v59_v10, %v59_v10 }
  0x97   :  { %v65_v13 = vsel %vm48_vm0, %v61_v12, 0.0 }
  0x98   :  { %66 = vadd.xlane.f32.xlu1 %v65_v13 }
  0xcb   :  { %v217_v55 = vpop.f32.mrf.mxu1 }
  0xcd   :  { %v513_v56 = vpop.f32.mrf.mxu1 }
  0xcf   :  { %v220_v57 = vpop.f32.mrf.mxu1 }
  0xd1   :  { %v514_v58 = vpop.f32.mrf.mxu1 }
 0x11d   :  { %v64_v18 = vpop.xlane.xlu1 %63 }
 0x11e   :  { %v68_v19 = vmul.f32 0.03125, %v64_v18 }
 0x120   :  { %v70_v20 = vadd.f32 1e-05, %v68_v19 }
 0x121   :  { %v67_v21 = vpop.xlane.xlu1 %66 }
 0x122   :  { %552 = vrsqrt.f32 %v70_v20  ;;  %v69_v22 = vmul.f32 0.03125, %v67_v21 }
 0x124   :  { %v71_v23 = vadd.f32 1e-05, %v69_v22  ;;  %v466_v22 = vld [vmem:[%s753_s5] ss:$0 sm:$0xff] }
 0x126   :  { %554 = vrsqrt.f32 %v71_v23  ;;  %v218_v23 = vadd.f32 %v466_v22, %v217_v55 }
 0x12f   :  { %v553_v24 = vpop.eup %552 }
 0x130   :  { %v74_v25 = vmul.f32 %v553_v24, %v58_v6 }
 0x132   :  { %v82_v29 = vmul.f32 %v461_v26, %v74_v25 }
 0x133   :  { %v555_v27 = vpop.eup %554 }
 0x134   :  { %v75_v28 = vmul.f32 %v555_v27, %v59_v10  ;;  %v90_v32 = vadd.f32 %v462_v30, %v82_v29 }
 0x136   :  { %v83_v31 = vmul.f32 %v461_v26, %v75_v28  ;;  %v221_v26 = vadd.f32 %v466_v22, %v220_v57 }
 0x138   :  { %v91_v33 = vadd.f32 %v462_v30, %v83_v31 }
 0x13a   :  { %v96_v35 = vpack.c.bf16 %v91_v33, %v90_v32 }
 0x13c   :  { %504 = vmatmul.mubr.msk.bf16.vlgmr.msra.gmra.mxu0 %vm48_vm0, %v96_v35 }
 0x13d   :  { %516 = vmatpush3.bf16.msra.mxu0 %v544_v34  ;;  %519 = vmatprep.mubr.msk.bf16.mxu0 %vm565_vm1, %v564_v14 }
 0x13e   :  { %517 = vmatprep.subr.bf16.mxu0 %v564_v14 }
 0x141   :  { %518 = vmatpush3.bf16.msra.mxu0 %v545_v36 }
 0x142   :  { %531 = vmatprep.subr.bf16.mxu0 %v564_v14 }
 0x144   :  { %520 = vmatmul.mubr.msk.bf16.vlgmr.msra.gmra.mxu0 %vm48_vm0, %v161_v37 }
 0x145   :  { %535 = vmatprep.mubr.msk.bf16.mxu0 %vm565_vm1, %v564_v14  ;;  %532 = vmatpush3.bf16.msra.mxu0 %v550_v59 }
 0x146   :  { %533 = vmatprep.subr.bf16.mxu0 %v564_v14 }
 0x149   :  { %534 = vmatpush3.bf16.msra.mxu0 %v551_v60 }
 0x1fc   :  { %v146_v41 = vpop.f32.mrf.mxu0 }
 0x1fd   :  { %154 = vst.msk [vmem:[%s748_s12] sm:$0xff] %vm153_vm2, %v146_v41 }
 0x1fe   :  { %v505_v42 = vpop.f32.mrf.mxu0 }
 0x200   :  { %v149_v43 = vpop.f32.mrf.mxu0 }
 0x201   :  { %155 = vst.msk [vmem:[%s748_s12 + $0x8] sm:$0xff] %vm153_vm2, %v149_v43 }
 0x202   :  { %v506_v44 = vpop.f32.mrf.mxu0 }
 0x204   :  { %v281_v46 = vpop.f32.mrf.mxu0 }
 0x205   :  { %v282_v48 = vadd.f32 %v470_v45, %v281_v46 }
 0x206   :  { %v521_v47 = vpop.f32.mrf.mxu0 }
 0x207   :  { %v288_v52 = vmax.f32 %v282_v48, 0.0 }
 0x208   :  { %v284_v49 = vpop.f32.mrf.mxu0 }
 0x209   :  { %v285_v50 = vadd.f32 %v470_v45, %v284_v49 }
 0x20a   :  { %v522_v51 = vpop.f32.mrf.mxu0 }
 0x20b   :  { %v289_v53 = vmax.f32 %v285_v50, 0.0 }
 0x20d   :  { %v295_v54 = vpack.c.bf16 %v289_v53, %v288_v52 }
 0x20f   :  { %528 = vmatmul.mubr.msk.bf16.vlgmr.msra.gmra.mxu1 %vm48_vm0, %v295_v54 }
 0x2cf   :  { %v351_v62 = vpop.f32.mrf.mxu1 }
 0x2d0   :  { %v352_v0 = vadd.f32 %v474_v61, %v351_v62 }
 0x2d1   :  { %v529_v63 = vpop.f32.mrf.mxu1 }
 0x2d2   :  { %v358_v4 = vmax.f32 %v352_v0, 0.0 }
 0x2d3   :  { %v354_v1 = vpop.f32.mrf.mxu1 }
 0x2d4   :  { %v355_v2 = vadd.f32 %v474_v61, %v354_v1 }
 0x2d5   :  { %v530_v3 = vpop.f32.mrf.mxu1 }
 0x2d6   :  { %v359_v5 = vmax.f32 %v355_v2, 0.0 }
 0x2d8   :  { %v365_v6 = vpack.c.bf16 %v359_v5, %v358_v4 }
 0x2da   :  { %536 = vmatmul.mubr.msk.bf16.vlgmr.msra.gmra.mxu0 %vm48_vm0, %v365_v6 }
 0x39a   :  { %v421_v8 = vpop.f32.mrf.mxu0 }
 0x39b   :  { %v422_v9 = vadd.f32 %v478_v7, %v421_v8 }
 0x39c   :  { %v537_v10 = vpop.f32.mrf.mxu0 }
 0x39d   :  { %v482_v11 = vmul.f32 -1.442695, %v422_v9 }
 0x39e   :  { %v424_v12 = vpop.f32.mrf.mxu0 }
 0x39f   :  { %556 = vpow2.f32 %v482_v11  ;;  %v425_v13 = vadd.f32 %v478_v7, %v424_v12 }
 0x3a0   :  { %v538_v14 = vpop.f32.mrf.mxu0 }
 0x3a1   :  { %v483_v15 = vmul.f32 -1.442695, %v425_v13 }
 0x3a3   :  { %558 = vpow2.f32 %v483_v15 }
 0x3ac   :  { %v557_v16 = vpop.eup %556 }
 0x3ad   :  { %v434_v17 = vadd.f32 1.0, %v557_v16 }
 0x3af   :  { %560 = vrcp.f32 %v434_v17 }
 0x3b0   :  { %v559_v18 = vpop.eup %558 }
 0x3b1   :  { %v435_v19 = vadd.f32 1.0, %v559_v18 }
 0x3b3   :  { %562 = vrcp.f32 %v435_v19 }
 0x3bc   :  { %v561_v20 = vpop.eup %560 }
 0x3bd   :  { %442 = vrot.lane.b32.xlu0 %v561_v20, %s566_s9 }
 0x3c0   :  { %v563_v21 = vpop.eup %562 }
 0x3c1   :  { %444 = vrot.lane.b32.xlu1 %v563_v21, %s566_s9 }
 0x42f   :  { %v443_v24 = vpop.permute.xlu0 %442 }
 0x430   :  { %v449_v25 = vsel %vm448_vm3, %v218_v23, %v443_v24 }
 0x431   :  { %451 = vst.msk [vmem:[%s754_s13] sm:$0xff] %vm153_vm2, %v449_v25 }
 0x433   :  { %v445_v27 = vpop.permute.xlu1 %444 }
 0x434   :  { %v450_v28 = vsel %vm448_vm3, %v221_v26, %v445_v27 }
 0x435   :  { %452 = vst.msk [vmem:[%s754_s13 + $0x8] sm:$0xff] %vm153_vm2, %v450_v28 }

// kernel: hoi_vit_forward.12
= control target key start
LH: loop header
LB: loop body
LE: loop exit
PB: predicated region body
PF: predicated region fallthrough
CT: control target
= control target key end

     0   :  { %s1487_s25 = smov 0   ;;  %s1489_s26 = smov 0   ;;  %s1675_s0 = inlined_call_operand.vmem [shape: f32[2,5,32], index: 0, kind: input, shape index: {}]   ;;  %s1676_s1 = inlined_call_operand.vmem [shape: bf16[2,16,32], index: 1, kind: input, shape index: {}]   ;;  %s1677_s2 = inlined_call_operand.vmem [shape: f32[1,32], index: 2, kind: input, shape index: {}]   ;;  %s1678_s3 = inlined_call_operand.vmem [shape: f32[1,32], index: 3, kind: input, shape index: {}]   ;;  %s1679_s4 = inlined_call_operand.vmem [shape: bf16[4,8,32], index: 4, kind: input, shape index: {}]   ;;  %s1680_s5 = inlined_call_operand.vmem [shape: f32[4,1,8], index: 5, kind: input, shape index: {}]   ;;  %s1681_s6 = inlined_call_operand.vmem [shape: bf16[4,8,32], index: 6, kind: input, shape index: {}]   ;;  %s1682_s7 = inlined_call_operand.vmem [shape: f32[4,1,8], index: 7, kind: input, shape index: {}]   ;;  %s1683_s8 = inlined_call_operand.vmem [shape: bf16[4,8,32], index: 8, kind: input, shape index: {}]   ;;  %s1684_s9 = inlined_call_operand.vmem [shape: f32[4,1,8], index: 9, kind: input, shape index: {}]   ;;  %s1685_s10 = inlined_call_operand.vmem [shape: bf16[4,8,32], index: 10, kind: input, shape index: {}]   ;;  %s1686_s11 = inlined_call_operand.vmem [shape: f32[1,32], index: 11, kind: input, shape index: {}]   ;;  %s1687_s12 = inlined_call_operand.vmem [shape: f32[2,5,32], index: 12, kind: output, shape index: {0}]   ;;  %s1688_s13 = inlined_call_operand.vmem [shape: f32[2,5,16], index: 13, kind: output, shape index: {1}]  }
   0x1   :  { %1692 = sst [smem:[#allocation11_spill]] %s1675_s0  ;;  %s1491_s27 = smov 0  }
   0x2   :  { %1693 = sst [smem:[#allocation12_spill]] %s1676_s1  ;;  %s1493_s28 = smov 0  }
   0x3   :  { %1694 = sst [smem:[#allocation13_spill]] %s1677_s2  ;;  %s1495_s29 = smov 0  }
   0x4   :  { %1695 = sst [smem:[#allocation14_spill]] %s1678_s3 }
   0x5   :  { %1696 = sst [smem:[#allocation15_spill]] %s1680_s5 }
   0x6   :  { %1697 = sst [smem:[#allocation16_spill]] %s1686_s11 }
   0x7 LB: > { %1698 = sst [smem:[#allocation6_spill]] %s1404_s27  ;;  %s33_s30 = sadd.s32 1, %s1404_s27  ;;  %s1412_s29 = sphi %s1495_s29, %s24_s29   ;;  %s1408_s28 = sphi %s1493_s28, %s1717_s28   ;;  %s1404_s27 = sphi %s1491_s27, %s1716_s27   ;;  %s1400_s26 = sphi %s1489_s26, %s1715_s26   ;;  %s1396_s25 = sphi %s1487_s25, %s1714_s25  }
   0x8   : > { %1699 = sst [smem:[#allocation7_spill]] %s1408_s28  ;;  %s36_s14 = sadd.s32 1, %s1408_s28 }
   0x9   : > { %1700 = sst [smem:[#allocation8_spill]] %s1412_s29  ;;  %p34_p0 = scmp.ge.s32.totalorder %s33_s30, 4 }
   0xa   : > { %p1234_p1 = scmp.ge.s32.totalorder %s1412_s29, 1  ;;  %p471_p2 = scmp.lt.s32.totalorder %s1412_s29, 9 }
   0xb   : > { %s1719_s30 = smov (%p34_p0, %s33_s30), 0  ;;  %s1721_s14 = smov (!%p34_p0, %s36_s14), %s1408_s28 }
   0xc   : > { %1701 = sst [smem:[#allocation9_spill]] %s1719_s30  ;;  %p472_p3 = pnand %p1234_p1, %p471_p2 }
   0xd   : > { %p38_p4 = scmp.ge.s32.totalorder %s1721_s14, 2  ;;  %p547_p5 = scmp.lt.s32.totalorder (!%p472_p3), %s1400_s26, 1 }
   0xe   : > { %475 = sbr.rel (%p472_p3) target bundleno = 1477 (0x5c5), region = 68  ;;  %p556_p6 = scmp.lt.s32.totalorder (!%p472_p3), %s1396_s25, 3 }
   0xf   : > { %s1723_s14 = smov (%p38_p4, %s1721_s14), 0  ;;  %s1703_s0 = sld [smem:[#allocation11_spill]] (!%p472_p3) }
  0x10   : > { %1702 = sst [smem:[#allocation10_spill]] %s1723_s14  ;;  %p1244_p7 = scmp.ne.s32.totalorder (!%p472_p3), %s1396_s25, 0 }
  0x11   : > { %s1704_s1 = sld [smem:[#allocation12_spill]] (!%p472_p3) }
  0x13   : > { %s1725_s26 = smov (!%p547_p5, %s1400_s26), 1  ;;  %s1706_s5 = sld [smem:[#allocation13_spill]] (!%p1244_p7) }
  0x14   : > { %s1521_s15 = scalar_select %p556_p6, %s1396_s25, 3 }
  0x15   : > { %s1523_s16 = sshll.u32 %s1725_s26, 3  ;;  %s1707_s29 = sld [smem:[#allocation14_spill]] (!%p1244_p7) }
  0x16   : > { %s1529_s19 = scalar_lea.vmem %s1703_s0, %s1523_s16  ;;  %s1536_s23 = sshll.u32 %s1521_s15, 2 }
  0x17   : > { %s555_s22 = scalar_lea.vmem %s1704_s1, %s1523_s16  ;;  %s569_s1 = scalar_lea.vmem %s1682_s7, %s1521_s15 }
  0x18   : > { %s573_s14 = scalar_lea.vmem %s1683_s8, %s1536_s23  ;;  %s576_s26 = scalar_lea.vmem %s1684_s9, %s1521_s15 }
  0x19   : > { %s580_s17 = scalar_lea.vmem %s1685_s10, %s1536_s23  ;;  %s584_s0 = scalar_lea.vmem %s1687_s12, %s1523_s16 }
  0x1a   : > { %s588_s20 = scalar_lea.vmem %s1688_s13, %s1523_s16  ;;  %593 = sbr.rel (%p1244_p7) target bundleno = 348 (0x15c), region = 72 }
  0x1f   : > { %v594_v0 = vld [vmem:[%s1529_s19] sm:$0x1f]  ;;  %vm597_vm0 = vcmask 258048   ;;  %vm694_vm1 = vcmask 126976   ;;  %v1414_v3 = vmov 0.0   ;;  %vm639_vm2 = vcmask 261120  }
  0x20   : > { %v1269_v1 = vld [vmem:[%s555_s22] sm:$0xff]   ;;  %v598_v2 = vsel %vm597_vm0, %v594_v0, 0.0  ;;  %693 = vst.msk [vmem:[#allocation4] sm:$0x1f] %vm597_vm0, %v1414_v3  ;;  %vm627_vm3 = vcmask 256000   ;;  %vm690_vm6 = vcmask 257024  }
  0x21   : > { %695 = vst.msk [vmem:[#allocation5] sm:$0x1f] %vm694_vm1, %v1414_v3  ;;  %v1271_v4 = vunpack.c.h.bf16 %v1269_v1  ;;  %v1270_v5 = vunpack.c.l.bf16 %v1269_v1  ;;  %599 = vadd.xlane.f32.xlu0 %v598_v2  ;;  %v1245_v33 = vld [vmem:[%s1706_s5] ss:$0 sm:$0xff]  ;;  %vm628_vm4 = vsmask.f32 2304 }
  0x22   : > { %v1246_v35 = vld [vmem:[%s1707_s29] ss:$0 sm:$0xff]  ;;  %vm629_vm5 = vmand %vm627_vm3, %vm628_vm4 }
  0x23   : > { %v643_v6 = vsel %vm639_vm2, %v1271_v4, 0.0  ;;  %v640_v7 = vsel %vm639_vm2, %v1270_v5, 0.0  ;;  %v630_v41 = vld [vmem:[#allocation2] sm:$0x7] }
  0x24   : > { %644 = vadd.xlane.f32.xlu1 %v643_v6 }
  0x25   : > { %641 = vadd.xlane.f32.xlu0 %v640_v7 }
  0xaa   : > { %v600_v8 = vpop.xlane.xlu0 %599 }
  0xab   : > { %v602_v9 = vmul.f32 0.03125, %v600_v8 }
  0xad   : > { %v645_v10 = vpop.xlane.xlu1 %644  ;;  %v603_v11 = vsub.f32 %v594_v0, %v602_v9 }
  0xae   : > { %v647_v12 = vmul.f32 0.03125, %v645_v10  ;;  %v642_v13 = vpop.xlane.xlu0 %641 }
  0xaf   : > { %v646_v15 = vmul.f32 0.03125, %v642_v13  ;;  %v604_v16 = vmul.f32 %v603_v11, %v603_v11 }
  0xb0   : > { %v649_v14 = vsub.f32 %v1271_v4, %v647_v12 }
  0xb1   : > { %v648_v17 = vsub.f32 %v1270_v5, %v646_v15  ;;  %v605_v18 = vsel %vm597_vm0, %v604_v16, 0.0 }
  0xb2   : > { %v651_v19 = vmul.f32 %v649_v14, %v649_v14  ;;  %606 = vadd.xlane.f32.xlu1 %v605_v18 }
  0xb3   : > { %v650_v21 = vmul.f32 %v648_v17, %v648_v17 }
  0xb4   : > { %v655_v20 = vsel %vm639_vm2, %v651_v19, 0.0 }
  0xb5   : > { %v652_v22 = vsel %vm639_vm2, %v650_v21, 0.0 }
  0xb6   : > { %656 = vadd.xlane.f32.xlu1 %v655_v20  ;;  %653 = vadd.xlane.f32.xlu0 %v652_v22 }
 0x13b   : > { %v607_v23 = vpop.xlane.xlu1 %606 }
 0x13c   : > { %v608_v24 = vmul.f32 0.03125, %v607_v23 }
 0x13e   : > { %v609_v25 = vadd.f32 1e-05, %v608_v24 }
 0x13f   : > { %v657_v26 = vpop.xlane.xlu1 %656  ;;  %v654_v27 = vpop.xlane.xlu0 %653 }
 0x140   : > { %1363 = vrsqrt.f32 %v609_v25  ;;  %v659_v28 = vmul.f32 0.03125, %v657_v26  ;;  %v658_v29 = vmul.f32 0.03125, %v654_v27 }
 0x142   : > { %v661_v30 = vadd.f32 1e-05, %v659_v28  ;;  %v660_v31 = vadd.f32 1e-05, %v658_v29 }
 0x144   : > { %1365 = vrsqrt.f32 %v661_v30 }
 0x145   : > { %1367 = vrsqrt.f32 %v660_v31 }
 0x14d   : > { %v1364_v32 = vpop.eup %1363 }
 0x14e   : > { %v611_v34 = vmul.f32 %v1364_v32, %v603_v11 }
 0x150   : > { %v618_v36 = vmul.f32 %v1245_v33, %v611_v34 }
 0x151   : > { %v1366_v37 = vpop.eup %1365 }
 0x152   : > { %v1368_v38 = vpop.eup %1367  ;;  %v625_v39 = vadd.f32 %v1246_v35, %v618_v36  ;;  %v665_v40 = vmul.f32 %v1366_v37, %v649_v14 }
 0x153   : > { %v664_v42 = vmul.f32 %v1368_v38, %v648_v17 }
 0x154   : > { %v626_v43 = vpack.c.bf16 %v625_v39, %v625_v39  ;;  %v673_v44 = vmul.f32 %v1245_v33, %v665_v40 }
 0x155   : > { %v672_v45 = vmul.f32 %v1245_v33, %v664_v42 }
 0x156   : > { %v631_v46 = vsel %vm629_vm5, %v626_v43, %v630_v41  ;;  %v681_v47 = vadd.f32 %v1246_v35, %v673_v44 }
 0x157   : > { %632 = vst [vmem:[#allocation2] sm:$0x7] %v631_v46  ;;  %v680_v48 = vadd.f32 %v1246_v35, %v672_v45 }
 0x158   : > { %v1267_v49 = vpack.c.bf16 %v681_v47, %v681_v47 }
 0x159   : > { %v1266_v50 = vpack.c.bf16 %v680_v48, %v680_v48 }
 0x15a   : > { %692 = vst.msk [vmem:[#allocation3 + $0x4] sm:$0xf] %vm690_vm6, %v1267_v49 }
 0x15b   : > { %691 = vst.msk [vmem:[#allocation3] sm:$0xf] %vm690_vm6, %v1266_v50 }
 0x15c PF: > { %vm707_vm7 = vcmask 261120   ;;  %s1708_s21 = scalar_lea.vmem %s1681_s6, %s1536_s23  ;;  %v1415_v52 = vmov 0.0   ;;  %s1709_s28 = scalar_lea.vmem %s1679_s4, %s1536_s23  ;;  %vm1416_vm8 = vmmov 0   ;;  %v1253_v60 = vld [vmem:[%s569_s1] ss:$0 sm:$0xff]  ;;  %vm868_vm9 = vcmask 64512  }
 0x15d   : > { %v754_v51 = vld [vmem:[%s1708_s21] sm:$0xf]  ;;  %1290 = vmatprep.subr.bf16.mxu1 %v1415_v52  ;;  %1284 = vmatprep.subr.bf16.mxu0 %v1415_v52  ;;  %s1710_s27 = sld [smem:[#allocation15_spill]]  ;;  %vm915_vm10 = vcmask 126976   ;;  %vm979_vm11 = vcmask 1043456   ;;  %vm929_vm12 = vcmask 130048  }
 0x15e   : > { %v771_v53 = vsel %vm707_vm7, %v754_v51, 0  ;;  %v699_v54 = vld [vmem:[%s1709_s28] sm:$0xf]  ;;  %1292 = vmatprep.mubr.msk.bf16.mxu1 %vm1416_vm8, %v1415_v52  ;;  %1286 = vmatprep.mubr.msk.bf16.mxu0 %vm1416_vm8, %v1415_v52  ;;  %v1026_v34 = vld [vmem:[#allocation5] sm:$0x1f]  ;;  %vm1024_vm13 = vcmask 258048  }
 0x15f   : > { %1291 = vmatpush3.bf16.xpose.msra.mxu1 %v771_v53  ;;  %v712_v55 = vsel %vm707_vm7, %v699_v54, 0  ;;  %v696_v57 = vld [vmem:[#allocation2] sm:$0x7]  ;;  %v973_v43 = vld [vmem:[#allocation4] sm:$0x1f]  ;;  %p1261_p8 = scmp.ne.s32.totalorder %s1396_s25, 3 }
 0x160   : > { %1285 = vmatpush3.bf16.xpose.msra.mxu0 %v712_v55  ;;  %1302 = vmatprep.subr.bf16.mxu1 %v1415_v52  ;;  %v814_v10 = vld [vmem:[%s573_s14] sm:$0xf] }
 0x161   : > { %1296 = vmatprep.subr.bf16.mxu0 %v1415_v52  ;;  %v823_v11 = vsel %vm707_vm7, %v814_v10, 0  ;;  %v1256_v24 = vld [vmem:[%s576_s26] ss:$0 sm:$0xff]  ;;  %s1712_s26 = sld [smem:[#allocation16_spill]] (!%p1261_p8) }
 0x162   : > { %v1369_v56 = vld [vmem:[#allocation3] sm:$0xff]   ;;  %v975_v30 = vld [vmem:[%s580_s17] sm:$0xf] }
 0x163   : > { %s1711_s29 = scalar_lea.vmem %s1710_s27, %s1521_s15  ;;  %v981_v31 = vsel %vm979_vm11, %v975_v30, 0 }
 0x164   : > { %v1251_v4 = vld [vmem:[%s1711_s29] ss:$0 sm:$0xff] }
 0x166   : > { %1293 = vmatmul.mubr.msk.bf16.vlgmr.msra.gmra.mxu1 %vm707_vm7, %v1369_v56 }
 0x167   : > { %1287 = vmatmul.mubr.msk.bf16.vlgmr.msra.gmra.mxu0 %vm707_vm7, %v696_v57  ;;  %1304 = vmatprep.mubr.msk.bf16.mxu1 %vm1416_vm8, %v1415_v52 }
 0x168   : > { %1298 = vmatprep.mubr.msk.bf16.mxu0 %vm1416_vm8, %v1415_v52  ;;  %1297 = vmatpush3.bf16.xpose.msra.mxu0 %v823_v11 }
 0x169   : > { %1308 = vmatprep.subr.bf16.mxu0 %v1415_v52 }
 0x16f   : > { %1299 = vmatmul.mubr.msk.bf16.vlgmr.msra.gmra.mxu0 %vm707_vm7, %v1369_v56 }
 0x170   : > { %1310 = vmatprep.mubr.msk.bf16.mxu0 %vm1416_vm8, %v1415_v52 }
 0x226   : > { %v807_v58 = vpop.f32.mrf.mxu1 }
 0x227   : > { %v748_v59 = vpop.f32.mrf.mxu0  ;;  %v808_v0 = vadd.f32 %v1253_v60, %v807_v58 }
 0x228   : > { %v1294_v61 = vpop.f32.mrf.mxu1  ;;  %v749_v7 = vadd.f32 %v1251_v4, %v748_v59 }
 0x229   : > { %v1288_v62 = vpop.f32.mrf.mxu0 }
 0x22a   : > { %v810_v63 = vpop.f32.mrf.mxu1  ;;  %v866_v9 = vpack.c.bf16 %v749_v7, %v749_v7 }
 0x22b   : > { %v811_v1 = vadd.f32 %v1253_v60, %v810_v63  ;;  %v751_v2 = vpop.f32.mrf.mxu0 }
 0x22c   : > { %v1295_v3 = vpop.f32.mrf.mxu1 }
 0x22d   : > { %v867_v5 = vpack.c.bf16 %v811_v1, %v808_v0  ;;  %v1289_v6 = vpop.f32.mrf.mxu0 }
 0x22f   : > { %v873_v8 = vsel %vm868_vm9, %v867_v5, 0  ;;  %v859_v17 = vpop.f32.mrf.mxu0 }
 0x230   : > { %1303 = vmatpush3.bf16.xpose.msra.mxu1 %v873_v8  ;;  %v860_v26 = vadd.f32 %v1256_v24, %v859_v17 }
 0x231   : > { %1314 = vmatprep.subr.bf16.mxu1 %v1415_v52  ;;  %v1300_v18 = vpop.f32.mrf.mxu0 }
 0x233   : > { %v862_v25 = vpop.f32.mrf.mxu0 }
 0x234   : > { %v863_v28 = vadd.f32 %v1256_v24, %v862_v25 }
 0x235   : > { %v1301_v27 = vpop.f32.mrf.mxu0 }
 0x236   : > { %v928_v29 = vpack.c.bf16 %v863_v28, %v860_v26 }
 0x237   : > { %1305 = vmatmul.mubr.msk.bf16.vlgmr.msra.gmra.mxu1 %vm868_vm9, %v866_v9 }
 0x238   : > { %1316 = vmatprep.mubr.msk.bf16.mxu1 %vm1416_vm8, %v1415_v52  ;;  %1309 = vmatpush3.bf16.msra.mxu0 %v928_v29 }
 0x239   : > { %1315 = vmatpush3.bf16.msra.mxu1 %v981_v31 }
 0x2f7   : > { %v909_v12 = vpop.f32.mrf.mxu1 }
 0x2f8   : > { %v916_v13 = vsel %vm915_vm10, %v909_v12, -inf }
 0x2f9   : > { %917 = vmax.xlane.f32.xlu0 %v916_v13  ;;  %v1306_v14 = vpop.f32.mrf.mxu1 }
 0x2fb   : > { %v912_v15 = vpop.f32.mrf.mxu1 }
 0x2fd   : > { %v1307_v16 = vpop.f32.mrf.mxu1 }
 0x382   : > { %v918_v19 = vpop.xlane.xlu0 %917 }
 0x383   : > { %v919_v20 = vsub.f32 %v909_v12, %v918_v19 }
 0x385   : > { %v920_v21 = vmul.f32 1.442695, %v919_v20 }
 0x387   : > { %1370 = vpow2.f32 %v920_v21 }
 0x394   : > { %v1371_v22 = vpop.eup %1370 }
 0x395   : > { %v922_v23 = vsel %vm915_vm10, %v1371_v22, 0.0 }
 0x396   : > { %923 = vadd.xlane.f32.xlu0 %v922_v23 }
 0x41f   : > { %v924_v32 = vpop.xlane.xlu0 %923 }
 0x420   : > { %1372 = vrcp.f32 %v924_v32 }
 0x42d   : > { %v1373_v33 = vpop.eup %1372 }
 0x42e   : > { %v926_v35 = vmul.f32 %v1373_v33, %v1371_v22 }
 0x430   : > { %v1027_v36 = vadd.f32 %v1026_v34, %v926_v35  ;;  %v927_v37 = vpack.c.bf16 %v926_v35, %v926_v35 }
 0x432   : > { %1028 = vst.msk [vmem:[#allocation5] sm:$0x1f] %vm915_vm10, %v1027_v36  ;;  %1311 = vmatmul.mubr.msk.bf16.vlgmr.msra.gmra.mxu0 %vm929_vm12, %v927_v37 }
 0x4f2   : > { %v967_v38 = vpop.f32.mrf.mxu0 }
 0x4f3   : > { %v974_v39 = vpack.c.bf16 %v967_v38, %v967_v38 }
 0x4f4   : > { %v1312_v40 = vpop.f32.mrf.mxu0 }
 0x4f5   : > { %1317 = vmatmul.mubr.msk.bf16.vlgmr.msra.gmra.mxu1 %vm868_vm9, %v974_v39 }
 0x4f6   : > { %v970_v41 = vpop.f32.mrf.mxu0 }
 0x4f8   : > { %v1313_v42 = vpop.f32.mrf.mxu0 }
 0x5b5   : > { %v1017_v44 = vpop.f32.mrf.mxu1 }
 0x5b6   : > { %v1023_v45 = vadd.f32 %v1017_v44, %v973_v43 }
 0x5b7   : > { %v1318_v46 = vpop.f32.mrf.mxu1  ;;  %1032 = sbr.rel (%p1261_p8) target bundleno = 1477 (0x5c5), region = 76 }
 0x5b8   : > { %1025 = vst.msk [vmem:[#allocation4] sm:$0x1f] %vm1024_vm13, %v1023_v45 }
 0x5b9   : > { %v1020_v47 = vpop.f32.mrf.mxu1 }
 0x5bb   : > { %v1319_v48 = vpop.f32.mrf.mxu1 }
 0x5bc   : > { %v1033_v49 = vld [vmem:[%s1529_s19] sm:$0x1f]  ;;  %v1045_v53 = vld [vmem:[#allocation5] sm:$0x1f] }
 0x5bd   : > { %v1262_v51 = vld [vmem:[%s1712_s26] ss:$0 sm:$0xff]  ;;  %v1046_v54 = vmul.f32 0.25, %v1045_v53 }
 0x5bf   : > { %v1034_v50 = vld [vmem:[#allocation4] sm:$0x1f]  ;;  %1047 = vst.msk [vmem:[%s588_s20] sm:$0x1f] %vm915_vm10, %v1046_v54 }
 0x5c0   : > { %v1035_v52 = vadd.f32 %v1034_v50, %v1033_v49 }
 0x5c2   : > { %v1043_v55 = vadd.f32 %v1262_v51, %v1035_v52 }
 0x5c4   : > { %1044 = vst.msk [vmem:[%s584_s0] sm:$0x1f] %vm1024_vm13, %v1043_v55 }
 0x5c5 PF: > { %s1713_s19 = sld [smem:[#allocation8_spill]] }
 0x5c6   : > { %s1714_s25 = sld [smem:[#allocation6_spill]] }
 0x5c7   : > { %s1715_s26 = sld [smem:[#allocation7_spill]] }
 0x5c8   : > { %s1716_s27 = sld [smem:[#allocation9_spill]] }
 0x5c9   : > { %s1717_s28 = sld [smem:[#allocation10_spill]] }
 0x5cb   : > { %s24_s29 = sadd.s32 1, %s1713_s19  }
 0x5cc   : > { %p21_p9 = scmp.ge.s32.totalorder %s24_s29, 10  }
 0x5ce   :  { %23 = sbr.rel (!%p21_p9) target bundleno = 7 (0x7), region = 142 }

</bundles_post_ra>
